<compile_context>
chip_gen: v6e
topology: v6e:2x2x1
jax: 0.10.0
libtpu: 0.0.40
codegen_flags: <defaults>
</compile_context>

<pallas_src>
import functools

import jax
import jax.numpy as jnp
from jax.experimental import pallas as pl
from jax.experimental.pallas import tpu as pltpu


def _round_up(x, m):
    return (x + m - 1) // m * m


def _kn_tiles(K, N):
    """Tile/padded sizes for the reduction (K) and output-lane (N) dims."""
    if K < 128:
        Kp = _round_up(K, 8)   # full-K block: exempt from the 128-lane rule
        TK = Kp
    else:
        Kp = _round_up(K, 128)
        TK = next(t for t in (512, 384, 256, 128) if Kp % t == 0)
    TN = min(256, _round_up(N, 128))
    Np = _round_up(N, TN)
    return TK, Kp, TN, Np


# ----------------------------------------------------------------------------
# Shared (phase-batched) tiled GEMM kernel with fused bias + activation.
# ----------------------------------------------------------------------------
def _gemm_bias_act_kernel(x_ref, w_ref, b_ref, o_ref, acc_ref, *, act):
    k = pl.program_id(3)

    @pl.when(k == 0)
    def _():
        acc_ref[...] = jnp.zeros_like(acc_ref)

    # bf16 x bf16 on the MXU with f32 accumulation.
    acc_ref[...] += jnp.dot(x_ref[0], w_ref[0],
                            preferred_element_type=jnp.float32)

    @pl.when(k == pl.num_programs(3) - 1)
    def _():
        y = acc_ref[...] + b_ref[...]
        if act == "relu":
            y = jnp.maximum(y, 0.0)
        elif act == "sigmoid":
            y = jax.nn.sigmoid(y)
        o_ref[0] = y.astype(o_ref.dtype)


def batched_matmul_bias_act(a, wp, bp, n_out, act):
    """out[g] = act(a[g] @ wp[g] + bp) for g in range(G).

    a  : [G, M, K]  (cast to bf16 here)
    wp : [G, Kp, Np] bf16 (pre-padded by _pack_gemm_weight)
    bp : [1, Np]     f32  (pre-padded)
    returns [G, M, n_out] f32
    """
    G, M, K = a.shape
    assert wp.shape[0] == G
    Kp, Np = wp.shape[1], wp.shape[2]
    TK, Kp2, TN, Np2 = _kn_tiles(K, n_out)
    assert Kp2 == Kp and Np2 == Np and Kp % TK == 0 and Np % TN == 0

    TM = min(256, _round_up(M, 8))
    Mp = _round_up(M, TM)
    # v7x megacore: ensure >= 2 parallel tiles when possible (harmless on 1-TC
    # chips; one extra ~0.35us grid step).
    if G * (Mp // TM) * (Np // TN) < 2 and Mp % 16 == 0:
        TM = Mp // 2

    a_p = jnp.pad(a, ((0, 0), (0, Mp - M), (0, Kp - K))).astype(jnp.bfloat16)

    out = pl.pallas_call(
        functools.partial(_gemm_bias_act_kernel, act=act),
        out_shape=jax.ShapeDtypeStruct((G, Mp, Np), jnp.float32),
        grid_spec=pltpu.PrefetchScalarGridSpec(
            num_scalar_prefetch=0,
            grid=(G, Mp // TM, Np // TN, Kp // TK),
            in_specs=[
                pl.BlockSpec((1, TM, TK), lambda g, i, j, k: (g, i, k)),
                pl.BlockSpec((1, TK, TN), lambda g, i, j, k: (g, k, j)),
                pl.BlockSpec((1, TN), lambda g, i, j, k: (0, j)),
            ],
            out_specs=pl.BlockSpec((1, TM, TN), lambda g, i, j, k: (g, i, j)),
            scratch_shapes=[pltpu.VMEM((TM, TN), jnp.float32)],
        ),
        compiler_params=pltpu.CompilerParams(
            dimension_semantics=("parallel", "parallel", "parallel",
                                 "arbitrary")),
    )(a_p, wp, bp)
    return out[:, :M, :n_out]


# ----------------------------------------------------------------------------
# im2col (NHWC, channel-minor / lane-dense columns) + conv wrappers.
# ----------------------------------------------------------------------------
def _im2col_nhwc(x, kh, kw, stride, pads):
    """x: [B,H,W,C] -> patches [B*Ho*Wo, kh*kw*C] (tap-major, C-minor)."""
    B, H, W, C = x.shape
    (pt, pb), (pleft, pright) = pads
    xp = jnp.pad(x, ((0, 0), (pt, pb), (pleft, pright), (0, 0)))
    Ho = (H + pt + pb - kh) // stride + 1
    Wo = (W + pleft + pright - kw) // stride + 1
    cols = []
    for ki in range(kh):
        for kj in range(kw):
            cols.append(xp[:, ki:ki + stride * Ho:stride,
                           kj:kj + stride * Wo:stride, :])
    patches = jnp.concatenate(cols, axis=-1)          # [B,Ho,Wo,kh*kw*C]
    return patches.reshape(B * Ho * Wo, kh * kw * C), Ho, Wo


def conv2d_nhwc(x, wp, bp, *, cout, kh, kw, stride, padding, act):
    """PyTorch-style Conv2d on NHWC activations via im2col + Pallas GEMM."""
    B = x.shape[0]
    patches, Ho, Wo = _im2col_nhwc(
        x, kh, kw, stride, ((padding, padding), (padding, padding)))
    out = batched_matmul_bias_act(patches[None], wp, bp, cout, act)
    return out[0].reshape(B, Ho, Wo, cout)


def conv_transpose2d_nhwc(x, wp, bp, *, cout, act):
    """PyTorch ConvTranspose2d(kernel=4, stride=2, padding=1) via sub-pixel
    phase decomposition: 4 dense stride-1 2x2 convs (one per output phase),
    run as one phase-batched Pallas GEMM, interleaved at the end."""
    B, H, W, _ = x.shape
    phases = []
    for a in (0, 1):
        for b in (0, 1):
            p, _, _ = _im2col_nhwc(x, 2, 2, 1, ((1 - a, a), (1 - b, b)))
            phases.append(p)
    patches = jnp.stack(phases, axis=0)               # [4, B*H*W, 4*Cin]
    out = batched_matmul_bias_act(patches, wp, bp, cout, act)  # [4,B*H*W,Cout]
    out = out.reshape(2, 2, B, H, W, cout).transpose(2, 3, 0, 4, 1, 5)
    return out.reshape(B, 2 * H, 2 * W, cout)


# ----------------------------------------------------------------------------
# Vector quantizer kernel (f32 distances, MXU gather-by-matmul).
# ----------------------------------------------------------------------------
def _vq_kernel(z_ref, cbt_ref, cb_ref, cbsq_ref, q_ref, cnt_ref, *, tm, n_valid):
    i = pl.program_id(0)
    z = z_ref[...]                                                  # (TM, D)

    # distances = ||z||^2 + ||e||^2 - 2 z @ E^T
    scores = jnp.dot(z, cbt_ref[...], preferred_element_type=jnp.float32)
    z_sq = jnp.sum(z * z, axis=1, keepdims=True)
    dist = z_sq + cbsq_ref[...] - 2.0 * scores                      # (TM, K)

    K = dist.shape[1]
    iota_k = jax.lax.broadcasted_iota(jnp.int32, dist.shape, 1)
    min_d = jnp.min(dist, axis=1, keepdims=True)
    # first-occurrence argmin (matches torch.argmin tie-breaking)
    idx = jnp.min(jnp.where(dist <= min_d, iota_k, K), axis=1, keepdims=True)
    onehot = (iota_k == idx).astype(jnp.float32)                    # (TM, K)

    # per-block codebook counts; mask padded rows
    row = i * tm + jax.lax.broadcasted_iota(jnp.int32, (tm, 1), 0)
    valid = (row < n_valid).astype(jnp.float32)
    cnt_row = jnp.sum(onehot * valid, axis=0, keepdims=True)        # (1, K)
    rows8 = jax.lax.broadcasted_iota(jnp.int32, (8, K), 0)
    cnt_ref[0] = jnp.where(rows8 == 0, cnt_row, 0.0)                # (8, K)

    # quantized = onehot @ E (matches the PyTorch reference exactly)
    q = jnp.dot(onehot, cb_ref[...], preferred_element_type=jnp.float32)
    q_ref[...] = q.astype(q_ref.dtype)


def vector_quantize_pallas(z, pp, commitment_cost):
    """z: encoder output in NCHW [B, D, H, W]; flattened exactly like the
    PyTorch module's `z.view(-1, embedding_dim)`."""
    cb, cbt, cbsq = pp["codebook"], pp["codebook_t"], pp["codebook_sq"]
    Kn, D = cb.shape
    flat = z.reshape(-1, D).astype(jnp.float32)
    N = flat.shape[0]

    TM = min(128, _round_up(N, 8))
    Np = _round_up(N, TM)
    G = Np // TM
    flat_p = jnp.pad(flat, ((0, Np - N), (0, 0)))

    quant_p, counts = pl.pallas_call(
        functools.partial(_vq_kernel, tm=TM, n_valid=N),
        out_shape=(jax.ShapeDtypeStruct((Np, D), jnp.float32),
                   jax.ShapeDtypeStruct((G, 8, Kn), jnp.float32)),
        grid_spec=pltpu.PrefetchScalarGridSpec(
            num_scalar_prefetch=0,
            grid=(G,),
            in_specs=[
                pl.BlockSpec((TM, D), lambda i: (i, 0)),
                pl.BlockSpec((D, Kn), lambda i: (0, 0)),
                pl.BlockSpec((Kn, D), lambda i: (0, 0)),
                pl.BlockSpec((1, Kn), lambda i: (0, 0)),
            ],
            out_specs=(pl.BlockSpec((TM, D), lambda i: (i, 0)),
                       pl.BlockSpec((1, 8, Kn), lambda i: (i, 0, 0))),
        ),
        compiler_params=pltpu.CompilerParams(
            dimension_semantics=("parallel",)),
    )(flat_p, cbt, cb, cbsq)

    quantized = quant_p[:N].reshape(z.shape)
    counts = jnp.sum(counts, axis=(0, 1))                           # [K]

    z32 = z.astype(jnp.float32)
    mse = jnp.mean((quantized - z32) ** 2)
    vq_loss = (1.0 + commitment_cost) * mse
    quantized_st = z32 + jax.lax.stop_gradient(quantized - z32)
    avg_probs = counts / N
    perplexity = jnp.exp(-jnp.sum(avg_probs * jnp.log(avg_probs + 1e-10)))
    return {"quantized": quantized_st, "vq_loss": vq_loss,
            "perplexity": perplexity}


# ----------------------------------------------------------------------------
# One-time parameter preparation (weight reshape / phase-slice / pad, bf16).
# ----------------------------------------------------------------------------
def _pack_gemm_weight(wmats, b):
    """wmats: [G, K, N] f32; b: [N] f32 -> (wp bf16 [G,Kp,Np], bp f32 [1,Np])."""
    G, K, N = wmats.shape
    _, Kp, _, Np = _kn_tiles(K, N)
    wp = jnp.pad(wmats, ((0, 0), (0, Kp - K), (0, Np - N))).astype(jnp.bfloat16)
    bp = jnp.pad(b.reshape(1, -1), ((0, 0), (0, Np - N))).astype(jnp.float32)
    return wp, bp


def prepare_params(params):
    pp = {}

    def conv(name, w, b):
        cout, cin, kh, kw = w.shape
        # tap-major, channel-minor rows to match the NHWC im2col columns
        wmat = w.transpose(2, 3, 1, 0).reshape(1, kh * kw * cin, cout)
        pp[name + "_w"], pp[name + "_b"] = _pack_gemm_weight(wmat, b)

    def convt(name, w, b):
        # w: [Cin, Cout, 4, 4] (PyTorch ConvTranspose2d layout); build the 4
        # per-phase 2x2 forward-conv weights (stride-2, padding-1 transpose).
        cin, cout = w.shape[0], w.shape[1]
        mats = []
        for a in (0, 1):
            kys = jnp.array((3, 1) if a == 0 else (2, 0))
            for bb in (0, 1):
                kxs = jnp.array((3, 1) if bb == 0 else (2, 0))
                wsub = w[:, :, kys, :][:, :, :, kxs]        # [Cin,Cout,2,2]
                mats.append(wsub.transpose(2, 3, 0, 1).reshape(4 * cin, cout))
        pp[name + "_w"], pp[name + "_b"] = _pack_gemm_weight(jnp.stack(mats, 0), b)

    conv("enc1", params["enc1_w"], params["enc1_b"])
    conv("enc2", params["enc2_w"], params["enc2_b"])
    conv("enc3", params["enc3_w"], params["enc3_b"])
    convt("dec1", params["dec1_w"], params["dec1_b"])
    convt("dec2", params["dec2_w"], params["dec2_b"])
    conv("dec3", params["dec3_w"], params["dec3_b"])

    cb = params["codebook"].astype(jnp.float32)
    pp["codebook"] = cb
    pp["codebook_t"] = cb.T
    pp["codebook_sq"] = jnp.sum(cb * cb, axis=1)[None, :]
    return pp


# ----------------------------------------------------------------------------
# VQVAE forward (activations kept NHWC between conv layers).
# ----------------------------------------------------------------------------
def vqvae_forward(pp, x, *, commitment_cost=0.25):
    xh = x.transpose(0, 2, 3, 1)                                   # NCHW->NHWC
    h = conv2d_nhwc(xh, pp["enc1_w"], pp["enc1_b"], cout=128,
                    kh=4, kw=4, stride=2, padding=1, act="relu")
    h = conv2d_nhwc(h, pp["enc2_w"], pp["enc2_b"], cout=256,
                    kh=4, kw=4, stride=2, padding=1, act="relu")
    z_e = conv2d_nhwc(h, pp["enc3_w"], pp["enc3_b"], cout=64,
                      kh=3, kw=3, stride=1, padding=1, act=None)

    z_e_nchw = z_e.transpose(0, 3, 1, 2)
    vq = vector_quantize_pallas(z_e_nchw, pp, commitment_cost)
    z_q = vq["quantized"]                                          # NCHW

    h = conv_transpose2d_nhwc(z_q.transpose(0, 2, 3, 1),
                              pp["dec1_w"], pp["dec1_b"], cout=256, act="relu")
    h = conv_transpose2d_nhwc(h, pp["dec2_w"], pp["dec2_b"], cout=128,
                              act="relu")
    xr = conv2d_nhwc(h, pp["dec3_w"], pp["dec3_b"], cout=3,
                     kh=3, kw=3, stride=1, padding=1, act="sigmoid")
    return {"quantized": z_q, "vq_loss": vq["vq_loss"],
            "perplexity": vq["perplexity"],
            "reconstructed": xr.transpose(0, 3, 1, 2)}


# ----------------------------------------------------------------------------
# Pure-JAX reference (same operand precision: bf16 operands, f32 accumulation).
# ----------------------------------------------------------------------------
def _reference_forward(params, x, commitment_cost):
    dn = ("NCHW", "OIHW", "NCHW")
    bf = jnp.bfloat16

    def conv(x, w, b, s, p):
        y = jax.lax.conv_general_dilated(
            x.astype(bf), w.astype(bf), (s, s), [(p, p), (p, p)],
            dimension_numbers=dn, preferred_element_type=jnp.float32)
        return y + b[None, :, None, None]

    def convt(x, w, b, s, p):
        k = w.shape[2]
        weq = jnp.flip(w, (2, 3)).transpose(1, 0, 2, 3)
        y = jax.lax.conv_general_dilated(
            x.astype(bf), weq.astype(bf), (1, 1),
            [(k - 1 - p, k - 1 - p)] * 2, lhs_dilation=(s, s),
            dimension_numbers=dn, preferred_element_type=jnp.float32)
        return y + b[None, :, None, None]

    h = jax.nn.relu(conv(x, params["enc1_w"], params["enc1_b"], 2, 1))
    h = jax.nn.relu(conv(h, params["enc2_w"], params["enc2_b"], 2, 1))
    z_e = conv(h, params["enc3_w"], params["enc3_b"], 1, 1)

    cb = params["codebook"]
    D = cb.shape[1]
    flat = z_e.reshape(-1, D)
    dist = (jnp.sum(flat ** 2, 1, keepdims=True) + jnp.sum(cb ** 2, 1)
            - 2.0 * flat @ cb.T)
    idx = jnp.argmin(dist, axis=1)
    enc = jax.nn.one_hot(idx, cb.shape[0], dtype=jnp.float32)
    q = (enc @ cb).reshape(z_e.shape)
    mse = jnp.mean((q - z_e) ** 2)
    vq_loss = (1.0 + commitment_cost) * mse
    avg = jnp.mean(enc, axis=0)
    perp = jnp.exp(-jnp.sum(avg * jnp.log(avg + 1e-10)))

    h = jax.nn.relu(convt(q, params["dec1_w"], params["dec1_b"], 2, 1))
    h = jax.nn.relu(convt(h, params["dec2_w"], params["dec2_b"], 2, 1))
    x_recon = jax.nn.sigmoid(conv(h, params["dec3_w"], params["dec3_b"], 1, 1))
    return {"quantized": q, "vq_loss": vq_loss, "perplexity": perp,
            "reconstructed": x_recon}


if __name__ == "__main__":
    key = jax.random.PRNGKey(0)
    ks = jax.random.split(key, 14)

    B, H, W = 2, 16, 16
    num_embeddings, embedding_dim, commitment_cost = 512, 64, 0.25

    def conv_w(k, cout, cin, kh, kw):
        return (jax.random.normal(k, (cout, cin, kh, kw), jnp.float32)
                / jnp.sqrt(cin * kh * kw))

    def convt_w(k, cin, cout, kh, kw):   # PyTorch ConvTranspose2d layout
        return (jax.random.normal(k, (cin, cout, kh, kw), jnp.float32)
                / jnp.sqrt(cin * kh * kw))

    def bias(k, c):
        return 0.01 * jax.random.normal(k, (c,), jnp.float32)

    params = {
        "enc1_w": conv_w(ks[0], 128, 3, 4, 4),   "enc1_b": bias(ks[1], 128),
        "enc2_w": conv_w(ks[2], 256, 128, 4, 4), "enc2_b": bias(ks[3], 256),
        "enc3_w": conv_w(ks[4], embedding_dim, 256, 3, 3),
        "enc3_b": bias(ks[5], embedding_dim),
        "codebook": jax.random.uniform(
            ks[6], (num_embeddings, embedding_dim),
            minval=-1.0 / num_embeddings, maxval=1.0 / num_embeddings),
        "dec1_w": convt_w(ks[7], embedding_dim, 256, 4, 4),
        "dec1_b": bias(ks[8], 256),
        "dec2_w": convt_w(ks[9], 256, 128, 4, 4), "dec2_b": bias(ks[10], 128),
        "dec3_w": conv_w(ks[11], 3, 128, 3, 3),   "dec3_b": bias(ks[12], 3),
    }
    x = jax.random.uniform(ks[13], (B, 3, H, W), jnp.float32)

    prep = prepare_params(params)   # one-time weight packing (hoisted)
    fwd = jax.jit(functools.partial(vqvae_forward,
                                    commitment_cost=commitment_cost))
    out = fwd(prep, x)
    jax.block_until_ready(out)

    ref = _reference_forward(params, x, commitment_cost)
    assert out["reconstructed"].shape == (B, 3, H, W)
    assert jnp.allclose(out["reconstructed"], ref["reconstructed"],
                        atol=5e-3, rtol=5e-3)
    assert jnp.allclose(out["quantized"], ref["quantized"],
                        atol=5e-3, rtol=5e-3)
    assert jnp.allclose(out["vq_loss"], ref["vq_loss"], atol=5e-3, rtol=5e-3)
    assert jnp.allclose(out["perplexity"], ref["perplexity"],
                        atol=1e-2, rtol=2e-2)

    print("KERNEL_OK")
</pallas_src>

<mosaic_0001>
module attributes {stable_mosaic.version = 11 : i64} {
  func.func @_gemm_bias_act_kernel(%arg0: i32, %arg1: i32, %arg2: i32, %arg3: i32, %arg4: memref<1x64x48xbf16, #tpu.memory_space<vmem>>, %arg5: memref<1x48x128xbf16, #tpu.memory_space<vmem>>, %arg6: memref<1x128xf32, #tpu.memory_space<vmem>>, %arg7: memref<1x64x128xf32, #tpu.memory_space<vmem>>, %arg8: memref<64x128xf32, #tpu.memory_space<vmem>>) attributes {dimension_semantics = [#tpu.dimension_semantics<parallel>, #tpu.dimension_semantics<parallel>, #tpu.dimension_semantics<parallel>, #tpu.dimension_semantics<arbitrary>], iteration_bounds = array<i64: 1, 2, 1, 1>, scalar_prefetch = 0 : i64, scratch_operands = 1 : i64, tpu.core_type = #tpu.core_type<tc>, window_params = [{transform_indices = @transform_0, window_bounds = array<i64: 1, 64, 48>}, {transform_indices = @transform_1, window_bounds = array<i64: 1, 48, 128>}, {transform_indices = @transform_2, window_bounds = array<i64: 1, 128>}, {transform_indices = @transform_3, window_bounds = array<i64: 1, 64, 128>}]} {
    %c0_i32 = arith.constant 0 : i32
    %0 = arith.cmpi eq, %arg3, %c0_i32 : i32
    %1 = arith.extui %0 : i1 to i32
    %c0_i32_0 = arith.constant 0 : i32
    %2 = arith.cmpi ne, %1, %c0_i32_0 : i32
    scf.if %2 {
      %cst_12 = arith.constant 0.000000e+00 : f32
      %14 = vector.broadcast %cst_12 : f32 to vector<64x128xf32>
      %c0_13 = arith.constant 0 : index
      %c0_14 = arith.constant 0 : index
      %15 = vector.load %arg8[%c0_13, %c0_14] : memref<64x128xf32, #tpu.memory_space<vmem>>, vector<64x128xf32>
      tpu.vector_store %arg8[%c0_13, %c0_14], %14 {strides = array<i32>} : memref<64x128xf32, #tpu.memory_space<vmem>>, vector<64x128xf32>,
    } else {
    }
    %c0 = arith.constant 0 : index
    %c0_1 = arith.constant 0 : index
    %3 = vector.load %arg8[%c0, %c0_1] : memref<64x128xf32, #tpu.memory_space<vmem>>, vector<64x128xf32>
    %c0_2 = arith.constant 0 : index
    %c0_3 = arith.constant 0 : index
    %c0_4 = arith.constant 0 : index
    %4 = vector.load %arg4[%c0_2, %c0_3, %c0_4] : memref<1x64x48xbf16, #tpu.memory_space<vmem>>, vector<1x64x48xbf16>
    %5 = vector.shape_cast %4 : vector<1x64x48xbf16> to vector<64x48xbf16>
    %c0_5 = arith.constant 0 : index
    %c0_6 = arith.constant 0 : index
    %c0_7 = arith.constant 0 : index
    %6 = vector.load %arg5[%c0_5, %c0_6, %c0_7] : memref<1x48x128xbf16, #tpu.memory_space<vmem>>, vector<1x48x128xbf16>
    %7 = vector.shape_cast %6 : vector<1x48x128xbf16> to vector<48x128xbf16>
    %cst = arith.constant dense<0.000000e+00> : vector<64x128xf32>
    %8 = tpu.matmul %5, %7, %cst {dimension_numbers = #tpu.dot_dimension_numbers<[1], [0], [0], [1], [0, 0, 1, 1], [], []>} : vector<64x48xbf16>, vector<48x128xbf16>, vector<64x128xf32> -> vector<64x128xf32>
    %9 = arith.addf %3, %8 : vector<64x128xf32>
    %c0_8 = arith.constant 0 : index
    %c0_9 = arith.constant 0 : index
    %10 = vector.load %arg8[%c0_8, %c0_9] : memref<64x128xf32, #tpu.memory_space<vmem>>, vector<64x128xf32>
    tpu.vector_store %arg8[%c0_8, %c0_9], %9 {strides = array<i32>} : memref<64x128xf32, #tpu.memory_space<vmem>>, vector<64x128xf32>,
    %c0_i32_10 = arith.constant 0 : i32
    %11 = arith.cmpi eq, %arg3, %c0_i32_10 : i32
    %12 = arith.extui %11 : i1 to i32
    %c0_i32_11 = arith.constant 0 : i32
    %13 = arith.cmpi ne, %12, %c0_i32_11 : i32
    scf.if %13 {
      %c0_12 = arith.constant 0 : index
      %c0_13 = arith.constant 0 : index
      %14 = vector.load %arg8[%c0_12, %c0_13] : memref<64x128xf32, #tpu.memory_space<vmem>>, vector<64x128xf32>
      %c0_14 = arith.constant 0 : index
      %c0_15 = arith.constant 0 : index
      %15 = vector.load %arg6[%c0_14, %c0_15] : memref<1x128xf32, #tpu.memory_space<vmem>>, vector<1x128xf32>
      %16 = vector.broadcast %15 : vector<1x128xf32> to vector<64x128xf32>
      %17 = arith.addf %14, %16 : vector<64x128xf32>
      %cst_16 = arith.constant 0.000000e+00 : f32
      %18 = vector.broadcast %cst_16 : f32 to vector<64x128xf32>
      %19 = arith.maximumf %17, %18 : vector<64x128xf32>
      %c0_17 = arith.constant 0 : index
      %c0_18 = arith.constant 0 : index
      %c0_19 = arith.constant 0 : index
      %20 = vector.load %arg7[%c0_17, %c0_18, %c0_19] : memref<1x64x128xf32, #tpu.memory_space<vmem>>, vector<1x64x128xf32>
      %21 = vector.shape_cast %20 : vector<1x64x128xf32> to vector<64x128xf32>
      %22 = vector.shape_cast %19 : vector<64x128xf32> to vector<1x64x128xf32>
      tpu.vector_store %arg7[%c0_17, %c0_18, %c0_19], %22 {strides = array<i32>} : memref<1x64x128xf32, #tpu.memory_space<vmem>>, vector<1x64x128xf32>,
    } else {
    }
    return
  }
  func.func @transform_0(%arg0: i32, %arg1: i32, %arg2: i32, %arg3: i32) -> (i32, i32, i32) {
    %c0_i32 = arith.constant 0 : i32
    return %arg0, %arg1, %arg3 : i32, i32, i32
  }
  func.func @transform_1(%arg0: i32, %arg1: i32, %arg2: i32, %arg3: i32) -> (i32, i32, i32) {
    %c0_i32 = arith.constant 0 : i32
    return %arg0, %arg3, %arg2 : i32, i32, i32
  }
  func.func @transform_2(%arg0: i32, %arg1: i32, %arg2: i32, %arg3: i32) -> (i32, i32) {
    %c0_i32 = arith.constant 0 : i32
    %c0_i32_0 = arith.constant 0 : i32
    return %c0_i32, %arg2 : i32, i32
  }
  func.func @transform_3(%arg0: i32, %arg1: i32, %arg2: i32, %arg3: i32) -> (i32, i32, i32) {
    %c0_i32 = arith.constant 0 : i32
    return %arg0, %arg1, %arg2 : i32, i32, i32
  }
}

module attributes {stable_mosaic.version = 11 : i64} {
  func.func @_gemm_bias_act_kernel(%arg0: i32, %arg1: i32, %arg2: i32, %arg3: i32, %arg4: memref<1x16x512xbf16, #tpu.memory_space<vmem>>, %arg5: memref<1x512x256xbf16, #tpu.memory_space<vmem>>, %arg6: memref<1x256xf32, #tpu.memory_space<vmem>>, %arg7: memref<1x16x256xf32, #tpu.memory_space<vmem>>, %arg8: memref<16x256xf32, #tpu.memory_space<vmem>>) attributes {dimension_semantics = [#tpu.dimension_semantics<parallel>, #tpu.dimension_semantics<parallel>, #tpu.dimension_semantics<parallel>, #tpu.dimension_semantics<arbitrary>], iteration_bounds = array<i64: 1, 2, 1, 4>, scalar_prefetch = 0 : i64, scratch_operands = 1 : i64, tpu.core_type = #tpu.core_type<tc>, window_params = [{transform_indices = @transform_0, window_bounds = array<i64: 1, 16, 512>}, {transform_indices = @transform_1, window_bounds = array<i64: 1, 512, 256>}, {transform_indices = @transform_2, window_bounds = array<i64: 1, 256>}, {transform_indices = @transform_3, window_bounds = array<i64: 1, 16, 256>}]} {
    %c0_i32 = arith.constant 0 : i32
    %0 = arith.cmpi eq, %arg3, %c0_i32 : i32
    %1 = arith.extui %0 : i1 to i32
    %c0_i32_0 = arith.constant 0 : i32
    %2 = arith.cmpi ne, %1, %c0_i32_0 : i32
    scf.if %2 {
      %cst_11 = arith.constant 0.000000e+00 : f32
      %14 = vector.broadcast %cst_11 : f32 to vector<16x256xf32>
      %c0_12 = arith.constant 0 : index
      %c0_13 = arith.constant 0 : index
      %15 = vector.load %arg8[%c0_12, %c0_13] : memref<16x256xf32, #tpu.memory_space<vmem>>, vector<16x256xf32>
      tpu.vector_store %arg8[%c0_12, %c0_13], %14 {strides = array<i32>} : memref<16x256xf32, #tpu.memory_space<vmem>>, vector<16x256xf32>,
    } else {
    }
    %c0 = arith.constant 0 : index
    %c0_1 = arith.constant 0 : index
    %3 = vector.load %arg8[%c0, %c0_1] : memref<16x256xf32, #tpu.memory_space<vmem>>, vector<16x256xf32>
    %c0_2 = arith.constant 0 : index
    %c0_3 = arith.constant 0 : index
    %c0_4 = arith.constant 0 : index
    %4 = vector.load %arg4[%c0_2, %c0_3, %c0_4] : memref<1x16x512xbf16, #tpu.memory_space<vmem>>, vector<1x16x512xbf16>
    %5 = vector.shape_cast %4 : vector<1x16x512xbf16> to vector<16x512xbf16>
    %c0_5 = arith.constant 0 : index
    %c0_6 = arith.constant 0 : index
    %c0_7 = arith.constant 0 : index
    %6 = vector.load %arg5[%c0_5, %c0_6, %c0_7] : memref<1x512x256xbf16, #tpu.memory_space<vmem>>, vector<1x512x256xbf16>
    %7 = vector.shape_cast %6 : vector<1x512x256xbf16> to vector<512x256xbf16>
    %cst = arith.constant dense<0.000000e+00> : vector<16x256xf32>
    %8 = tpu.matmul %5, %7, %cst {dimension_numbers = #tpu.dot_dimension_numbers<[1], [0], [0], [1], [0, 0, 1, 1], [], []>} : vector<16x512xbf16>, vector<512x256xbf16>, vector<16x256xf32> -> vector<16x256xf32>
    %9 = arith.addf %3, %8 : vector<16x256xf32>
    %c0_8 = arith.constant 0 : index
    %c0_9 = arith.constant 0 : index
    %10 = vector.load %arg8[%c0_8, %c0_9] : memref<16x256xf32, #tpu.memory_space<vmem>>, vector<16x256xf32>
    tpu.vector_store %arg8[%c0_8, %c0_9], %9 {strides = array<i32>} : memref<16x256xf32, #tpu.memory_space<vmem>>, vector<16x256xf32>,
    %c3_i32 = arith.constant 3 : i32
    %11 = arith.cmpi eq, %arg3, %c3_i32 : i32
    %12 = arith.extui %11 : i1 to i32
    %c0_i32_10 = arith.constant 0 : i32
    %13 = arith.cmpi ne, %12, %c0_i32_10 : i32
    scf.if %13 {
      %c0_11 = arith.constant 0 : index
      %c0_12 = arith.constant 0 : index
      %14 = vector.load %arg8[%c0_11, %c0_12] : memref<16x256xf32, #tpu.memory_space<vmem>>, vector<16x256xf32>
      %c0_13 = arith.constant 0 : index
      %c0_14 = arith.constant 0 : index
      %15 = vector.load %arg6[%c0_13, %c0_14] : memref<1x256xf32, #tpu.memory_space<vmem>>, vector<1x256xf32>
      %16 = vector.broadcast %15 : vector<1x256xf32> to vector<16x256xf32>
      %17 = arith.addf %14, %16 : vector<16x256xf32>
      %cst_15 = arith.constant 0.000000e+00 : f32
      %18 = vector.broadcast %cst_15 : f32 to vector<16x256xf32>
      %19 = arith.maximumf %17, %18 : vector<16x256xf32>
      %c0_16 = arith.constant 0 : index
      %c0_17 = arith.constant 0 : index
      %c0_18 = arith.constant 0 : index
      %20 = vector.load %arg7[%c0_16, %c0_17, %c0_18] : memref<1x16x256xf32, #tpu.memory_space<vmem>>, vector<1x16x256xf32>
      %21 = vector.shape_cast %20 : vector<1x16x256xf32> to vector<16x256xf32>
      %22 = vector.shape_cast %19 : vector<16x256xf32> to vector<1x16x256xf32>
      tpu.vector_store %arg7[%c0_16, %c0_17, %c0_18], %22 {strides = array<i32>} : memref<1x16x256xf32, #tpu.memory_space<vmem>>, vector<1x16x256xf32>,
    } else {
    }
    return
  }
  func.func @transform_0(%arg0: i32, %arg1: i32, %arg2: i32, %arg3: i32) -> (i32, i32, i32) {
    %c0_i32 = arith.constant 0 : i32
    return %arg0, %arg1, %arg3 : i32, i32, i32
  }
  func.func @transform_1(%arg0: i32, %arg1: i32, %arg2: i32, %arg3: i32) -> (i32, i32, i32) {
    %c0_i32 = arith.constant 0 : i32
    return %arg0, %arg3, %arg2 : i32, i32, i32
  }
  func.func @transform_2(%arg0: i32, %arg1: i32, %arg2: i32, %arg3: i32) -> (i32, i32) {
    %c0_i32 = arith.constant 0 : i32
    %c0_i32_0 = arith.constant 0 : i32
    return %c0_i32, %arg2 : i32, i32
  }
  func.func @transform_3(%arg0: i32, %arg1: i32, %arg2: i32, %arg3: i32) -> (i32, i32, i32) {
    %c0_i32 = arith.constant 0 : i32
    return %arg0, %arg1, %arg2 : i32, i32, i32
  }
}

module attributes {stable_mosaic.version = 11 : i64} {
  func.func @_gemm_bias_act_kernel(%arg0: i32, %arg1: i32, %arg2: i32, %arg3: i32, %arg4: memref<1x16x384xbf16, #tpu.memory_space<vmem>>, %arg5: memref<1x384x128xbf16, #tpu.memory_space<vmem>>, %arg6: memref<1x128xf32, #tpu.memory_space<vmem>>, %arg7: memref<1x16x128xf32, #tpu.memory_space<vmem>>, %arg8: memref<16x128xf32, #tpu.memory_space<vmem>>) attributes {dimension_semantics = [#tpu.dimension_semantics<parallel>, #tpu.dimension_semantics<parallel>, #tpu.dimension_semantics<parallel>, #tpu.dimension_semantics<arbitrary>], iteration_bounds = array<i64: 1, 2, 1, 6>, scalar_prefetch = 0 : i64, scratch_operands = 1 : i64, tpu.core_type = #tpu.core_type<tc>, window_params = [{transform_indices = @transform_0, window_bounds = array<i64: 1, 16, 384>}, {transform_indices = @transform_1, window_bounds = array<i64: 1, 384, 128>}, {transform_indices = @transform_2, window_bounds = array<i64: 1, 128>}, {transform_indices = @transform_3, window_bounds = array<i64: 1, 16, 128>}]} {
    %c0_i32 = arith.constant 0 : i32
    %0 = arith.cmpi eq, %arg3, %c0_i32 : i32
    %1 = arith.extui %0 : i1 to i32
    %c0_i32_0 = arith.constant 0 : i32
    %2 = arith.cmpi ne, %1, %c0_i32_0 : i32
    scf.if %2 {
      %cst_11 = arith.constant 0.000000e+00 : f32
      %14 = vector.broadcast %cst_11 : f32 to vector<16x128xf32>
      %c0_12 = arith.constant 0 : index
      %c0_13 = arith.constant 0 : index
      %15 = vector.load %arg8[%c0_12, %c0_13] : memref<16x128xf32, #tpu.memory_space<vmem>>, vector<16x128xf32>
      tpu.vector_store %arg8[%c0_12, %c0_13], %14 {strides = array<i32>} : memref<16x128xf32, #tpu.memory_space<vmem>>, vector<16x128xf32>,
    } else {
    }
    %c0 = arith.constant 0 : index
    %c0_1 = arith.constant 0 : index
    %3 = vector.load %arg8[%c0, %c0_1] : memref<16x128xf32, #tpu.memory_space<vmem>>, vector<16x128xf32>
    %c0_2 = arith.constant 0 : index
    %c0_3 = arith.constant 0 : index
    %c0_4 = arith.constant 0 : index
    %4 = vector.load %arg4[%c0_2, %c0_3, %c0_4] : memref<1x16x384xbf16, #tpu.memory_space<vmem>>, vector<1x16x384xbf16>
    %5 = vector.shape_cast %4 : vector<1x16x384xbf16> to vector<16x384xbf16>
    %c0_5 = arith.constant 0 : index
    %c0_6 = arith.constant 0 : index
    %c0_7 = arith.constant 0 : index
    %6 = vector.load %arg5[%c0_5, %c0_6, %c0_7] : memref<1x384x128xbf16, #tpu.memory_space<vmem>>, vector<1x384x128xbf16>
    %7 = vector.shape_cast %6 : vector<1x384x128xbf16> to vector<384x128xbf16>
    %cst = arith.constant dense<0.000000e+00> : vector<16x128xf32>
    %8 = tpu.matmul %5, %7, %cst {dimension_numbers = #tpu.dot_dimension_numbers<[1], [0], [0], [1], [0, 0, 1, 1], [], []>} : vector<16x384xbf16>, vector<384x128xbf16>, vector<16x128xf32> -> vector<16x128xf32>
    %9 = arith.addf %3, %8 : vector<16x128xf32>
    %c0_8 = arith.constant 0 : index
    %c0_9 = arith.constant 0 : index
    %10 = vector.load %arg8[%c0_8, %c0_9] : memref<16x128xf32, #tpu.memory_space<vmem>>, vector<16x128xf32>
    tpu.vector_store %arg8[%c0_8, %c0_9], %9 {strides = array<i32>} : memref<16x128xf32, #tpu.memory_space<vmem>>, vector<16x128xf32>,
    %c5_i32 = arith.constant 5 : i32
    %11 = arith.cmpi eq, %arg3, %c5_i32 : i32
    %12 = arith.extui %11 : i1 to i32
    %c0_i32_10 = arith.constant 0 : i32
    %13 = arith.cmpi ne, %12, %c0_i32_10 : i32
    scf.if %13 {
      %c0_11 = arith.constant 0 : index
      %c0_12 = arith.constant 0 : index
      %14 = vector.load %arg8[%c0_11, %c0_12] : memref<16x128xf32, #tpu.memory_space<vmem>>, vector<16x128xf32>
      %c0_13 = arith.constant 0 : index
      %c0_14 = arith.constant 0 : index
      %15 = vector.load %arg6[%c0_13, %c0_14] : memref<1x128xf32, #tpu.memory_space<vmem>>, vector<1x128xf32>
      %16 = vector.broadcast %15 : vector<1x128xf32> to vector<16x128xf32>
      %17 = arith.addf %14, %16 : vector<16x128xf32>
      %c0_15 = arith.constant 0 : index
      %c0_16 = arith.constant 0 : index
      %c0_17 = arith.constant 0 : index
      %18 = vector.load %arg7[%c0_15, %c0_16, %c0_17] : memref<1x16x128xf32, #tpu.memory_space<vmem>>, vector<1x16x128xf32>
      %19 = vector.shape_cast %18 : vector<1x16x128xf32> to vector<16x128xf32>
      %20 = vector.shape_cast %17 : vector<16x128xf32> to vector<1x16x128xf32>
      tpu.vector_store %arg7[%c0_15, %c0_16, %c0_17], %20 {strides = array<i32>} : memref<1x16x128xf32, #tpu.memory_space<vmem>>, vector<1x16x128xf32>,
    } else {
    }
    return
  }
  func.func @transform_0(%arg0: i32, %arg1: i32, %arg2: i32, %arg3: i32) -> (i32, i32, i32) {
    %c0_i32 = arith.constant 0 : i32
    return %arg0, %arg1, %arg3 : i32, i32, i32
  }
  func.func @transform_1(%arg0: i32, %arg1: i32, %arg2: i32, %arg3: i32) -> (i32, i32, i32) {
    %c0_i32 = arith.constant 0 : i32
    return %arg0, %arg3, %arg2 : i32, i32, i32
  }
  func.func @transform_2(%arg0: i32, %arg1: i32, %arg2: i32, %arg3: i32) -> (i32, i32) {
    %c0_i32 = arith.constant 0 : i32
    %c0_i32_0 = arith.constant 0 : i32
    return %c0_i32, %arg2 : i32, i32
  }
  func.func @transform_3(%arg0: i32, %arg1: i32, %arg2: i32, %arg3: i32) -> (i32, i32, i32) {
    %c0_i32 = arith.constant 0 : i32
    return %arg0, %arg1, %arg2 : i32, i32, i32
  }
}

module attributes {stable_mosaic.version = 11 : i64} {
  func.func @_vq_kernel(%arg0: i32, %arg1: memref<32x64xf32, #tpu.memory_space<vmem>>, %arg2: memref<64x512xf32, #tpu.memory_space<vmem>>, %arg3: memref<512x64xf32, #tpu.memory_space<vmem>>, %arg4: memref<1x512xf32, #tpu.memory_space<vmem>>, %arg5: memref<32x64xf32, #tpu.memory_space<vmem>>, %arg6: memref<1x8x512xf32, #tpu.memory_space<vmem>>) attributes {dimension_semantics = [#tpu.dimension_semantics<parallel>], iteration_bounds = array<i64: 1>, scalar_prefetch = 0 : i64, scratch_operands = 0 : i64, tpu.core_type = #tpu.core_type<tc>, window_params = [{transform_indices = @transform_0, window_bounds = array<i64: 32, 64>}, {pipeline_mode = #tpu.pipeline_mode<synchronous>, transform_indices = @transform_1, window_bounds = array<i64: 64, 512>}, {pipeline_mode = #tpu.pipeline_mode<synchronous>, transform_indices = @transform_2, window_bounds = array<i64: 512, 64>}, {pipeline_mode = #tpu.pipeline_mode<synchronous>, transform_indices = @transform_3, window_bounds = array<i64: 1, 512>}, {transform_indices = @transform_4, window_bounds = array<i64: 32, 64>}, {transform_indices = @transform_5, window_bounds = array<i64: 1, 8, 512>}]} {
    %c0 = arith.constant 0 : index
    %c0_0 = arith.constant 0 : index
    %0 = vector.load %arg1[%c0, %c0_0] : memref<32x64xf32, #tpu.memory_space<vmem>>, vector<32x64xf32>
    %c0_1 = arith.constant 0 : index
    %c0_2 = arith.constant 0 : index
    %1 = vector.load %arg2[%c0_1, %c0_2] : memref<64x512xf32, #tpu.memory_space<vmem>>, vector<64x512xf32>
    %cst = arith.constant dense<0.000000e+00> : vector<32x512xf32>
    %2 = tpu.matmul %0, %1, %cst {dimension_numbers = #tpu.dot_dimension_numbers<[1], [0], [0], [1], [0, 0, 1, 1], [], []>} : vector<32x64xf32>, vector<64x512xf32>, vector<32x512xf32> -> vector<32x512xf32>
    %3 = arith.mulf %0, %0 : vector<32x64xf32>
    %cst_3 = arith.constant dense<0.000000e+00> : vector<32xf32>
    %4 = vector.multi_reduction <add>, %3, %cst_3 [1] : vector<32x64xf32> to vector<32xf32>
    %5 = vector.shape_cast %4 : vector<32xf32> to vector<32x1xf32>
    %c0_4 = arith.constant 0 : index
    %c0_5 = arith.constant 0 : index
    %6 = vector.load %arg4[%c0_4, %c0_5] : memref<1x512xf32, #tpu.memory_space<vmem>>, vector<1x512xf32>
    %7 = vector.broadcast %5 : vector<32x1xf32> to vector<32x512xf32>
    %8 = vector.broadcast %6 : vector<1x512xf32> to vector<32x512xf32>
    %9 = arith.addf %7, %8 : vector<32x512xf32>
    %cst_6 = arith.constant 2.000000e+00 : f32
    %10 = vector.broadcast %cst_6 : f32 to vector<32x512xf32>
    %11 = arith.mulf %10, %2 : vector<32x512xf32>
    %12 = arith.subf %9, %11 : vector<32x512xf32>
    %13 = tpu.iota {dimensions = array<i32: 1>} : vector<32x512xi32>
    %cst_7 = arith.constant dense<0x7F800000> : vector<32xf32>
    %14 = vector.multi_reduction <minimumf>, %12, %cst_7 [1] : vector<32x512xf32> to vector<32xf32>
    %15 = vector.shape_cast %14 : vector<32xf32> to vector<32x1xf32>
    %16 = vector.broadcast %15 : vector<32x1xf32> to vector<32x512xf32>
    %17 = arith.cmpf ole, %12, %16 : vector<32x512xf32>
    %c512_i32 = arith.constant 512 : i32
    %18 = vector.broadcast %c512_i32 : i32 to vector<32x512xi32>
    %19 = arith.select %17, %13, %18 : vector<32x512xi1>, vector<32x512xi32>
    %cst_8 = arith.constant dense<2147483647> : vector<32xi32>
    %20 = vector.multi_reduction <minsi>, %19, %cst_8 [1] : vector<32x512xi32> to vector<32xi32>
    %21 = vector.shape_cast %20 : vector<32xi32> to vector<32x1xi32>
    %22 = vector.broadcast %21 : vector<32x1xi32> to vector<32x512xi32>
    %23 = arith.cmpi eq, %13, %22 : vector<32x512xi32>
    %24 = arith.extui %23 : vector<32x512xi1> to vector<32x512xi32>
    %25 = arith.sitofp %24 : vector<32x512xi32> to vector<32x512xf32>
    %c32_i32 = arith.constant 32 : i32
    %26 = arith.muli %arg0, %c32_i32 : i32
    %27 = tpu.iota {dimensions = array<i32: 0>} : vector<32x1xi32>
    %28 = vector.broadcast %26 : i32 to vector<32x1xi32>
    %29 = arith.addi %28, %27 : vector<32x1xi32>
    %c32_i32_9 = arith.constant 32 : i32
    %30 = vector.broadcast %c32_i32_9 : i32 to vector<32x1xi32>
    %31 = arith.cmpi slt, %29, %30 : vector<32x1xi32>
    %32 = arith.extui %31 : vector<32x1xi1> to vector<32x1xi32>
    %33 = arith.sitofp %32 : vector<32x1xi32> to vector<32x1xf32>
    %34 = vector.broadcast %33 : vector<32x1xf32> to vector<32x512xf32>
    %35 = arith.mulf %25, %34 : vector<32x512xf32>
    %cst_10 = arith.constant dense<0.000000e+00> : vector<512xf32>
    %36 = vector.multi_reduction <add>, %35, %cst_10 [0] : vector<32x512xf32> to vector<512xf32>
    %37 = vector.shape_cast %36 : vector<512xf32> to vector<1x512xf32>
    %38 = tpu.iota {dimensions = array<i32: 0>} : vector<8x512xi32>
    %c0_i32 = arith.constant 0 : i32
    %39 = vector.broadcast %c0_i32 : i32 to vector<8x512xi32>
    %40 = arith.cmpi eq, %38, %39 : vector<8x512xi32>
    %cst_11 = arith.constant 0.000000e+00 : f32
    %41 = vector.shape_cast %37 : vector<1x512xf32> to vector<1x512xf32>
    %42 = vector.broadcast %41 : vector<1x512xf32> to vector<8x512xf32>
    %43 = vector.broadcast %cst_11 : f32 to vector<8x512xf32>
    %44 = arith.select %40, %42, %43 : vector<8x512xi1>, vector<8x512xf32>
    %c0_12 = arith.constant 0 : index
    %c0_13 = arith.constant 0 : index
    %c0_14 = arith.constant 0 : index
    %45 = vector.load %arg6[%c0_12, %c0_13, %c0_14] : memref<1x8x512xf32, #tpu.memory_space<vmem>>, vector<1x8x512xf32>
    %46 = vector.shape_cast %45 : vector<1x8x512xf32> to vector<8x512xf32>
    %47 = vector.shape_cast %44 : vector<8x512xf32> to vector<1x8x512xf32>
    tpu.vector_store %arg6[%c0_12, %c0_13, %c0_14], %47 {strides = array<i32>} : memref<1x8x512xf32, #tpu.memory_space<vmem>>, vector<1x8x512xf32>,
    %c0_15 = arith.constant 0 : index
    %c0_16 = arith.constant 0 : index
    %48 = vector.load %arg3[%c0_15, %c0_16] : memref<512x64xf32, #tpu.memory_space<vmem>>, vector<512x64xf32>
    %cst_17 = arith.constant dense<0.000000e+00> : vector<32x64xf32>
    %49 = tpu.matmul %25, %48, %cst_17 {dimension_numbers = #tpu.dot_dimension_numbers<[1], [0], [0], [1], [0, 0, 1, 1], [], []>} : vector<32x512xf32>, vector<512x64xf32>, vector<32x64xf32> -> vector<32x64xf32>
    %c0_18 = arith.constant 0 : index
    %c0_19 = arith.constant 0 : index
    %50 = vector.load %arg5[%c0_18, %c0_19] : memref<32x64xf32, #tpu.memory_space<vmem>>, vector<32x64xf32>
    tpu.vector_store %arg5[%c0_18, %c0_19], %49 {strides = array<i32>} : memref<32x64xf32, #tpu.memory_space<vmem>>, vector<32x64xf32>,
    return
  }
  func.func @transform_0(%arg0: i32) -> (i32, i32) {
    %c0_i32 = arith.constant 0 : i32
    %c0_i32_0 = arith.constant 0 : i32
    return %arg0, %c0_i32 : i32, i32
  }
  func.func @transform_1(%arg0: i32) -> (i32, i32) {
    %c0_i32 = arith.constant 0 : i32
    %c0_i32_0 = arith.constant 0 : i32
    %c0_i32_1 = arith.constant 0 : i32
    return %c0_i32, %c0_i32_0 : i32, i32
  }
  func.func @transform_2(%arg0: i32) -> (i32, i32) {
    %c0_i32 = arith.constant 0 : i32
    %c0_i32_0 = arith.constant 0 : i32
    %c0_i32_1 = arith.constant 0 : i32
    return %c0_i32, %c0_i32_0 : i32, i32
  }
  func.func @transform_3(%arg0: i32) -> (i32, i32) {
    %c0_i32 = arith.constant 0 : i32
    %c0_i32_0 = arith.constant 0 : i32
    %c0_i32_1 = arith.constant 0 : i32
    return %c0_i32, %c0_i32_0 : i32, i32
  }
  func.func @transform_4(%arg0: i32) -> (i32, i32) {
    %c0_i32 = arith.constant 0 : i32
    %c0_i32_0 = arith.constant 0 : i32
    return %arg0, %c0_i32 : i32, i32
  }
  func.func @transform_5(%arg0: i32) -> (i32, i32, i32) {
    %c0_i32 = arith.constant 0 : i32
    %c0_i32_0 = arith.constant 0 : i32
    %c0_i32_1 = arith.constant 0 : i32
    return %arg0, %c0_i32, %c0_i32_0 : i32, i32, i32
  }
}

module attributes {stable_mosaic.version = 11 : i64} {
  func.func @_gemm_bias_act_kernel(%arg0: i32, %arg1: i32, %arg2: i32, %arg3: i32, %arg4: memref<1x32x256xbf16, #tpu.memory_space<vmem>>, %arg5: memref<1x256x256xbf16, #tpu.memory_space<vmem>>, %arg6: memref<1x256xf32, #tpu.memory_space<vmem>>, %arg7: memref<1x32x256xf32, #tpu.memory_space<vmem>>, %arg8: memref<32x256xf32, #tpu.memory_space<vmem>>) attributes {dimension_semantics = [#tpu.dimension_semantics<parallel>, #tpu.dimension_semantics<parallel>, #tpu.dimension_semantics<parallel>, #tpu.dimension_semantics<arbitrary>], iteration_bounds = array<i64: 4, 1, 1, 1>, scalar_prefetch = 0 : i64, scratch_operands = 1 : i64, tpu.core_type = #tpu.core_type<tc>, window_params = [{transform_indices = @transform_0, window_bounds = array<i64: 1, 32, 256>}, {transform_indices = @transform_1, window_bounds = array<i64: 1, 256, 256>}, {transform_indices = @transform_2, window_bounds = array<i64: 1, 256>}, {transform_indices = @transform_3, window_bounds = array<i64: 1, 32, 256>}]} {
    %c0_i32 = arith.constant 0 : i32
    %0 = arith.cmpi eq, %arg3, %c0_i32 : i32
    %1 = arith.extui %0 : i1 to i32
    %c0_i32_0 = arith.constant 0 : i32
    %2 = arith.cmpi ne, %1, %c0_i32_0 : i32
    scf.if %2 {
      %cst_12 = arith.constant 0.000000e+00 : f32
      %14 = vector.broadcast %cst_12 : f32 to vector<32x256xf32>
      %c0_13 = arith.constant 0 : index
      %c0_14 = arith.constant 0 : index
      %15 = vector.load %arg8[%c0_13, %c0_14] : memref<32x256xf32, #tpu.memory_space<vmem>>, vector<32x256xf32>
      tpu.vector_store %arg8[%c0_13, %c0_14], %14 {strides = array<i32>} : memref<32x256xf32, #tpu.memory_space<vmem>>, vector<32x256xf32>,
    } else {
    }
    %c0 = arith.constant 0 : index
    %c0_1 = arith.constant 0 : index
    %3 = vector.load %arg8[%c0, %c0_1] : memref<32x256xf32, #tpu.memory_space<vmem>>, vector<32x256xf32>
    %c0_2 = arith.constant 0 : index
    %c0_3 = arith.constant 0 : index
    %c0_4 = arith.constant 0 : index
    %4 = vector.load %arg4[%c0_2, %c0_3, %c0_4] : memref<1x32x256xbf16, #tpu.memory_space<vmem>>, vector<1x32x256xbf16>
    %5 = vector.shape_cast %4 : vector<1x32x256xbf16> to vector<32x256xbf16>
    %c0_5 = arith.constant 0 : index
    %c0_6 = arith.constant 0 : index
    %c0_7 = arith.constant 0 : index
    %6 = vector.load %arg5[%c0_5, %c0_6, %c0_7] : memref<1x256x256xbf16, #tpu.memory_space<vmem>>, vector<1x256x256xbf16>
    %7 = vector.shape_cast %6 : vector<1x256x256xbf16> to vector<256x256xbf16>
    %cst = arith.constant dense<0.000000e+00> : vector<32x256xf32>
    %8 = tpu.matmul %5, %7, %cst {dimension_numbers = #tpu.dot_dimension_numbers<[1], [0], [0], [1], [0, 0, 1, 1], [], []>} : vector<32x256xbf16>, vector<256x256xbf16>, vector<32x256xf32> -> vector<32x256xf32>
    %9 = arith.addf %3, %8 : vector<32x256xf32>
    %c0_8 = arith.constant 0 : index
    %c0_9 = arith.constant 0 : index
    %10 = vector.load %arg8[%c0_8, %c0_9] : memref<32x256xf32, #tpu.memory_space<vmem>>, vector<32x256xf32>
    tpu.vector_store %arg8[%c0_8, %c0_9], %9 {strides = array<i32>} : memref<32x256xf32, #tpu.memory_space<vmem>>, vector<32x256xf32>,
    %c0_i32_10 = arith.constant 0 : i32
    %11 = arith.cmpi eq, %arg3, %c0_i32_10 : i32
    %12 = arith.extui %11 : i1 to i32
    %c0_i32_11 = arith.constant 0 : i32
    %13 = arith.cmpi ne, %12, %c0_i32_11 : i32
    scf.if %13 {
      %c0_12 = arith.constant 0 : index
      %c0_13 = arith.constant 0 : index
      %14 = vector.load %arg8[%c0_12, %c0_13] : memref<32x256xf32, #tpu.memory_space<vmem>>, vector<32x256xf32>
      %c0_14 = arith.constant 0 : index
      %c0_15 = arith.constant 0 : index
      %15 = vector.load %arg6[%c0_14, %c0_15] : memref<1x256xf32, #tpu.memory_space<vmem>>, vector<1x256xf32>
      %16 = vector.broadcast %15 : vector<1x256xf32> to vector<32x256xf32>
      %17 = arith.addf %14, %16 : vector<32x256xf32>
      %cst_16 = arith.constant 0.000000e+00 : f32
      %18 = vector.broadcast %cst_16 : f32 to vector<32x256xf32>
      %19 = arith.maximumf %17, %18 : vector<32x256xf32>
      %c0_17 = arith.constant 0 : index
      %c0_18 = arith.constant 0 : index
      %c0_19 = arith.constant 0 : index
      %20 = vector.load %arg7[%c0_17, %c0_18, %c0_19] : memref<1x32x256xf32, #tpu.memory_space<vmem>>, vector<1x32x256xf32>
      %21 = vector.shape_cast %20 : vector<1x32x256xf32> to vector<32x256xf32>
      %22 = vector.shape_cast %19 : vector<32x256xf32> to vector<1x32x256xf32>
      tpu.vector_store %arg7[%c0_17, %c0_18, %c0_19], %22 {strides = array<i32>} : memref<1x32x256xf32, #tpu.memory_space<vmem>>, vector<1x32x256xf32>,
    } else {
    }
    return
  }
  func.func @transform_0(%arg0: i32, %arg1: i32, %arg2: i32, %arg3: i32) -> (i32, i32, i32) {
    %c0_i32 = arith.constant 0 : i32
    return %arg0, %arg1, %arg3 : i32, i32, i32
  }
  func.func @transform_1(%arg0: i32, %arg1: i32, %arg2: i32, %arg3: i32) -> (i32, i32, i32) {
    %c0_i32 = arith.constant 0 : i32
    return %arg0, %arg3, %arg2 : i32, i32, i32
  }
  func.func @transform_2(%arg0: i32, %arg1: i32, %arg2: i32, %arg3: i32) -> (i32, i32) {
    %c0_i32 = arith.constant 0 : i32
    %c0_i32_0 = arith.constant 0 : i32
    return %c0_i32, %arg2 : i32, i32
  }
  func.func @transform_3(%arg0: i32, %arg1: i32, %arg2: i32, %arg3: i32) -> (i32, i32, i32) {
    %c0_i32 = arith.constant 0 : i32
    return %arg0, %arg1, %arg2 : i32, i32, i32
  }
}

module attributes {stable_mosaic.version = 11 : i64} {
  func.func @_gemm_bias_act_kernel(%arg0: i32, %arg1: i32, %arg2: i32, %arg3: i32, %arg4: memref<1x128x512xbf16, #tpu.memory_space<vmem>>, %arg5: memref<1x512x128xbf16, #tpu.memory_space<vmem>>, %arg6: memref<1x128xf32, #tpu.memory_space<vmem>>, %arg7: memref<1x128x128xf32, #tpu.memory_space<vmem>>, %arg8: memref<128x128xf32, #tpu.memory_space<vmem>>) attributes {dimension_semantics = [#tpu.dimension_semantics<parallel>, #tpu.dimension_semantics<parallel>, #tpu.dimension_semantics<parallel>, #tpu.dimension_semantics<arbitrary>], iteration_bounds = array<i64: 4, 1, 1, 2>, scalar_prefetch = 0 : i64, scratch_operands = 1 : i64, tpu.core_type = #tpu.core_type<tc>, window_params = [{transform_indices = @transform_0, window_bounds = array<i64: 1, 128, 512>}, {transform_indices = @transform_1, window_bounds = array<i64: 1, 512, 128>}, {transform_indices = @transform_2, window_bounds = array<i64: 1, 128>}, {transform_indices = @transform_3, window_bounds = array<i64: 1, 128, 128>}]} {
    %c0_i32 = arith.constant 0 : i32
    %0 = arith.cmpi eq, %arg3, %c0_i32 : i32
    %1 = arith.extui %0 : i1 to i32
    %c0_i32_0 = arith.constant 0 : i32
    %2 = arith.cmpi ne, %1, %c0_i32_0 : i32
    scf.if %2 {
      %cst_11 = arith.constant 0.000000e+00 : f32
      %14 = vector.broadcast %cst_11 : f32 to vector<128x128xf32>
      %c0_12 = arith.constant 0 : index
      %c0_13 = arith.constant 0 : index
      %15 = vector.load %arg8[%c0_12, %c0_13] : memref<128x128xf32, #tpu.memory_space<vmem>>, vector<128x128xf32>
      tpu.vector_store %arg8[%c0_12, %c0_13], %14 {strides = array<i32>} : memref<128x128xf32, #tpu.memory_space<vmem>>, vector<128x128xf32>,
    } else {
    }
    %c0 = arith.constant 0 : index
    %c0_1 = arith.constant 0 : index
    %3 = vector.load %arg8[%c0, %c0_1] : memref<128x128xf32, #tpu.memory_space<vmem>>, vector<128x128xf32>
    %c0_2 = arith.constant 0 : index
    %c0_3 = arith.constant 0 : index
    %c0_4 = arith.constant 0 : index
    %4 = vector.load %arg4[%c0_2, %c0_3, %c0_4] : memref<1x128x512xbf16, #tpu.memory_space<vmem>>, vector<1x128x512xbf16>
    %5 = vector.shape_cast %4 : vector<1x128x512xbf16> to vector<128x512xbf16>
    %c0_5 = arith.constant 0 : index
    %c0_6 = arith.constant 0 : index
    %c0_7 = arith.constant 0 : index
    %6 = vector.load %arg5[%c0_5, %c0_6, %c0_7] : memref<1x512x128xbf16, #tpu.memory_space<vmem>>, vector<1x512x128xbf16>
    %7 = vector.shape_cast %6 : vector<1x512x128xbf16> to vector<512x128xbf16>
    %cst = arith.constant dense<0.000000e+00> : vector<128x128xf32>
    %8 = tpu.matmul %5, %7, %cst {dimension_numbers = #tpu.dot_dimension_numbers<[1], [0], [0], [1], [0, 0, 1, 1], [], []>} : vector<128x512xbf16>, vector<512x128xbf16>, vector<128x128xf32> -> vector<128x128xf32>
    %9 = arith.addf %3, %8 : vector<128x128xf32>
    %c0_8 = arith.constant 0 : index
    %c0_9 = arith.constant 0 : index
    %10 = vector.load %arg8[%c0_8, %c0_9] : memref<128x128xf32, #tpu.memory_space<vmem>>, vector<128x128xf32>
    tpu.vector_store %arg8[%c0_8, %c0_9], %9 {strides = array<i32>} : memref<128x128xf32, #tpu.memory_space<vmem>>, vector<128x128xf32>,
    %c1_i32 = arith.constant 1 : i32
    %11 = arith.cmpi eq, %arg3, %c1_i32 : i32
    %12 = arith.extui %11 : i1 to i32
    %c0_i32_10 = arith.constant 0 : i32
    %13 = arith.cmpi ne, %12, %c0_i32_10 : i32
    scf.if %13 {
      %c0_11 = arith.constant 0 : index
      %c0_12 = arith.constant 0 : index
      %14 = vector.load %arg8[%c0_11, %c0_12] : memref<128x128xf32, #tpu.memory_space<vmem>>, vector<128x128xf32>
      %c0_13 = arith.constant 0 : index
      %c0_14 = arith.constant 0 : index
      %15 = vector.load %arg6[%c0_13, %c0_14] : memref<1x128xf32, #tpu.memory_space<vmem>>, vector<1x128xf32>
      %16 = vector.broadcast %15 : vector<1x128xf32> to vector<128x128xf32>
      %17 = arith.addf %14, %16 : vector<128x128xf32>
      %cst_15 = arith.constant 0.000000e+00 : f32
      %18 = vector.broadcast %cst_15 : f32 to vector<128x128xf32>
      %19 = arith.maximumf %17, %18 : vector<128x128xf32>
      %c0_16 = arith.constant 0 : index
      %c0_17 = arith.constant 0 : index
      %c0_18 = arith.constant 0 : index
      %20 = vector.load %arg7[%c0_16, %c0_17, %c0_18] : memref<1x128x128xf32, #tpu.memory_space<vmem>>, vector<1x128x128xf32>
      %21 = vector.shape_cast %20 : vector<1x128x128xf32> to vector<128x128xf32>
      %22 = vector.shape_cast %19 : vector<128x128xf32> to vector<1x128x128xf32>
      tpu.vector_store %arg7[%c0_16, %c0_17, %c0_18], %22 {strides = array<i32>} : memref<1x128x128xf32, #tpu.memory_space<vmem>>, vector<1x128x128xf32>,
    } else {
    }
    return
  }
  func.func @transform_0(%arg0: i32, %arg1: i32, %arg2: i32, %arg3: i32) -> (i32, i32, i32) {
    %c0_i32 = arith.constant 0 : i32
    return %arg0, %arg1, %arg3 : i32, i32, i32
  }
  func.func @transform_1(%arg0: i32, %arg1: i32, %arg2: i32, %arg3: i32) -> (i32, i32, i32) {
    %c0_i32 = arith.constant 0 : i32
    return %arg0, %arg3, %arg2 : i32, i32, i32
  }
  func.func @transform_2(%arg0: i32, %arg1: i32, %arg2: i32, %arg3: i32) -> (i32, i32) {
    %c0_i32 = arith.constant 0 : i32
    %c0_i32_0 = arith.constant 0 : i32
    return %c0_i32, %arg2 : i32, i32
  }
  func.func @transform_3(%arg0: i32, %arg1: i32, %arg2: i32, %arg3: i32) -> (i32, i32, i32) {
    %c0_i32 = arith.constant 0 : i32
    return %arg0, %arg1, %arg2 : i32, i32, i32
  }
}

module attributes {stable_mosaic.version = 11 : i64} {
  func.func @_gemm_bias_act_kernel(%arg0: i32, %arg1: i32, %arg2: i32, %arg3: i32, %arg4: memref<1x256x384xbf16, #tpu.memory_space<vmem>>, %arg5: memref<1x384x128xbf16, #tpu.memory_space<vmem>>, %arg6: memref<1x128xf32, #tpu.memory_space<vmem>>, %arg7: memref<1x256x128xf32, #tpu.memory_space<vmem>>, %arg8: memref<256x128xf32, #tpu.memory_space<vmem>>) attributes {dimension_semantics = [#tpu.dimension_semantics<parallel>, #tpu.dimension_semantics<parallel>, #tpu.dimension_semantics<parallel>, #tpu.dimension_semantics<arbitrary>], iteration_bounds = array<i64: 1, 2, 1, 3>, scalar_prefetch = 0 : i64, scratch_operands = 1 : i64, tpu.core_type = #tpu.core_type<tc>, window_params = [{transform_indices = @transform_0, window_bounds = array<i64: 1, 256, 384>}, {transform_indices = @transform_1, window_bounds = array<i64: 1, 384, 128>}, {transform_indices = @transform_2, window_bounds = array<i64: 1, 128>}, {transform_indices = @transform_3, window_bounds = array<i64: 1, 256, 128>}]} {
    %c0_i32 = arith.constant 0 : i32
    %0 = arith.cmpi eq, %arg3, %c0_i32 : i32
    %1 = arith.extui %0 : i1 to i32
    %c0_i32_0 = arith.constant 0 : i32
    %2 = arith.cmpi ne, %1, %c0_i32_0 : i32
    scf.if %2 {
      %cst_11 = arith.constant 0.000000e+00 : f32
      %14 = vector.broadcast %cst_11 : f32 to vector<256x128xf32>
      %c0_12 = arith.constant 0 : index
      %c0_13 = arith.constant 0 : index
      %15 = vector.load %arg8[%c0_12, %c0_13] : memref<256x128xf32, #tpu.memory_space<vmem>>, vector<256x128xf32>
      tpu.vector_store %arg8[%c0_12, %c0_13], %14 {strides = array<i32>} : memref<256x128xf32, #tpu.memory_space<vmem>>, vector<256x128xf32>,
    } else {
    }
    %c0 = arith.constant 0 : index
    %c0_1 = arith.constant 0 : index
    %3 = vector.load %arg8[%c0, %c0_1] : memref<256x128xf32, #tpu.memory_space<vmem>>, vector<256x128xf32>
    %c0_2 = arith.constant 0 : index
    %c0_3 = arith.constant 0 : index
    %c0_4 = arith.constant 0 : index
    %4 = vector.load %arg4[%c0_2, %c0_3, %c0_4] : memref<1x256x384xbf16, #tpu.memory_space<vmem>>, vector<1x256x384xbf16>
    %5 = vector.shape_cast %4 : vector<1x256x384xbf16> to vector<256x384xbf16>
    %c0_5 = arith.constant 0 : index
    %c0_6 = arith.constant 0 : index
    %c0_7 = arith.constant 0 : index
    %6 = vector.load %arg5[%c0_5, %c0_6, %c0_7] : memref<1x384x128xbf16, #tpu.memory_space<vmem>>, vector<1x384x128xbf16>
    %7 = vector.shape_cast %6 : vector<1x384x128xbf16> to vector<384x128xbf16>
    %cst = arith.constant dense<0.000000e+00> : vector<256x128xf32>
    %8 = tpu.matmul %5, %7, %cst {dimension_numbers = #tpu.dot_dimension_numbers<[1], [0], [0], [1], [0, 0, 1, 1], [], []>} : vector<256x384xbf16>, vector<384x128xbf16>, vector<256x128xf32> -> vector<256x128xf32>
    %9 = arith.addf %3, %8 : vector<256x128xf32>
    %c0_8 = arith.constant 0 : index
    %c0_9 = arith.constant 0 : index
    %10 = vector.load %arg8[%c0_8, %c0_9] : memref<256x128xf32, #tpu.memory_space<vmem>>, vector<256x128xf32>
    tpu.vector_store %arg8[%c0_8, %c0_9], %9 {strides = array<i32>} : memref<256x128xf32, #tpu.memory_space<vmem>>, vector<256x128xf32>,
    %c2_i32 = arith.constant 2 : i32
    %11 = arith.cmpi eq, %arg3, %c2_i32 : i32
    %12 = arith.extui %11 : i1 to i32
    %c0_i32_10 = arith.constant 0 : i32
    %13 = arith.cmpi ne, %12, %c0_i32_10 : i32
    scf.if %13 {
      %c0_11 = arith.constant 0 : index
      %c0_12 = arith.constant 0 : index
      %14 = vector.load %arg8[%c0_11, %c0_12] : memref<256x128xf32, #tpu.memory_space<vmem>>, vector<256x128xf32>
      %c0_13 = arith.constant 0 : index
      %c0_14 = arith.constant 0 : index
      %15 = vector.load %arg6[%c0_13, %c0_14] : memref<1x128xf32, #tpu.memory_space<vmem>>, vector<1x128xf32>
      %16 = vector.broadcast %15 : vector<1x128xf32> to vector<256x128xf32>
      %17 = arith.addf %14, %16 : vector<256x128xf32>
      %18 = arith.negf %17 : vector<256x128xf32>
      %19 = math.exp %18 : vector<256x128xf32>
      %cst_15 = arith.constant 1.000000e+00 : f32
      %20 = vector.broadcast %cst_15 : f32 to vector<256x128xf32>
      %21 = arith.addf %20, %19 : vector<256x128xf32>
      %22 = arith.divf %20, %21 : vector<256x128xf32>
      %c0_16 = arith.constant 0 : index
      %c0_17 = arith.constant 0 : index
      %c0_18 = arith.constant 0 : index
      %23 = vector.load %arg7[%c0_16, %c0_17, %c0_18] : memref<1x256x128xf32, #tpu.memory_space<vmem>>, vector<1x256x128xf32>
      %24 = vector.shape_cast %23 : vector<1x256x128xf32> to vector<256x128xf32>
      %25 = vector.shape_cast %22 : vector<256x128xf32> to vector<1x256x128xf32>
      tpu.vector_store %arg7[%c0_16, %c0_17, %c0_18], %25 {strides = array<i32>} : memref<1x256x128xf32, #tpu.memory_space<vmem>>, vector<1x256x128xf32>,
    } else {
    }
    return
  }
  func.func @transform_0(%arg0: i32, %arg1: i32, %arg2: i32, %arg3: i32) -> (i32, i32, i32) {
    %c0_i32 = arith.constant 0 : i32
    return %arg0, %arg1, %arg3 : i32, i32, i32
  }
  func.func @transform_1(%arg0: i32, %arg1: i32, %arg2: i32, %arg3: i32) -> (i32, i32, i32) {
    %c0_i32 = arith.constant 0 : i32
    return %arg0, %arg3, %arg2 : i32, i32, i32
  }
  func.func @transform_2(%arg0: i32, %arg1: i32, %arg2: i32, %arg3: i32) -> (i32, i32) {
    %c0_i32 = arith.constant 0 : i32
    %c0_i32_0 = arith.constant 0 : i32
    return %c0_i32, %arg2 : i32, i32
  }
  func.func @transform_3(%arg0: i32, %arg1: i32, %arg2: i32, %arg3: i32) -> (i32, i32, i32) {
    %c0_i32 = arith.constant 0 : i32
    return %arg0, %arg1, %arg2 : i32, i32, i32
  }
}

</mosaic_0001>

<bundles_post_ra>
// kernel: vqvae_forward.7
= control target key start
LH: loop header
LB: loop body
LE: loop exit
PB: predicated region body
PF: predicated region fallthrough
CT: control target
= control target key end

     0   :  { %s782_s12 = smov 0   ;;  %s784_s13 = smov 0   ;;  %s827_s0 = inlined_call_operand.vmem [shape: bf16[1,128,48], index: 0, kind: input, shape index: {}]   ;;  %s828_s1 = inlined_call_operand.vmem [shape: bf16[1,48,128], index: 1, kind: input, shape index: {}]   ;;  %s829_s2 = inlined_call_operand.vmem [shape: f32[1,128], index: 2, kind: input, shape index: {}]   ;;  %s830_s3 = inlined_call_operand.vmem [shape: f32[1,128,128], index: 3, kind: output, shape index: {}]  }
   0x1   :  { %s786_s14 = smov 0  }
   0x2 LB: > { %s35_s15 = sadd.s32 1, %s756_s13  ;;  %p661_p0 = scmp.ge.s32.totalorder %s760_s14, 1  ;;  %s760_s14 = sphi %s786_s14, %s13_s14   ;;  %s756_s13 = sphi %s784_s13, %s832_s13   ;;  %s752_s12 = sphi %s782_s12, %s831_s12  }
   0x3   : > { %p37_p1 = scmp.ge.s32.totalorder %s35_s15, 2  ;;  %p209_p2 = scmp.lt.s32.totalorder %s760_s14, 3 }
   0x5   : > { %s834_s15 = smov (%p37_p1, %s35_s15), 0  ;;  %p210_p3 = pnand %p661_p0, %p209_p2 }
   0x6   : > { %s662_s18 = sshll.u32 (!%p210_p3), %s752_s12, 3 }
   0x7   : > { %213 = sbr.rel (%p210_p3) target bundleno = 229 (0xe5), region = 32  ;;  %p265_p4 = scmp.lt.s32.totalorder (!%p210_p3), %s662_s18, 15 }
   0xc   : > { %v731_v0 = vld [vmem:[%s828_s1 + $0x10] sm:$0xff]   ;;  %v732_v1 = vld [vmem:[%s828_s1 + $0x8] sm:$0xff]   ;;  %s836_s18 = smov (!%p265_p4, %s662_s18), 15  ;;  %v733_v2 = vld [vmem:[%s828_s1] sm:$0xff]   ;;  %vm377_vm0 = vcmask 392192  }
   0xd   : > { %687 = vmatprep.subr.bf16.mxu0 %v731_v0  ;;  %701 = vmatprep.subr.bf16.mxu1 %v731_v0  ;;  %s663_s23 = sshll.u32 %s836_s18, 2  ;;  %v677_v7 = vld [vmem:[%s829_s2] ss:$0 sm:$0xff]  ;;  %s665_s29 = sshll.u32 %s836_s18, 3 }
   0xe   : > { %688 = vmatpush3.bf16.msra.mxu0 %v731_v0  ;;  %704 = vmatpush3.bf16.msra.mxu1 %v731_v0  ;;  %s273_s26 = scalar_lea.vmem %s827_s0, %s663_s23  ;;  %s302_s5 = scalar_lea.vmem %s830_s3, %s665_s29 }
   0xf   : > { %689 = vmatprep.subr.bf16.mxu0 %v732_v1  ;;  %702 = vmatprep.subr.bf16.mxu1 %v732_v1  ;;  %v734_v3 = vld [vmem:[%s273_s26] sm:$0xff]   ;;  %v735_v4 = vld [vmem:[%s273_s26 + $0x10] sm:$0xff]   ;;  %v736_v5 = vld [vmem:[%s273_s26 + $0x8] sm:$0xff]  }
  0x10   : > { %693 = vmatprep.mubr.msk.bf16.mxu0 %vm377_vm0, %v734_v3  ;;  %697 = vmatprep.mubr.msk.bf16.mxu1 %vm377_vm0, %v735_v4  ;;  %v737_v6 = vld [vmem:[%s273_s26 + $0x18] sm:$0xff]  }
  0x12   : > { %690 = vmatpush3.bf16.msra.mxu0 %v732_v1  ;;  %705 = vmatpush3.bf16.msra.mxu1 %v732_v1 }
  0x13   : > { %691 = vmatprep.subr.bf16.mxu0 %v733_v2  ;;  %703 = vmatprep.subr.bf16.mxu1 %v733_v2 }
  0x16   : > { %692 = vmatpush3.bf16.msra.mxu0 %v733_v2  ;;  %706 = vmatpush3.bf16.msra.mxu1 %v733_v2 }
  0x19   : > { %694 = vmatmul.mubr.msk.bf16.vlgmr.msra.gmra.mxu0 %vm377_vm0, %v736_v5  ;;  %698 = vmatmul.mubr.msk.bf16.vlgmr.msra.gmra.mxu1 %vm377_vm0, %v737_v6 }
  0xd9   : > { %v695_v8 = vpop.f32.mrf.mxu0  ;;  %v699_v9 = vpop.f32.mrf.mxu1 }
  0xda   : > { %v491_v10 = vadd.f32 %v695_v8, %v677_v7  ;;  %v495_v11 = vadd.f32 %v699_v9, %v677_v7 }
  0xdb   : > { %v424_v12 = vpop.f32.mrf.mxu0  ;;  %v440_v13 = vpop.f32.mrf.mxu1 }
  0xdc   : > { %v499_v14 = vmax.f32 %v491_v10, 0.0  ;;  %v503_v15 = vmax.f32 %v495_v11, 0.0  ;;  %v489_v16 = vadd.f32 %v677_v7, %v424_v12  ;;  %v493_v17 = vadd.f32 %v677_v7, %v440_v13 }
  0xdd   : > { %v696_v18 = vpop.f32.mrf.mxu0  ;;  %v700_v19 = vpop.f32.mrf.mxu1 }
  0xde   : > { %507 = vst [vmem:[%s302_s5 + $0x10] sm:$0xff] %v499_v14  ;;  %511 = vst [vmem:[%s302_s5 + $0x30] sm:$0xff] %v503_v15  ;;  %v497_v20 = vmax.f32 %v489_v16, 0.0  ;;  %v501_v21 = vmax.f32 %v493_v17, 0.0  ;;  %v492_v22 = vadd.f32 %v696_v18, %v677_v7  ;;  %v496_v23 = vadd.f32 %v700_v19, %v677_v7 }
  0xdf   : > { %v427_v24 = vpop.f32.mrf.mxu0  ;;  %v443_v25 = vpop.f32.mrf.mxu1 }
  0xe0   : > { %505 = vst [vmem:[%s302_s5] sm:$0xff] %v497_v20  ;;  %509 = vst [vmem:[%s302_s5 + $0x20] sm:$0xff] %v501_v21  ;;  %v500_v26 = vmax.f32 %v492_v22, 0.0  ;;  %v504_v27 = vmax.f32 %v496_v23, 0.0  ;;  %v490_v28 = vadd.f32 %v677_v7, %v427_v24  ;;  %v494_v29 = vadd.f32 %v677_v7, %v443_v25 }
  0xe2   : > { %508 = vst [vmem:[%s302_s5 + $0x18] sm:$0xff] %v500_v26  ;;  %512 = vst [vmem:[%s302_s5 + $0x38] sm:$0xff] %v504_v27  ;;  %v498_v30 = vmax.f32 %v490_v28, 0.0  ;;  %v502_v31 = vmax.f32 %v494_v29, 0.0 }
  0xe4   : > { %506 = vst [vmem:[%s302_s5 + $0x8] sm:$0xff] %v498_v30  ;;  %510 = vst [vmem:[%s302_s5 + $0x28] sm:$0xff] %v502_v31 }
  0xe5 PF: > { %s13_s14 = sadd.s32 1, %s760_s14   ;;  %s831_s12 = smov %s756_s13 }
  0xe6   : > { %p10_p5 = scmp.ge.s32.totalorder %s13_s14, 4   ;;  %s832_s13 = smov %s834_s15 }
  0xe8   :  { %12 = sbr.rel (!%p10_p5) target bundleno = 2 (0x2), region = 76 }

// kernel: squeeze.5
= control target key start
LH: loop header
LB: loop body
LE: loop exit
PB: predicated region body
PF: predicated region fallthrough
CT: control target
= control target key end

     0   :  { %v214_v11 = vmov 0.0   ;;  %s297_s0 = inlined_call_operand.vmem [shape: f32[1,32,256], index: 0, kind: input, shape index: {}]   ;;  %s298_s1 = inlined_call_operand.vmem [shape: bf16[2,4,4,256], index: 1, kind: output, shape index: {}]  }
   0x1   :  { %v2_v0 = vld [vmem:[%s297_s0] sm:$0xff]   ;;  %v191_v1 = vld [vmem:[%s297_s0 + $0x8] sm:$0xff]   ;;  %v192_v2 = vld [vmem:[%s297_s0 + $0x10] sm:$0xff]  }
   0x2   :  { %3 = vst [vmem:[#allocation0] sm:$0xf] %v2_v0   ;;  %5 = vst [vmem:[#allocation0 + $0xc] sm:$0xf0] %v2_v0   ;;  %v193_v3 = vld [vmem:[%s297_s0 + $0x18] sm:$0xff]   ;;  %v194_v4 = vld [vmem:[%s297_s0 + $0x20] sm:$0xff]  }
   0x3   :  { %9 = vst [vmem:[#allocation0 + $0x8] sm:$0xf] %v191_v1   ;;  %11 = vst [vmem:[#allocation0 + $0x14] sm:$0xf0] %v191_v1   ;;  %v195_v5 = vld [vmem:[%s297_s0 + $0x28] sm:$0xff]   ;;  %v196_v6 = vld [vmem:[%s297_s0 + $0x30] sm:$0xff]  }
   0x4   :  { %15 = vst [vmem:[#allocation0 + $0x20] sm:$0xf] %v192_v2   ;;  %17 = vst [vmem:[#allocation0 + $0x2c] sm:$0xf0] %v192_v2   ;;  %v197_v7 = vld [vmem:[%s297_s0 + $0x38] sm:$0xff]  }
   0x5   :  { %21 = vst [vmem:[#allocation0 + $0x28] sm:$0xf] %v193_v3   ;;  %23 = vst [vmem:[#allocation0 + $0x34] sm:$0xf0] %v193_v3  }
   0x6   :  { %27 = vst [vmem:[#allocation0 + $0x40] sm:$0xf] %v194_v4   ;;  %29 = vst [vmem:[#allocation0 + $0x4c] sm:$0xf0] %v194_v4  }
   0x7   :  { %33 = vst [vmem:[#allocation0 + $0x48] sm:$0xf] %v195_v5   ;;  %35 = vst [vmem:[#allocation0 + $0x54] sm:$0xf0] %v195_v5  }
   0x8   :  { %39 = vst [vmem:[#allocation0 + $0x60] sm:$0xf] %v196_v6   ;;  %41 = vst [vmem:[#allocation0 + $0x6c] sm:$0xf0] %v196_v6  }
   0x9   :  { %45 = vst [vmem:[#allocation0 + $0x68] sm:$0xf] %v197_v7   ;;  %47 = vst [vmem:[#allocation0 + $0x74] sm:$0xf0] %v197_v7   ;;  %v53_v8 = vld [vmem:[#allocation0] sm:$0xf] }
   0xa   :  { %v59_v9 = vld [vmem:[#allocation0 + $0x8] sm:$0xf]  ;;  %v66_v10 = vld [vmem:[#allocation0 + $0x10] sm:$0xf]  ;;  %v54_v12 = vpack.c.bf16 %v214_v11, %v53_v8  ;;  %v74_v15 = vld [vmem:[#allocation0 + $0x18] sm:$0xf] }
   0xb   :  { %v60_v13 = vpack.c.bf16 %v214_v11, %v59_v9  ;;  %v67_v14 = vpack.c.bf16 %v214_v11, %v66_v10  ;;  %v82_v16 = vld [vmem:[#allocation0 + $0x20] sm:$0xf]  ;;  %v75_v18 = vpack.c.bf16 %v214_v11, %v74_v15  ;;  %v98_v21 = vld [vmem:[#allocation0 + $0x30] sm:$0xf] }
   0xc   :  { %v90_v17 = vld [vmem:[#allocation0 + $0x28] sm:$0xf]  ;;  %v83_v19 = vpack.c.bf16 %v214_v11, %v82_v16  ;;  %v106_v22 = vld [vmem:[#allocation0 + $0x38] sm:$0xf]  ;;  %57 = vst [vmem:[%s298_s1] sm:$0x3] %v54_v12  ;;  %v99_v24 = vpack.c.bf16 %v214_v11, %v98_v21 }
   0xd   :  { %v91_v20 = vpack.c.bf16 %v214_v11, %v90_v17  ;;  %v114_v23 = vld [vmem:[#allocation0 + $0x40] sm:$0xf]  ;;  %198 = vst [vmem:[%s298_s1 + $0x2] sm:$0x3] %v60_v13  ;;  %199 = vst [vmem:[%s298_s1 + $0x4] sm:$0x3] %v67_v14  ;;  %v107_v25 = vpack.c.bf16 %v214_v11, %v106_v22 }
   0xe   :  { %v115_v26 = vpack.c.bf16 %v214_v11, %v114_v23  ;;  %v122_v27 = vld [vmem:[#allocation0 + $0x48] sm:$0xf]  ;;  %v130_v28 = vld [vmem:[#allocation0 + $0x50] sm:$0xf]  ;;  %v138_v29 = vld [vmem:[#allocation0 + $0x58] sm:$0xf] }
   0xf   :  { %200 = vst [vmem:[%s298_s1 + $0x6] sm:$0x3] %v75_v18  ;;  %201 = vst [vmem:[%s298_s1 + $0x8] sm:$0x3] %v83_v19  ;;  %v123_v30 = vpack.c.bf16 %v214_v11, %v122_v27  ;;  %v131_v31 = vpack.c.bf16 %v214_v11, %v130_v28  ;;  %v139_v32 = vpack.c.bf16 %v214_v11, %v138_v29  ;;  %v146_v33 = vld [vmem:[#allocation0 + $0x60] sm:$0xf] }
  0x10   :  { %202 = vst [vmem:[%s298_s1 + $0xa] sm:$0x3] %v91_v20  ;;  %v154_v34 = vld [vmem:[#allocation0 + $0x68] sm:$0xf]  ;;  %v162_v35 = vld [vmem:[#allocation0 + $0x70] sm:$0xf]  ;;  %v147_v36 = vpack.c.bf16 %v214_v11, %v146_v33 }
  0x11   :  { %203 = vst [vmem:[%s298_s1 + $0xc] sm:$0x3] %v99_v24  ;;  %204 = vst [vmem:[%s298_s1 + $0xe] sm:$0x3] %v107_v25  ;;  %v155_v37 = vpack.c.bf16 %v214_v11, %v154_v34  ;;  %v163_v38 = vpack.c.bf16 %v214_v11, %v162_v35  ;;  %v170_v39 = vld [vmem:[#allocation0 + $0x78] sm:$0xf] }
  0x12   :  { %205 = vst [vmem:[%s298_s1 + $0x10] sm:$0x3] %v115_v26  ;;  %206 = vst [vmem:[%s298_s1 + $0x12] sm:$0x3] %v123_v30  ;;  %v171_v40 = vpack.c.bf16 %v214_v11, %v170_v39 }
  0x13   :  { %207 = vst [vmem:[%s298_s1 + $0x14] sm:$0x3] %v131_v31  ;;  %208 = vst [vmem:[%s298_s1 + $0x16] sm:$0x3] %v139_v32 }
  0x14   :  { %209 = vst [vmem:[%s298_s1 + $0x18] sm:$0x3] %v147_v36  ;;  %210 = vst [vmem:[%s298_s1 + $0x1a] sm:$0x3] %v155_v37 }
  0x15   :  { %211 = vst [vmem:[%s298_s1 + $0x1c] sm:$0x3] %v163_v38  ;;  %212 = vst [vmem:[%s298_s1 + $0x1e] sm:$0x3] %v171_v40 }

// kernel: vqvae_forward.8
= control target key start
LH: loop header
LB: loop body
LE: loop exit
PB: predicated region body
PF: predicated region fallthrough
CT: control target
= control target key end

     0   :  { %s1363_s12 = smov 0   ;;  %s1365_s13 = smov 0   ;;  %s1538_s0 = inlined_call_operand.vmem [shape: bf16[1,32,2048], index: 0, kind: input, shape index: {}]   ;;  %s1539_s1 = inlined_call_operand.vmem [shape: bf16[1,2048,256], index: 1, kind: input, shape index: {}]   ;;  %s1540_s2 = inlined_call_operand.vmem [shape: f32[1,256], index: 2, kind: input, shape index: {}]   ;;  %s1541_s3 = inlined_call_operand.vmem [shape: f32[1,32,256], index: 3, kind: output, shape index: {}]  }
   0x1   :  { %s1367_s14 = smov 0   ;;  %s1369_s15 = smov 0  }
   0x2   :  { %s1371_s16 = smov 0   ;;  %s1373_s17 = smov 0  }
   0x3   :  { %s1375_s18 = smov 0  }
   0x4 LB: > { %s28_s19 = sadd.s32 1, %s1332_s16  ;;  %s35_s20 = sadd.s32 1, %s1336_s17  ;;  %s1340_s18 = sphi %s1375_s18, %s13_s18   ;;  %s1336_s17 = sphi %s1373_s17, %s1547_s17   ;;  %s1332_s16 = sphi %s1371_s16, %s1546_s16   ;;  %s1328_s15 = sphi %s1369_s15, %s1545_s15   ;;  %s1324_s14 = sphi %s1367_s14, %s1544_s14   ;;  %s1320_s13 = sphi %s1365_s13, %s1543_s13   ;;  %s1316_s12 = sphi %s1363_s12, %s1542_s12  }
   0x5   : > { %p29_p0 = scmp.ge.s32.totalorder %s28_s19, 4  ;;  %p57_p1 = scmp.ne.s32.totalorder %s1320_s13, %s1316_s12 }
   0x6   : > { %p58_p2 = scmp.eq.s32.totalorder %s1340_s18, 0  ;;  %s50_s24 = sadd.s32 1, %s1320_s13 }
   0x7   : > { %s1549_s19 = smov (%p29_p0, %s28_s19), 0  ;;  %s1551_s20 = smov (!%p29_p0, %s35_s20), %s1336_s17 }
   0x8   : > { %p59_p3 = por %p58_p2, %p57_p1  ;;  %p37_p4 = scmp.ge.s32.totalorder %s1551_s20, 2 }
   0x9   : > { %s46_s21 = ssub.s32 %s1332_s16, %s1549_s19  ;;  %p1038_p6 = scmp.ge.s32.totalorder %s1340_s18, 8 }
   0xa   : > { %s1553_s20 = smov (%p37_p4, %s1551_s20), 0 }
   0xb   : > { %s44_s22 = ssub.s32 %s1336_s17, %s1553_s20  ;;  %177 = sbr.rel (%p1038_p6) target bundleno = 25 (0x19), region = 20 }
   0xc   : > { %s47_s23 = sor.u32 %s46_s21, %s44_s22 }
   0xd   : > { %p48_p5 = scmp.eq.s32.totalorder %s47_s23, 0 }
   0xf   : > { %s1414_s25 = scalar_select %p48_p5, %s1320_s13, %s50_s24  }
  0x10   : > { %180 = sbr.rel (!%p59_p3) target bundleno = 25 (0x19), region = 24  ;;  %s182_s26 = sand.u32 (%p59_p3), 1, %s1320_s13  }
  0x11   : > { %s1041_s27 = sshll.u32 (%p59_p3), %s1332_s16, 2  ;;  %s1039_s28 = sshll.u32 (%p59_p3), %s182_s26, 5 }
  0x12   : > { %s1124_s29 = sshll.u32 (%p59_p3), %s1336_s17, 5  ;;  %s184_s8 = scalar_lea.vmem (%p59_p3), [#allocation3], %s1039_s28 }
  0x13   : > { %s188_s30 = sadd.s32 (%p59_p3), %s1124_s29, %s1041_s27 }
  0x14   : > { %s1043_s4 = sshll.u32 (%p59_p3), %s188_s30, 2 }
  0x15   : > { %s192_s7 = scalar_lea.vmem %s1538_s0, %s1043_s4 }
  0x16   : > { %v205_v0 = vld [vmem:[%s192_s7] sm:$0xff]  ;;  %v207_v1 = vld [vmem:[%s192_s7 + $0x8] sm:$0xff] }
  0x17   : > { %v209_v2 = vld [vmem:[%s192_s7 + $0x40] sm:$0xff]  ;;  %206 = vst [vmem:[%s184_s8] sm:$0xff] %v205_v0  ;;  %208 = vst [vmem:[%s184_s8 + $0x8] sm:$0xff] %v207_v1  ;;  %v211_v3 = vld [vmem:[%s192_s7 + $0x48] sm:$0xff] }
  0x18   : > { %210 = vst [vmem:[%s184_s8 + $0x10] sm:$0xff] %v209_v2  ;;  %212 = vst [vmem:[%s184_s8 + $0x18] sm:$0xff] %v211_v3 }
  0x19 PF: > { %p1044_p7 = scmp.ge.s32.totalorder %s1340_s18, 1  ;;  %p236_p8 = scmp.lt.s32.totalorder %s1340_s18, 9 }
  0x1b   : > { %p237_p9 = pnand %p1044_p7, %p236_p8 }
  0x1c   : > { %s243_s9 = sand.u32 (!%p237_p9), 1, %s1316_s12   ;;  %s1046_s10 = sshll.u32 (!%p237_p9), %s1324_s14, 6 }
  0x1d   : > { %240 = sbr.rel (%p237_p9) target bundleno = 329 (0x149), region = 51  ;;  %s1045_s11 = sshll.u32 (!%p237_p9), %s243_s9, 5 }
  0x1e   : > { %p299_p10 = scmp.lt.s32.totalorder (!%p237_p9), %s1046_s10, 255  ;;  %s1049_s21 = sshll.u32 (!%p237_p9), %s1328_s15, 1 }
  0x1f   : > { %p320_p11 = scmp.lt.s32.totalorder (!%p237_p9), %s1049_s21, 3  ;;  %s1438_s12 = scalar_lea.vmem (!%p237_p9), [#allocation3], %s1045_s11 }
  0x20   : > { %p1052_p12 = scmp.ne.s32.totalorder (!%p237_p9), %s1324_s14, 0 }
  0x22   : > { %s1555_s10 = smov (!%p299_p10, %s1046_s10), 255  ;;  %s1557_s21 = smov (!%p320_p11, %s1049_s21), 3 }
  0x23   : > { %s1125_s22 = sshll.u32 %s1555_s10, 3  ;;  %s1126_s27 = sshll.u32 %s1557_s21, 4 }
  0x24   : > { %s1431_s26 = scalar_lea.vmem %s1539_s1, %s1125_s22  ;;  %s1436_s30 = scalar_lea.vmem %s1541_s3, %s1126_s27 }
  0x25   : > { %335 = sbr.rel (%p1052_p12) target bundleno = 45 (0x2d), region = 59 }
  0x2a   : > { %v1342_v4 = vmov 0.0  }
  0x2b   : > { %336 = vst [vmem:[#allocation2 + $0x10] sm:$0xff] %v1342_v4  ;;  %337 = vst [vmem:[#allocation2] sm:$0xff] %v1342_v4 }
  0x2c   : > { %338 = vst [vmem:[#allocation2 + $0x18] sm:$0xff] %v1342_v4  ;;  %339 = vst [vmem:[#allocation2 + $0x8] sm:$0xff] %v1342_v4 }
  0x2d PF: > { %v1184_v5 = vld [vmem:[%s1431_s26 + $0x74] ss:$8 sps:$4 sm:$0xff]   ;;  %v1188_v7 = vld [vmem:[%s1431_s26 + $0x70] ss:$8 sps:$4 sm:$0xff]   ;;  %v1190_v9 = vld [vmem:[%s1431_s26 + $0x64] ss:$8 sps:$4 sm:$0xff]  }
  0x2e   : > { %v1186_v6 = vld [vmem:[%s1431_s26 + $0x174] ss:$8 sps:$4 sm:$0xff]   ;;  %752 = vmatprep.subr.bf16.mxu0 %v1184_v5  ;;  %v1189_v8 = vld [vmem:[%s1431_s26 + $0x170] ss:$8 sps:$4 sm:$0xff]   ;;  %v1192_v10 = vld [vmem:[%s1431_s26 + $0x164] ss:$8 sps:$4 sm:$0xff]  }
  0x2f   : > { %795 = vmatprep.subr.bf16.mxu1 %v1186_v6  ;;  %753 = vmatpush1.bf16.msra.mxu0 %v1188_v7  ;;  %v1194_v11 = vld [vmem:[%s1431_s26 + $0x60] ss:$8 sps:$4 sm:$0xff]   ;;  %v1196_v13 = vld [vmem:[%s1431_s26 + $0x54] ss:$8 sps:$4 sm:$0xff]   ;;  %v1200_v15 = vld [vmem:[%s1431_s26 + $0x50] ss:$8 sps:$4 sm:$0xff]  }
  0x30   : > { %796 = vmatpush1.bf16.msra.mxu1 %v1189_v8  ;;  %754 = vmatprep.subr.bf16.mxu0 %v1190_v9  ;;  %v1195_v12 = vld [vmem:[%s1431_s26 + $0x160] ss:$8 sps:$4 sm:$0xff]   ;;  %v1198_v14 = vld [vmem:[%s1431_s26 + $0x154] ss:$8 sps:$4 sm:$0xff]   ;;  %v1201_v16 = vld [vmem:[%s1431_s26 + $0x150] ss:$8 sps:$4 sm:$0xff]  }
  0x31   : > { %797 = vmatprep.subr.bf16.mxu1 %v1192_v10  ;;  %v1202_v17 = vld [vmem:[%s1431_s26 + $0x44] ss:$8 sps:$4 sm:$0xff]   ;;  %v1206_v19 = vld [vmem:[%s1431_s26 + $0x40] ss:$8 sps:$4 sm:$0xff]   ;;  %v1208_v21 = vld [vmem:[%s1431_s26 + $0x34] ss:$8 sps:$4 sm:$0xff]  }
  0x32   : > { %v1204_v18 = vld [vmem:[%s1431_s26 + $0x144] ss:$8 sps:$4 sm:$0xff]   ;;  %v1207_v20 = vld [vmem:[%s1431_s26 + $0x140] ss:$8 sps:$4 sm:$0xff]   ;;  %v1210_v22 = vld [vmem:[%s1431_s26 + $0x134] ss:$8 sps:$4 sm:$0xff]  }
  0x33   : > { %755 = vmatpush1.bf16.msra.mxu0 %v1194_v11  ;;  %v1212_v23 = vld [vmem:[%s1431_s26 + $0x30] ss:$8 sps:$4 sm:$0xff]   ;;  %v1214_v25 = vld [vmem:[%s1431_s26 + $0x24] ss:$8 sps:$4 sm:$0xff]   ;;  %v1218_v27 = vld [vmem:[%s1431_s26 + $0x20] ss:$8 sps:$4 sm:$0xff]  }
  0x34   : > { %798 = vmatpush1.bf16.msra.mxu1 %v1195_v12  ;;  %756 = vmatprep.subr.bf16.mxu0 %v1196_v13  ;;  %v1213_v24 = vld [vmem:[%s1431_s26 + $0x130] ss:$8 sps:$4 sm:$0xff]   ;;  %v1216_v26 = vld [vmem:[%s1431_s26 + $0x124] ss:$8 sps:$4 sm:$0xff]   ;;  %v1219_v28 = vld [vmem:[%s1431_s26 + $0x120] ss:$8 sps:$4 sm:$0xff]  }
  0x35   : > { %799 = vmatprep.subr.bf16.mxu1 %v1198_v14  ;;  %v1220_v29 = vld [vmem:[%s1431_s26 + $0x14] ss:$8 sps:$4 sm:$0xff]   ;;  %v1224_v31 = vld [vmem:[%s1431_s26 + $0x10] ss:$8 sps:$4 sm:$0xff]   ;;  %v1226_v33 = vld [vmem:[%s1431_s26 + $0x4] ss:$8 sps:$4 sm:$0xff]  }
  0x36   : > { %v1222_v30 = vld [vmem:[%s1431_s26 + $0x114] ss:$8 sps:$4 sm:$0xff]   ;;  %v1225_v32 = vld [vmem:[%s1431_s26 + $0x110] ss:$8 sps:$4 sm:$0xff]   ;;  %v1228_v34 = vld [vmem:[%s1431_s26 + $0x104] ss:$8 sps:$4 sm:$0xff]  }
  0x37   : > { %757 = vmatpush1.bf16.msra.mxu0 %v1200_v15  ;;  %v1230_v35 = vld [vmem:[%s1431_s26] ss:$8 sps:$4 sm:$0xff]   ;;  %v1232_v37 = vld [vmem:[%s1431_s26 + $0xf4] ss:$8 sps:$4 sm:$0xff]   ;;  %v1236_v39 = vld [vmem:[%s1431_s26 + $0xf0] ss:$8 sps:$4 sm:$0xff]  }
  0x38   : > { %800 = vmatpush1.bf16.msra.mxu1 %v1201_v16  ;;  %758 = vmatprep.subr.bf16.mxu0 %v1202_v17  ;;  %v1231_v36 = vld [vmem:[%s1431_s26 + $0x100] ss:$8 sps:$4 sm:$0xff]   ;;  %v1234_v38 = vld [vmem:[%s1431_s26 + $0x1f4] ss:$8 sps:$4 sm:$0xff]   ;;  %v1237_v40 = vld [vmem:[%s1431_s26 + $0x1f0] ss:$8 sps:$4 sm:$0xff]  }
  0x39   : > { %801 = vmatprep.subr.bf16.mxu1 %v1204_v18  ;;  %v1238_v41 = vld [vmem:[%s1431_s26 + $0xe4] ss:$8 sps:$4 sm:$0xff]   ;;  %v1242_v43 = vld [vmem:[%s1431_s26 + $0xe0] ss:$8 sps:$4 sm:$0xff]   ;;  %v1244_v45 = vld [vmem:[%s1431_s26 + $0xd4] ss:$8 sps:$4 sm:$0xff]  }
  0x3a   : > { %v1240_v42 = vld [vmem:[%s1431_s26 + $0x1e4] ss:$8 sps:$4 sm:$0xff]   ;;  %v1243_v44 = vld [vmem:[%s1431_s26 + $0x1e0] ss:$8 sps:$4 sm:$0xff]   ;;  %v1246_v46 = vld [vmem:[%s1431_s26 + $0x1d4] ss:$8 sps:$4 sm:$0xff]  }
  0x3b   : > { %759 = vmatpush1.bf16.msra.mxu0 %v1206_v19  ;;  %v1248_v47 = vld [vmem:[%s1431_s26 + $0xd0] ss:$8 sps:$4 sm:$0xff]   ;;  %v1250_v49 = vld [vmem:[%s1431_s26 + $0xc4] ss:$8 sps:$4 sm:$0xff]   ;;  %v1254_v51 = vld [vmem:[%s1431_s26 + $0xc0] ss:$8 sps:$4 sm:$0xff]  }
  0x3c   : > { %802 = vmatpush1.bf16.msra.mxu1 %v1207_v20  ;;  %760 = vmatprep.subr.bf16.mxu0 %v1208_v21  ;;  %v1249_v48 = vld [vmem:[%s1431_s26 + $0x1d0] ss:$8 sps:$4 sm:$0xff]   ;;  %v1252_v50 = vld [vmem:[%s1431_s26 + $0x1c4] ss:$8 sps:$4 sm:$0xff]   ;;  %v1255_v53 = vld [vmem:[%s1431_s26 + $0x1c0] ss:$8 sps:$4 sm:$0xff]  }
  0x3d   : > { %803 = vmatprep.subr.bf16.mxu1 %v1210_v22  ;;  %v1282_v52 = vld [vmem:[%s1438_s12 + $0x4] ss:$16 sps:$4 sm:$0xff]   ;;  %v1285_v56 = vld [vmem:[%s1438_s12 + $0xc] ss:$16 sps:$4 sm:$0xff]   ;;  %v1260_v57 = vld [vmem:[%s1431_s26 + $0xb0] ss:$8 sps:$4 sm:$0xff]  }
  0x3e   : > { %v1256_v54 = vld [vmem:[%s1431_s26 + $0xb4] ss:$8 sps:$4 sm:$0xff]   ;;  %784 = vmatprep.mubr.bf16.mxu0 %v1282_v52  ;;  %827 = vmatprep.mubr.bf16.mxu1 %v1285_v56  ;;  %v1261_v58 = vld [vmem:[%s1431_s26 + $0x1b0] ss:$8 sps:$4 sm:$0xff]   ;;  %v1262_v59 = vld [vmem:[%s1431_s26 + $0xa4] ss:$8 sps:$4 sm:$0xff]  }
  0x3f   : > { %761 = vmatpush1.bf16.msra.mxu0 %v1212_v23  ;;  %v1258_v55 = vld [vmem:[%s1431_s26 + $0x1b4] ss:$8 sps:$4 sm:$0xff]   ;;  %v1264_v60 = vld [vmem:[%s1431_s26 + $0x1a4] ss:$8 sps:$4 sm:$0xff]   ;;  %v1266_v61 = vld [vmem:[%s1431_s26 + $0xa0] ss:$8 sps:$4 sm:$0xff]  }
  0x40   : > { %804 = vmatpush1.bf16.msra.mxu1 %v1213_v24  ;;  %762 = vmatprep.subr.bf16.mxu0 %v1214_v25  ;;  %v1267_v62 = vld [vmem:[%s1431_s26 + $0x1a0] ss:$8 sps:$4 sm:$0xff]   ;;  %v1268_v63 = vld [vmem:[%s1431_s26 + $0x94] ss:$8 sps:$4 sm:$0xff]   ;;  %v1272_v1 = vld [vmem:[%s1431_s26 + $0x90] ss:$8 sps:$4 sm:$0xff]  }
  0x41   : > { %805 = vmatprep.subr.bf16.mxu1 %v1216_v26  ;;  %v1270_v0 = vld [vmem:[%s1431_s26 + $0x194] ss:$8 sps:$4 sm:$0xff]   ;;  %v1273_v2 = vld [vmem:[%s1431_s26 + $0x190] ss:$8 sps:$4 sm:$0xff]   ;;  %v1274_v3 = vld [vmem:[%s1431_s26 + $0x84] ss:$8 sps:$4 sm:$0xff]  }
  0x42   : > { %v1276_v4 = vld [vmem:[%s1431_s26 + $0x184] ss:$8 sps:$4 sm:$0xff]   ;;  %v1278_v5 = vld [vmem:[%s1431_s26 + $0x80] ss:$8 sps:$4 sm:$0xff]   ;;  %v340_v10 = vld [vmem:[#allocation2 + $0x10] sm:$0xff]  ;;  %p1121_p13 = scmp.ne.s32.totalorder %s1324_s14, 3 }
  0x43   : > { %763 = vmatpush1.bf16.msra.mxu0 %v1218_v27  ;;  %v1279_v6 = vld [vmem:[%s1431_s26 + $0x180] ss:$8 sps:$4 sm:$0xff]   ;;  %v342_v19 = vld [vmem:[#allocation2 + $0x18] sm:$0xff] }
  0x44   : > { %806 = vmatpush1.bf16.msra.mxu1 %v1219_v28  ;;  %764 = vmatprep.subr.bf16.mxu0 %v1220_v29  ;;  %v1280_v7 = vld [vmem:[%s1438_s12] ss:$16 sps:$4 sm:$0xff]   ;;  %v1283_v8 = vld [vmem:[%s1438_s12 + $0x8] ss:$16 sps:$4 sm:$0xff]  }
  0x45   : > { %807 = vmatprep.subr.bf16.mxu1 %v1222_v30  ;;  %v341_v14 = vld [vmem:[#allocation2] sm:$0xff]  ;;  %v343_v24 = vld [vmem:[#allocation2 + $0x8] sm:$0xff] }
  0x47   : > { %765 = vmatpush1.bf16.msra.mxu0 %v1224_v31 }
  0x48   : > { %808 = vmatpush1.bf16.msra.mxu1 %v1225_v32  ;;  %766 = vmatprep.subr.bf16.mxu0 %v1226_v33 }
  0x49   : > { %809 = vmatprep.subr.bf16.mxu1 %v1228_v34 }
  0x4b   : > { %767 = vmatpush1.bf16.msra.mxu0 %v1230_v35 }
  0x4c   : > { %810 = vmatpush1.bf16.msra.mxu1 %v1231_v36  ;;  %768 = vmatprep.subr.bf16.mxu0 %v1232_v37 }
  0x4d   : > { %811 = vmatprep.subr.bf16.mxu1 %v1234_v38 }
  0x4f   : > { %769 = vmatpush2.bf16.msra.mxu0 %v1236_v39 }
  0x50   : > { %812 = vmatpush2.bf16.msra.mxu1 %v1237_v40  ;;  %770 = vmatprep.subr.bf16.mxu0 %v1238_v41 }
  0x51   : > { %813 = vmatprep.subr.bf16.mxu1 %v1240_v42 }
  0x53   : > { %771 = vmatpush2.bf16.msra.mxu0 %v1242_v43 }
  0x54   : > { %814 = vmatpush2.bf16.msra.mxu1 %v1243_v44  ;;  %772 = vmatprep.subr.bf16.mxu0 %v1244_v45 }
  0x55   : > { %815 = vmatprep.subr.bf16.mxu1 %v1246_v46 }
  0x57   : > { %773 = vmatpush2.bf16.msra.mxu0 %v1248_v47 }
  0x58   : > { %816 = vmatpush2.bf16.msra.mxu1 %v1249_v48  ;;  %774 = vmatprep.subr.bf16.mxu0 %v1250_v49 }
  0x59   : > { %817 = vmatprep.subr.bf16.mxu1 %v1252_v50 }
  0x5b   : > { %775 = vmatpush2.bf16.msra.mxu0 %v1254_v51 }
  0x5c   : > { %818 = vmatpush2.bf16.msra.mxu1 %v1255_v53  ;;  %776 = vmatprep.subr.bf16.mxu0 %v1256_v54 }
  0x5d   : > { %819 = vmatprep.subr.bf16.mxu1 %v1258_v55 }
  0x5f   : > { %777 = vmatpush2.bf16.msra.mxu0 %v1260_v57 }
  0x60   : > { %820 = vmatpush2.bf16.msra.mxu1 %v1261_v58  ;;  %778 = vmatprep.subr.bf16.mxu0 %v1262_v59 }
  0x61   : > { %821 = vmatprep.subr.bf16.mxu1 %v1264_v60 }
  0x63   : > { %779 = vmatpush2.bf16.msra.mxu0 %v1266_v61 }
  0x64   : > { %822 = vmatpush2.bf16.msra.mxu1 %v1267_v62  ;;  %780 = vmatprep.subr.bf16.mxu0 %v1268_v63 }
  0x65   : > { %823 = vmatprep.subr.bf16.mxu1 %v1270_v0 }
  0x67   : > { %781 = vmatpush2.bf16.msra.mxu0 %v1272_v1 }
  0x68   : > { %824 = vmatpush2.bf16.msra.mxu1 %v1273_v2  ;;  %782 = vmatprep.subr.bf16.mxu0 %v1274_v3 }
  0x69   : > { %825 = vmatprep.subr.bf16.mxu1 %v1276_v4 }
  0x6b   : > { %783 = vmatpush2.bf16.msra.mxu0 %v1278_v5 }
  0x6c   : > { %826 = vmatpush2.bf16.msra.mxu1 %v1279_v6 }
  0x6e   : > { %785 = vmatmul.mubr.bf16.vlgmr.msra.gmra.mxu0 %v1280_v7 }
  0x6f   : > { %828 = vmatmul.mubr.bf16.vlgmr.msra.gmra.mxu1 %v1283_v8 }
 0x12e   : > { %v786_v9 = vpop.f32.mrf.mxu0 }
 0x12f   : > { %v829_v11 = vpop.f32.mrf.mxu1 }
 0x130   : > { %v830_v12 = vadd.f32 %v829_v11, %v786_v9  ;;  %v788_v13 = vpop.f32.mrf.mxu0 }
 0x131   : > { %v831_v15 = vpop.f32.mrf.mxu1 }
 0x132   : > { %v838_v16 = vadd.f32 %v830_v12, %v340_v10  ;;  %v832_v17 = vadd.f32 %v831_v15, %v788_v13  ;;  %v790_v18 = vpop.f32.mrf.mxu0 }
 0x133   : > { %v833_v20 = vpop.f32.mrf.mxu1 }
 0x134   : > { %842 = vst [vmem:[#allocation2 + $0x10] sm:$0xff] %v838_v16  ;;  %v839_v21 = vadd.f32 %v832_v17, %v341_v14  ;;  %v834_v22 = vadd.f32 %v833_v20, %v790_v18  ;;  %v792_v23 = vpop.f32.mrf.mxu0 }
 0x135   : > { %v835_v25 = vpop.f32.mrf.mxu1 }
 0x136   : > { %843 = vst [vmem:[#allocation2] sm:$0xff] %v839_v21  ;;  %v840_v26 = vadd.f32 %v834_v22, %v342_v19  ;;  %v836_v27 = vadd.f32 %v835_v25, %v792_v23  ;;  %849 = sbr.rel (%p1121_p13) target bundleno = 329 (0x149), region = 63 }
 0x138   : > { %844 = vst [vmem:[#allocation2 + $0x18] sm:$0xff] %v840_v26  ;;  %v841_v28 = vadd.f32 %v836_v27, %v343_v24 }
 0x13a   : > { %845 = vst [vmem:[#allocation2 + $0x8] sm:$0xff] %v841_v28 }
 0x13b   : > { %v856_v29 = vlaneseq  ;;  %v854_v31 = vld [vmem:[%s1540_s2] sm:$0x3]  ;;  %v850_v32 = vld [vmem:[#allocation2 + $0x10] sm:$0xff] }
 0x13d   : > { %v857_v30 = vshrl.u32 %v856_v29, 7  ;;  %v851_v35 = vld [vmem:[#allocation2] sm:$0xff] }
 0x13f   : > { %v858_v33 = vsub.s32 0, %v857_v30  ;;  %v862_v34 = vsub.s32 1, %v857_v30  ;;  %v852_v36 = vld [vmem:[#allocation2 + $0x18] sm:$0xff] }
 0x141   : > { %v853_v37 = vld [vmem:[#allocation2 + $0x8] sm:$0xff]  ;;  %v859_v38 = vrot.slane %v854_v31, %v858_v33  ;;  %v863_v39 = vrot.slane %v854_v31, %v862_v34 }
 0x143   : > { %v866_v40 = vadd.f32 %v859_v38, %v850_v32  ;;  %v867_v41 = vadd.f32 %v863_v39, %v851_v35  ;;  %v868_v42 = vadd.f32 %v859_v38, %v852_v36  ;;  %v869_v43 = vadd.f32 %v863_v39, %v853_v37 }
 0x145   : > { %v870_v44 = vmax.f32 %v866_v40, 0.0  ;;  %v871_v45 = vmax.f32 %v867_v41, 0.0  ;;  %v872_v46 = vmax.f32 %v868_v42, 0.0  ;;  %v873_v47 = vmax.f32 %v869_v43, 0.0 }
 0x147   : > { %874 = vst [vmem:[%s1436_s30] sm:$0xff] %v870_v44  ;;  %875 = vst [vmem:[%s1436_s30 + $0x8] sm:$0xff] %v871_v45 }
 0x148   : > { %876 = vst [vmem:[%s1436_s30 + $0x10] sm:$0xff] %v872_v46  ;;  %877 = vst [vmem:[%s1436_s30 + $0x18] sm:$0xff] %v873_v47 }
 0x149 PF: > { %s13_s18 = sadd.s32 1, %s1340_s18   ;;  %s1542_s12 = smov %s1320_s13 }
 0x14a   : > { %p10_p0 = scmp.ge.s32.totalorder %s13_s18, 10   ;;  %s1543_s13 = smov %s1414_s25 }
 0x14b   : > { %s1544_s14 = smov %s1332_s16  ;;  %s1545_s15 = smov %s1336_s17 }
 0x14c   : > { %s1546_s16 = smov %s1549_s19  ;;  %s1547_s17 = smov %s1553_s20 }
 0x14d   :  { %12 = sbr.rel (!%p10_p0) target bundleno = 4 (0x4), region = 104 }

// kernel: vqvae_forward.9
= control target key start
LH: loop header
LB: loop body
LE: loop exit
PB: predicated region body
PF: predicated region fallthrough
CT: control target
= control target key end

     0   :  { %s1064_s12 = smov 0   ;;  %s1066_s13 = smov 0   ;;  %s1196_s0 = inlined_call_operand.vmem [shape: bf16[1,32,2304], index: 0, kind: input, shape index: {}]   ;;  %s1197_s1 = inlined_call_operand.vmem [shape: bf16[1,2304,128], index: 1, kind: input, shape index: {}]   ;;  %s1198_s2 = inlined_call_operand.vmem [shape: f32[1,128], index: 2, kind: input, shape index: {}]   ;;  %s1199_s3 = inlined_call_operand.vmem [shape: f32[1,32,128], index: 3, kind: output, shape index: {}]  }
   0x1   :  { %s1068_s14 = smov 0   ;;  %s1070_s15 = smov 0  }
   0x2   :  { %s1072_s16 = smov 0   ;;  %s1074_s17 = smov 0  }
   0x3   :  { %s1076_s18 = smov 0  }
   0x4 LB: > { %s28_s19 = sadd.s32 1, %s1031_s16  ;;  %s35_s20 = sadd.s32 1, %s1035_s17  ;;  %s1039_s18 = sphi %s1076_s18, %s13_s18   ;;  %s1035_s17 = sphi %s1074_s17, %s1205_s17   ;;  %s1031_s16 = sphi %s1072_s16, %s1204_s16   ;;  %s1027_s15 = sphi %s1070_s15, %s1203_s15   ;;  %s1023_s14 = sphi %s1068_s14, %s1202_s14   ;;  %s1019_s13 = sphi %s1066_s13, %s1201_s13   ;;  %s1015_s12 = sphi %s1064_s12, %s1200_s12  }
   0x5   : > { %p29_p0 = scmp.ge.s32.totalorder %s28_s19, 6  ;;  %p57_p1 = scmp.ne.s32.totalorder %s1019_s13, %s1015_s12 }
   0x6   : > { %p58_p2 = scmp.eq.s32.totalorder %s1039_s18, 0  ;;  %s50_s24 = sadd.s32 1, %s1019_s13 }
   0x7   : > { %s1207_s19 = smov (%p29_p0, %s28_s19), 0  ;;  %s1209_s20 = smov (!%p29_p0, %s35_s20), %s1035_s17 }
   0x8   : > { %p59_p3 = por %p58_p2, %p57_p1  ;;  %p37_p4 = scmp.ge.s32.totalorder %s1209_s20, 2 }
   0x9   : > { %s46_s21 = ssub.s32 %s1031_s16, %s1207_s19  ;;  %p800_p6 = scmp.ge.s32.totalorder %s1039_s18, 12 }
   0xa   : > { %s1211_s20 = smov (%p37_p4, %s1209_s20), 0 }
   0xb   : > { %s44_s22 = ssub.s32 %s1035_s17, %s1211_s20  ;;  %175 = sbr.rel (%p800_p6) target bundleno = 27 (0x1b), region = 20 }
   0xc   : > { %s47_s23 = sor.u32 %s46_s21, %s44_s22 }
   0xd   : > { %p48_p5 = scmp.eq.s32.totalorder %s47_s23, 0 }
   0xf   : > { %s1115_s25 = scalar_select %p48_p5, %s1019_s13, %s50_s24  }
  0x10   : > { %178 = sbr.rel (!%p59_p3) target bundleno = 27 (0x1b), region = 24  ;;  %s180_s26 = sand.u32 (%p59_p3), 1, %s1019_s13  }
  0x11   : > { %s184_s27 = smul.u32 (%p59_p3), 3, %s1031_s16 }
  0x12   : > { %s895_s28 = smul.u32 (%p59_p3), 24, %s180_s26 }
  0x13   : > { %s896_s29 = smul.u32 (%p59_p3), 36, %s1035_s17 }
  0x14   : > { %s182_s8 = scalar_lea.vmem (%p59_p3), [#allocation3], %s895_s28 }
  0x15   : > { %s186_s30 = sadd.s32 %s896_s29, %s184_s27 }
  0x16   : > { %s803_s4 = sshll.u32 %s186_s30, 2 }
  0x17   : > { %s190_s7 = scalar_lea.vmem %s1196_s0, %s803_s4 }
  0x18   : > { %v205_v0 = vld [vmem:[%s190_s7] sm:$0xff]  ;;  %v207_v1 = vld [vmem:[%s190_s7 + $0x48] sm:$0xff]  ;;  %v806_v3 = vld [vmem:[%s190_s7 + $0x50] sm:$0xf] }
  0x19   : > { %v804_v2 = vld [vmem:[%s190_s7 + $0x8] sm:$0xf]  ;;  %206 = vst [vmem:[%s182_s8] sm:$0xff] %v205_v0  ;;  %208 = vst [vmem:[%s182_s8 + $0xc] sm:$0xff] %v207_v1 }
  0x1a   : > { %805 = vst [vmem:[%s182_s8 + $0x8] sm:$0xf] %v804_v2  ;;  %807 = vst [vmem:[%s182_s8 + $0x14] sm:$0xf] %v806_v3 }
  0x1b PF: > { %p808_p7 = scmp.ge.s32.totalorder %s1039_s18, 1  ;;  %p241_p8 = scmp.lt.s32.totalorder %s1039_s18, 13 }
  0x1d   : > { %p242_p9 = pnand %p808_p7, %p241_p8 }
  0x1e   : > { %s248_s9 = sand.u32 (!%p242_p9), 1, %s1015_s12   ;;  %s295_s10 = smul.u32 (!%p242_p9), 48, %s1023_s14 }
  0x1f   : > { %245 = sbr.rel (%p242_p9) target bundleno = 296 (0x128), region = 54  ;;  %s810_s21 = sshll.u32 (!%p242_p9), %s1027_s15, 1 }
  0x20   : > { %s897_s11 = smul.u32 (!%p242_p9), 24, %s248_s9  ;;  %p298_p10 = scmp.lt.s32.totalorder (!%p242_p9), %s295_s10, 287 }
  0x21   : > { %p314_p11 = scmp.lt.s32.totalorder (!%p242_p9), %s810_s21, 3  ;;  %p812_p12 = scmp.ne.s32.totalorder (!%p242_p9), %s1023_s14, 0 }
  0x22   : > { %s1139_s12 = scalar_lea.vmem (!%p242_p9), [#allocation3], %s897_s11 }
  0x24   : > { %s1213_s10 = smov (!%p298_p10, %s295_s10), 287  ;;  %s1215_s21 = smov (!%p314_p11, %s810_s21), 3 }
  0x25   : > { %s809_s22 = sshll.u32 %s1213_s10, 2  ;;  %s811_s27 = sshll.u32 %s1215_s21, 3 }
  0x26   : > { %s1132_s26 = scalar_lea.vmem %s1197_s1, %s809_s22  ;;  %s1137_s30 = scalar_lea.vmem %s1199_s3, %s811_s27 }
  0x27   : > { %328 = sbr.rel (%p812_p12) target bundleno = 46 (0x2e), region = 62 }
  0x2c   : > { %v1041_v4 = vmov 0.0  }
  0x2d   : > { %329 = vst [vmem:[#allocation2] sm:$0xff] %v1041_v4  ;;  %330 = vst [vmem:[#allocation2 + $0x8] sm:$0xff] %v1041_v4 }
  0x2e PF: > { %v957_v5 = vld [vmem:[%s1132_s26 + $0x78] sm:$0xff]   ;;  %v1042_v6 = vmov 0.0   ;;  %vm1043_vm0 = vmmov 0   ;;  %v960_v9 = vld [vmem:[%s1132_s26 + $0x70] sm:$0xff]   ;;  %v963_v12 = vld [vmem:[%s1132_s26 + $0x68] sm:$0xff]   ;;  %p840_p13 = scmp.ne.s32.totalorder %s1023_s14, 5 }
  0x2f   : > { %875 = vmatprep.subr.bf16.mxu1 %v1042_v6  ;;  %v958_v7 = vld [vmem:[%s1132_s26 + $0xb8] sm:$0xff]   ;;  %844 = vmatprep.subr.bf16.mxu0 %v957_v5  ;;  %v961_v10 = vld [vmem:[%s1132_s26 + $0xb0] sm:$0xff]   ;;  %v964_v13 = vld [vmem:[%s1132_s26 + $0xa8] sm:$0xff]  }
  0x30   : > { %v959_v8 = vld [vmem:[%s1132_s26 + $0x38] sm:$0xff]   ;;  %891 = vmatprep.mubr.msk.bf16.mxu1 %vm1043_vm0, %v1042_v6  ;;  %876 = vmatpush3.bf16.msra.mxu1 %v958_v7  ;;  %v962_v11 = vld [vmem:[%s1132_s26 + $0x30] sm:$0xff]   ;;  %v965_v14 = vld [vmem:[%s1132_s26 + $0x28] sm:$0xff]  }
  0x31   : > { %845 = vmatpush3.bf16.msra.mxu0 %v959_v8  ;;  %877 = vmatprep.subr.bf16.mxu1 %v1042_v6  ;;  %v966_v15 = vld [vmem:[%s1132_s26 + $0x60] sm:$0xff]   ;;  %v969_v18 = vld [vmem:[%s1132_s26 + $0x58] sm:$0xff]   ;;  %v972_v21 = vld [vmem:[%s1132_s26 + $0x50] sm:$0xff]  }
  0x32   : > { %846 = vmatprep.subr.bf16.mxu0 %v960_v9  ;;  %v967_v16 = vld [vmem:[%s1132_s26 + $0xa0] sm:$0xff]   ;;  %v970_v19 = vld [vmem:[%s1132_s26 + $0x98] sm:$0xff]   ;;  %v973_v22 = vld [vmem:[%s1132_s26 + $0x90] sm:$0xff]  }
  0x33   : > { %v968_v17 = vld [vmem:[%s1132_s26 + $0x20] sm:$0xff]   ;;  %v971_v20 = vld [vmem:[%s1132_s26 + $0x18] sm:$0xff]   ;;  %v974_v23 = vld [vmem:[%s1132_s26 + $0x10] sm:$0xff]  }
  0x34   : > { %878 = vmatpush3.bf16.msra.mxu1 %v961_v10  ;;  %v975_v24 = vld [vmem:[%s1132_s26 + $0x48] sm:$0xff]   ;;  %v978_v27 = vld [vmem:[%s1132_s26 + $0x40] sm:$0xff]  }
  0x35   : > { %847 = vmatpush3.bf16.msra.mxu0 %v962_v11  ;;  %879 = vmatprep.subr.bf16.mxu1 %v1042_v6  ;;  %v976_v25 = vld [vmem:[%s1132_s26 + $0x88] sm:$0xff]   ;;  %v979_v29 = vld [vmem:[%s1132_s26 + $0x80] sm:$0xff]  }
  0x36   : > { %848 = vmatprep.subr.bf16.mxu0 %v963_v12  ;;  %v977_v26 = vld [vmem:[%s1132_s26 + $0x8] sm:$0xff]   ;;  %v980_v30 = vld [vmem:[%s1132_s26] sm:$0xff]  }
  0x37   : > { %v983_v28 = vld [vmem:[%s1139_s12 + $0x4] ss:$12 sps:$4 sm:$0xff]   ;;  %v984_v31 = vld [vmem:[%s1139_s12 + $0x8] ss:$12 sps:$4 sm:$0xff]   ;;  %v981_v32 = vld [vmem:[%s1139_s12] ss:$12 sps:$4 sm:$0xff]  }
  0x38   : > { %880 = vmatpush3.bf16.msra.mxu1 %v964_v13  ;;  %577 = vmatprep.mubr.bf16.mxu0 %v983_v28  ;;  %v331_v39 = vld [vmem:[#allocation2] sm:$0xff]  ;;  %v332_v46 = vld [vmem:[#allocation2 + $0x8] sm:$0xff] }
  0x39   : > { %849 = vmatpush3.bf16.msra.mxu0 %v965_v14  ;;  %881 = vmatprep.subr.bf16.mxu1 %v1042_v6 }
  0x3a   : > { %850 = vmatprep.subr.bf16.mxu0 %v966_v15 }
  0x3c   : > { %882 = vmatpush3.bf16.msra.mxu1 %v967_v16 }
  0x3d   : > { %851 = vmatpush3.bf16.msra.mxu0 %v968_v17  ;;  %883 = vmatprep.subr.bf16.mxu1 %v1042_v6 }
  0x3e   : > { %852 = vmatprep.subr.bf16.mxu0 %v969_v18 }
  0x40   : > { %884 = vmatpush3.bf16.msra.mxu1 %v970_v19 }
  0x41   : > { %853 = vmatpush3.bf16.msra.mxu0 %v971_v20  ;;  %885 = vmatprep.subr.bf16.mxu1 %v1042_v6 }
  0x42   : > { %854 = vmatprep.subr.bf16.mxu0 %v972_v21 }
  0x44   : > { %886 = vmatpush3.bf16.msra.mxu1 %v973_v22 }
  0x45   : > { %855 = vmatpush3.bf16.msra.mxu0 %v974_v23  ;;  %887 = vmatprep.subr.bf16.mxu1 %v1042_v6 }
  0x46   : > { %856 = vmatprep.subr.bf16.mxu0 %v975_v24 }
  0x48   : > { %888 = vmatpush3.bf16.msra.mxu1 %v976_v25 }
  0x49   : > { %857 = vmatpush3.bf16.msra.mxu0 %v977_v26  ;;  %889 = vmatprep.subr.bf16.mxu1 %v1042_v6 }
  0x4a   : > { %858 = vmatprep.subr.bf16.mxu0 %v978_v27 }
  0x4c   : > { %890 = vmatpush3.bf16.msra.mxu1 %v979_v29 }
  0x4d   : > { %859 = vmatpush3.bf16.msra.mxu0 %v980_v30 }
  0x4f   : > { %892 = vmatmul.mubr.bf16.vlgmr.msra.gmra.mxu1 %v984_v31 }
  0x50   : > { %578 = vmatmul.mubr.bf16.vlgmr.msra.gmra.mxu0 %v981_v32 }
 0x10f   : > { %v620_v33 = vpop.f32.mrf.mxu1 }
 0x110   : > { %v860_v34 = vpop.f32.mrf.mxu0 }
 0x111   : > { %v893_v35 = vpop.f32.mrf.mxu1 }
 0x112   : > { %v861_v36 = vpop.f32.mrf.mxu0 }
 0x113   : > { %v862_v37 = vadd.f32 %v861_v36, %v860_v34  ;;  %v623_v38 = vpop.f32.mrf.mxu1 }
 0x114   : > { %v863_v40 = vpop.f32.mrf.mxu0 }
 0x115   : > { %v621_v41 = vadd.f32 %v862_v37, %v620_v33  ;;  %v894_v42 = vpop.f32.mrf.mxu1 }
 0x116   : > { %v864_v43 = vpop.f32.mrf.mxu0 }
 0x117   : > { %v627_v44 = vadd.f32 %v621_v41, %v331_v39  ;;  %v865_v45 = vadd.f32 %v864_v43, %v863_v40 }
 0x119   : > { %629 = vst [vmem:[#allocation2] sm:$0xff] %v627_v44  ;;  %v624_v47 = vadd.f32 %v865_v45, %v623_v38  ;;  %634 = sbr.rel (%p840_p13) target bundleno = 296 (0x128), region = 66 }
 0x11b   : > { %v628_v48 = vadd.f32 %v624_v47, %v332_v46 }
 0x11d   : > { %630 = vst [vmem:[#allocation2 + $0x8] sm:$0xff] %v628_v48 }
 0x11e   : > { %v841_v50 = vld [vmem:[%s1198_s2] ss:$0 sm:$0xff] }
 0x120   : > { %v635_v49 = vld [vmem:[#allocation2] sm:$0xff] }
 0x121   : > { %v644_v52 = vadd.f32 %v841_v50, %v635_v49 }
 0x123   : > { %646 = vst [vmem:[%s1137_s30] sm:$0xff] %v644_v52 }
 0x124   : > { %v636_v51 = vld [vmem:[#allocation2 + $0x8] sm:$0xff] }
 0x125   : > { %v645_v53 = vadd.f32 %v841_v50, %v636_v51 }
 0x127   : > { %647 = vst [vmem:[%s1137_s30 + $0x8] sm:$0xff] %v645_v53 }
 0x128 PF: > { %s13_s18 = sadd.s32 1, %s1039_s18   ;;  %s1200_s12 = smov %s1019_s13 }
 0x129   : > { %p10_p0 = scmp.ge.s32.totalorder %s13_s18, 14   ;;  %s1201_s13 = smov %s1115_s25 }
 0x12a   : > { %s1202_s14 = smov %s1031_s16  ;;  %s1203_s15 = smov %s1035_s17 }
 0x12b   : > { %s1204_s16 = smov %s1207_s19  ;;  %s1205_s17 = smov %s1211_s20 }
 0x12c   :  { %12 = sbr.rel (!%p10_p0) target bundleno = 4 (0x4), region = 113 }

// kernel: vqvae_forward.10
= control target key start
LH: loop header
LB: loop body
LE: loop exit
PB: predicated region body
PF: predicated region fallthrough
CT: control target
= control target key end

     0   :  { %v977_v3 = vmov 0.0   ;;  %vm55_vm0 = vcmask 523264   ;;  %v264_v45 = vlaneseq  ;;  %s1542_s1 = inlined_call_operand.vmem [shape: f32[64,512], index: 1, kind: input, shape index: {}]   ;;  %s1543_s0 = inlined_call_operand.vmem [shape: f32[32,64], index: 0, kind: input, shape index: {}]   ;;  %s1544_s3 = inlined_call_operand.vmem [shape: f32[1,512], index: 3, kind: input, shape index: {}]   ;;  %s1545_s2 = inlined_call_operand.vmem [shape: f32[512,64], index: 2, kind: input, shape index: {}]   ;;  %s1546_s5 = inlined_call_operand.vmem [shape: f32[1,8,512], index: 5, kind: output, shape index: {1}]   ;;  %s1547_s4 = inlined_call_operand.vmem [shape: f32[32,64], index: 4, kind: output, shape index: {0}]  }
   0x1   :  { %v52_v0 = vld [vmem:[%s1542_s1 + $0xe8] sm:$0xff]  ;;  %v54_v1 = vld [vmem:[%s1542_s1 + $0xf8] sm:$0xff]  ;;  %v51_v2 = vld [vmem:[%s1542_s1 + $0xe0] sm:$0xff]  ;;  %132 = vmatprep.mubr.f32.mxu0 %v977_v3  ;;  %221 = vmatprep.mubr.f32.mxu1 %v977_v3 }
   0x2   :  { %84 = vmatprep.subr.mxu0 %v52_v0  ;;  %173 = vmatprep.subr.mxu1 %v54_v1  ;;  %v53_v4 = vld [vmem:[%s1542_s1 + $0xf0] sm:$0xff]  ;;  %v48_v5 = vld [vmem:[%s1542_s1 + $0xc8] sm:$0xff]  ;;  %v50_v6 = vld [vmem:[%s1542_s1 + $0xd8] sm:$0xff]  ;;  %v1138_v46 = vshrl.u32 %v264_v45, 7 }
   0x3   :  { %85 = vmatpush1.msra.mxu0 %v51_v2  ;;  %174 = vmatpush1.msra.mxu1 %v53_v4  ;;  %v47_v7 = vld [vmem:[%s1542_s1 + $0xc0] sm:$0xff]  ;;  %v49_v8 = vld [vmem:[%s1542_s1 + $0xd0] sm:$0xff]  ;;  %v44_v9 = vld [vmem:[%s1542_s1 + $0xa8] sm:$0xff] }
   0x4   :  { %86 = vmatprep.subr.mxu0 %v48_v5  ;;  %175 = vmatprep.subr.mxu1 %v50_v6  ;;  %v46_v10 = vld [vmem:[%s1542_s1 + $0xb8] sm:$0xff]  ;;  %v43_v11 = vld [vmem:[%s1542_s1 + $0xa0] sm:$0xff]  ;;  %v45_v12 = vld [vmem:[%s1542_s1 + $0xb0] sm:$0xff]  ;;  %v266_v47 = vsub.s32 0, %v1138_v46  ;;  %v270_v48 = vsub.s32 1, %v1138_v46  ;;  %v274_v51 = vsub.s32 2, %v1138_v46 }
   0x5   :  { %87 = vmatpush1.msra.mxu0 %v47_v7  ;;  %176 = vmatpush1.msra.mxu1 %v49_v8  ;;  %v40_v13 = vld [vmem:[%s1542_s1 + $0x88] sm:$0xff]  ;;  %v42_v14 = vld [vmem:[%s1542_s1 + $0x98] sm:$0xff]  ;;  %v39_v15 = vld [vmem:[%s1542_s1 + $0x80] sm:$0xff]  ;;  %v278_v54 = vsub.s32 3, %v1138_v46 }
   0x6   :  { %88 = vmatprep.subr.mxu0 %v44_v9  ;;  %177 = vmatprep.subr.mxu1 %v46_v10  ;;  %v41_v16 = vld [vmem:[%s1542_s1 + $0x90] sm:$0xff]  ;;  %v36_v17 = vld [vmem:[%s1542_s1 + $0x68] sm:$0xff]  ;;  %v38_v18 = vld [vmem:[%s1542_s1 + $0x78] sm:$0xff] }
   0x7   :  { %89 = vmatpush1.msra.mxu0 %v43_v11  ;;  %178 = vmatpush1.msra.mxu1 %v45_v12  ;;  %v35_v19 = vld [vmem:[%s1542_s1 + $0x60] sm:$0xff]  ;;  %v37_v20 = vld [vmem:[%s1542_s1 + $0x70] sm:$0xff]  ;;  %v32_v21 = vld [vmem:[%s1542_s1 + $0x48] sm:$0xff] }
   0x8   :  { %90 = vmatprep.subr.mxu0 %v40_v13  ;;  %179 = vmatprep.subr.mxu1 %v42_v14  ;;  %v34_v22 = vld [vmem:[%s1542_s1 + $0x58] sm:$0xff]  ;;  %v31_v23 = vld [vmem:[%s1542_s1 + $0x40] sm:$0xff]  ;;  %v33_v24 = vld [vmem:[%s1542_s1 + $0x50] sm:$0xff] }
   0x9   :  { %91 = vmatpush1.msra.mxu0 %v39_v15  ;;  %180 = vmatpush1.msra.mxu1 %v41_v16  ;;  %v28_v25 = vld [vmem:[%s1542_s1 + $0x28] sm:$0xff]  ;;  %v30_v26 = vld [vmem:[%s1542_s1 + $0x38] sm:$0xff]  ;;  %v27_v27 = vld [vmem:[%s1542_s1 + $0x20] sm:$0xff] }
   0xa   :  { %92 = vmatprep.subr.mxu0 %v36_v17  ;;  %181 = vmatprep.subr.mxu1 %v38_v18  ;;  %v29_v28 = vld [vmem:[%s1542_s1 + $0x30] sm:$0xff]  ;;  %v19_v29 = vld [vmem:[%s1543_s0] sm:$0xff]  ;;  %v24_v31 = vld [vmem:[%s1542_s1 + $0x8] sm:$0xff] }
   0xb   :  { %93 = vmatpush1.msra.mxu0 %v35_v19  ;;  %182 = vmatpush1.msra.mxu1 %v37_v20  ;;  %v21_v30 = vld [vmem:[%s1543_s0 + $0x10] sm:$0xff]  ;;  %v26_v32 = vld [vmem:[%s1542_s1 + $0x18] sm:$0xff]  ;;  %v246_v33 = vmul.f32 %v19_v29, %v19_v29  ;;  %v23_v35 = vld [vmem:[%s1542_s1] sm:$0xff] }
   0xc   :  { %94 = vmatprep.subr.mxu0 %v32_v21  ;;  %183 = vmatprep.subr.mxu1 %v34_v22  ;;  %v248_v34 = vmul.f32 %v21_v30, %v21_v30  ;;  %v25_v36 = vld [vmem:[%s1542_s1 + $0x10] sm:$0xff]  ;;  %v20_v37 = vld [vmem:[%s1543_s0 + $0x8] sm:$0xff]  ;;  %v22_v38 = vld [vmem:[%s1543_s0 + $0x18] sm:$0xff] }
   0xd   :  { %95 = vmatpush1.msra.mxu0 %v31_v23  ;;  %184 = vmatpush1.msra.mxu1 %v33_v24  ;;  %v250_v39 = vsel %vm55_vm0, %v246_v33, 0.0  ;;  %v247_v40 = vmul.f32 %v20_v37, %v20_v37  ;;  %v249_v42 = vmul.f32 %v22_v38, %v22_v38  ;;  %v262_v49 = vld [vmem:[%s1544_s3] sm:$0xf] }
   0xe   :  { %96 = vmatprep.subr.mxu0 %v28_v25  ;;  %185 = vmatprep.subr.mxu1 %v30_v26  ;;  %v256_v41 = vsel %vm55_vm0, %v248_v34, 0.0  ;;  %v267_v52 = vrot.slane %v262_v49, %v266_v47  ;;  %v271_v53 = vrot.slane %v262_v49, %v270_v48  ;;  %v275_v55 = vrot.slane %v262_v49, %v274_v51 }
   0xf   :  { %97 = vmatpush1.msra.mxu0 %v27_v27  ;;  %186 = vmatpush1.msra.mxu1 %v29_v28  ;;  %v253_v43 = vsel %vm55_vm0, %v247_v40, 0.0  ;;  %v259_v44 = vsel %vm55_vm0, %v249_v42, 0.0  ;;  %v279_v0 = vrot.slane %v262_v49, %v278_v54 }
  0x10   :  { %98 = vmatprep.subr.mxu0 %v24_v31  ;;  %187 = vmatprep.subr.mxu1 %v26_v32 }
  0x11   :  { %99 = vmatpush1.msra.mxu0 %v23_v35  ;;  %188 = vmatpush1.msra.mxu1 %v25_v36 }
  0x12   :  { %847 = vmatmul.mubr.msk.f32.vlgmr.msra.gmra.mxu0 %vm55_vm0, %v19_v29  ;;  %851 = vmatmul.mubr.msk.f32.vlgmr.msra.gmra.mxu1 %vm55_vm0, %v19_v29 }
  0x13   :  { %138 = vmatprep.mubr.f32.mxu0 %v977_v3  ;;  %227 = vmatprep.mubr.f32.mxu1 %v977_v3 }
  0x14   :  { %251 = vadd.xlane.f32.xlu0 %v250_v39  ;;  %257 = vadd.xlane.f32.xlu1 %v256_v41 }
  0x16   :  { %848 = vmatmul.mubr.msk.f32.gmra.mxu0 %vm55_vm0, %v20_v37  ;;  %852 = vmatmul.mubr.msk.f32.gmra.mxu1 %vm55_vm0, %v20_v37 }
  0x17   :  { %144 = vmatprep.mubr.f32.mxu0 %v977_v3  ;;  %233 = vmatprep.mubr.f32.mxu1 %v977_v3 }
  0x18   :  { %254 = vadd.xlane.f32.xlu0 %v253_v43  ;;  %260 = vadd.xlane.f32.xlu1 %v259_v44 }
  0x1a   :  { %849 = vmatmul.mubr.msk.f32.gmra.mxu0 %vm55_vm0, %v21_v30  ;;  %853 = vmatmul.mubr.msk.f32.gmra.mxu1 %vm55_vm0, %v21_v30 }
  0x1b   :  { %150 = vmatprep.mubr.f32.mxu0 %v977_v3  ;;  %239 = vmatprep.mubr.f32.mxu1 %v977_v3 }
  0x1e   :  { %850 = vmatmul.mubr.msk.f32.gmra.mxu0 %vm55_vm0, %v22_v38  ;;  %854 = vmatmul.mubr.msk.f32.gmra.mxu1 %vm55_vm0, %v22_v38 }
  0x9d   :  { %v252_v50 = vpop.xlane.xlu0 %251  ;;  %v258_v5 = vpop.xlane.xlu1 %257 }
  0x9e   :  { %v284_v58 = vadd.f32 %v267_v52, %v252_v50  ;;  %v285_v60 = vadd.f32 %v271_v53, %v252_v50  ;;  %v286_v1 = vadd.f32 %v275_v55, %v252_v50  ;;  %v287_v13 = vadd.f32 %v279_v0, %v252_v50 }
  0x9f   :  { %v292_v23 = vadd.f32 %v267_v52, %v258_v5  ;;  %v294_v25 = vadd.f32 %v275_v55, %v258_v5  ;;  %v293_v26 = vadd.f32 %v271_v53, %v258_v5  ;;  %v295_v37 = vadd.f32 %v279_v0, %v258_v5 }
  0xa1   :  { %v255_v61 = vpop.xlane.xlu0 %254  ;;  %v261_v30 = vpop.xlane.xlu1 %260 }
  0xa2   :  { %v288_v7 = vadd.f32 %v267_v52, %v255_v61  ;;  %v289_v12 = vadd.f32 %v271_v53, %v255_v61  ;;  %v290_v15 = vadd.f32 %v275_v55, %v255_v61  ;;  %v291_v33 = vadd.f32 %v279_v0, %v255_v61 }
  0xa3   :  { %v296_v44 = vadd.f32 %v267_v52, %v261_v30  ;;  %v297_v49 = vadd.f32 %v271_v53, %v261_v30 }
  0xd2   :  { %v134_v56 = vpop.f32.mrf.mxu0  ;;  %v223_v57 = vpop.f32.mrf.mxu1 }
  0xd3   :  { %v300_v59 = vmul.f32 2.0, %v134_v56  ;;  %v302_v2 = vmul.f32 2.0, %v223_v57 }
  0xd4   :  { %v136_v62 = vpop.f32.mrf.mxu0  ;;  %v225_v63 = vpop.f32.mrf.mxu1 }
  0xd5   :  { %v301_v4 = vmul.f32 2.0, %v136_v62  ;;  %v1147_v9 = vsub.f32 %v284_v58, %v300_v59  ;;  %v303_v14 = vmul.f32 2.0, %v225_v63  ;;  %v1151_v18 = vsub.f32 %v286_v1, %v302_v2 }
  0xd6   :  { %v140_v6 = vpop.f32.mrf.mxu0  ;;  %v229_v8 = vpop.f32.mrf.mxu1  ;;  %v298_v58 = vadd.f32 %v275_v55, %v261_v30  ;;  %v299_v2 = vadd.f32 %v279_v0, %v261_v30 }
  0xd7   :  { %v1149_v10 = vsub.f32 %v285_v60, %v301_v4  ;;  %v304_v11 = vmul.f32 2.0, %v140_v6  ;;  %v306_v20 = vmul.f32 2.0, %v229_v8  ;;  %v1160_v32 = vsub.f32 %v287_v13, %v303_v14 }
  0xd8   :  { %v142_v16 = vpop.f32.mrf.mxu0  ;;  %v231_v17 = vpop.f32.mrf.mxu1  ;;  %v1184_v14 = vand.u32 127, %v264_v45 }
  0xd9   :  { %v337_v19 = vmin.f32 %v1147_v9, %v1149_v10  ;;  %v305_v21 = vmul.f32 2.0, %v142_v16  ;;  %v1155_v27 = vsub.f32 %v288_v7, %v304_v11  ;;  %v307_v34 = vmul.f32 2.0, %v231_v17 }
  0xda   :  { %v146_v22 = vpop.f32.mrf.mxu0  ;;  %v235_v24 = vpop.f32.mrf.mxu1  ;;  %v1162_v38 = vsub.f32 %v290_v15, %v306_v20  ;;  %v1187_v15 = vadd.s32 128, %v1184_v14  ;;  %v1190_v17 = vadd.s32 256, %v1184_v14  ;;  %v1198_v45 = vadd.s32 384, %v1184_v14 }
  0xdb   :  { %v1157_v28 = vsub.f32 %v289_v12, %v305_v21  ;;  %v308_v29 = vmul.f32 2.0, %v146_v22  ;;  %v338_v31 = vmin.f32 %v337_v19, %v1151_v18  ;;  %v310_v40 = vmul.f32 2.0, %v235_v24 }
  0xdc   :  { %v148_v35 = vpop.f32.mrf.mxu0  ;;  %v237_v36 = vpop.f32.mrf.mxu1  ;;  %v1168_v57 = vsub.f32 %v291_v33, %v307_v34 }
  0xdd   :  { %v342_v39 = vmin.f32 %v1155_v27, %v1157_v28  ;;  %v309_v41 = vmul.f32 2.0, %v148_v35  ;;  %v311_v42 = vmul.f32 2.0, %v237_v36  ;;  %v339_v48 = vmin.f32 %v338_v31, %v1160_v32 }
  0xde   :  { %v152_v43 = vpop.f32.mrf.mxu0  ;;  %v241_v47 = vpop.f32.mrf.mxu1  ;;  %v324_v50 = vsub.f32 %v292_v23, %v308_v29  ;;  %v1170_v61 = vsub.f32 %v294_v25, %v310_v40 }
  0xdf   :  { %v325_v51 = vsub.f32 %v293_v26, %v309_v41  ;;  %v312_v54 = vmul.f32 2.0, %v152_v43  ;;  %v343_v56 = vmin.f32 %v342_v39, %v1162_v38  ;;  %340 = vmin.xlane.f32.xlu0 %v339_v48  ;;  %v314_v63 = vmul.f32 2.0, %v241_v47 }
  0xe0   :  { %v154_v59 = vpop.f32.mrf.mxu0  ;;  %v243_v60 = vpop.f32.mrf.mxu1  ;;  %v1172_v1 = vsub.f32 %v295_v37, %v311_v42 }
  0xe1   :  { %v347_v62 = vmin.f32 %v324_v50, %v325_v51  ;;  %v313_v52 = vmul.f32 2.0, %v154_v59  ;;  %v344_v53 = vmin.f32 %v343_v56, %v1168_v57  ;;  %v328_v4 = vsub.f32 %v296_v44, %v312_v54 }
  0xe2   :  { %v315_v6 = vmul.f32 2.0, %v243_v60  ;;  %v1176_v55 = vsub.f32 %v298_v58, %v314_v63  ;;  %v632_v60 = vld [vmem:[%s1545_s2 + $0xf8] sm:$0xff] }
  0xe3   :  { %v329_v5 = vsub.f32 %v297_v49, %v313_v52  ;;  %v348_v7 = vmin.f32 %v347_v62, %v1170_v61  ;;  %345 = vmin.xlane.f32.xlu1 %v344_v53  ;;  %v616_v62 = vld [vmem:[%s1545_s2 + $0x78] sm:$0xff]  ;;  %887 = vmatprep.subr.mxu0 %v632_v60  ;;  %v631_v52 = vld [vmem:[%s1545_s2 + $0xf0] sm:$0xff] }
  0xe4   :  { %v1179_v12 = vsub.f32 %v299_v2, %v315_v6  ;;  %v648_v63 = vld [vmem:[%s1545_s2 + $0x178] sm:$0xff]  ;;  %888 = vmatpush3.msra.mxu0 %v616_v62  ;;  %v615_v2 = vld [vmem:[%s1545_s2 + $0x70] sm:$0xff]  ;;  %v614_v6 = vld [vmem:[%s1545_s2 + $0x68] sm:$0xff] }
  0xe5   :  { %v352_v8 = vmin.f32 %v328_v4, %v329_v5  ;;  %v349_v11 = vmin.f32 %v348_v7, %v1172_v1  ;;  %v647_v53 = vld [vmem:[%s1545_s2 + $0x170] sm:$0xff]  ;;  %889 = vmatprep.subr.mxu0 %v631_v52  ;;  %v646_v7 = vld [vmem:[%s1545_s2 + $0x168] sm:$0xff]  ;;  %v604_v60 = vld [vmem:[%s1545_s2 + $0x18] sm:$0xff] }
  0xe6   :  { %890 = vmatpush3.msra.mxu0 %v615_v2 }
  0xe7   :  { %350 = vmin.xlane.f32.xlu0 %v349_v11  ;;  %v353_v13 = vmin.f32 %v352_v8, %v1176_v55  ;;  %v661_v8 = vld [vmem:[%s1545_s2 + $0x1e0] sm:$0xff] }
  0xe8   :  { %v613_v11 = vld [vmem:[%s1545_s2 + $0x60] sm:$0xff] }
  0xe9   :  { %v354_v0 = vmin.f32 %v353_v13, %v1179_v12  ;;  %v628_v13 = vld [vmem:[%s1545_s2 + $0xd8] sm:$0xff] }
  0xeb   :  { %355 = vmin.xlane.f32.xlu1 %v354_v0  ;;  %v660_v0 = vld [vmem:[%s1545_s2 + $0x1d8] sm:$0xff] }
 0x168   :  { %v341_v16 = vpop.xlane.xlu0 %340 }
 0x169   :  { %vm357_vm1 = vcmp.le.f32.partialorder %v1147_v9, %v341_v16  ;;  %vm358_vm2 = vcmp.le.f32.partialorder %v1149_v10, %v341_v16  ;;  %vm359_vm3 = vcmp.le.f32.partialorder %v1151_v18, %v341_v16  ;;  %vm360_vm5 = vcmp.le.f32.partialorder %v1160_v32, %v341_v16  ;;  %v612_v16 = vld [vmem:[%s1545_s2 + $0x58] sm:$0xff] }
 0x16a   :  { %v373_v19 = vsel %vm357_vm1, %v1184_v14, 512  ;;  %v374_v20 = vsel %vm358_vm2, %v1187_v15, 512  ;;  %v375_v23 = vsel %vm359_vm3, %v1190_v17, 512  ;;  %v376_v24 = vsel %vm360_vm5, %v1198_v45, 512 }
 0x16b   :  { %vm389_vm4 = vcmp.lt.s32.totalorder %v373_v19, %v374_v20 }
 0x16c   :  { %v346_v21 = vpop.xlane.xlu1 %345  ;;  %v390_v22 = vsel %vm389_vm4, %v373_v19, %v374_v20  ;;  %v644_v19 = vld [vmem:[%s1545_s2 + $0x158] sm:$0xff]  ;;  %v627_v20 = vld [vmem:[%s1545_s2 + $0xd0] sm:$0xff] }
 0x16d   :  { %vm361_vm6 = vcmp.le.f32.partialorder %v1155_v27, %v346_v21  ;;  %vm362_vm7 = vcmp.le.f32.partialorder %v1157_v28, %v346_v21  ;;  %vm363_vm8 = vcmp.le.f32.partialorder %v1162_v38, %v346_v21  ;;  %vm391_vm9 = vcmp.lt.s32.totalorder %v390_v22, %v375_v23 }
 0x16e   :  { %v377_v9 = vsel %vm361_vm6, %v1184_v14, 512  ;;  %v378_v10 = vsel %vm362_vm7, %v1187_v15, 512  ;;  %v392_v25 = vsel %vm391_vm9, %v390_v22, %v375_v23  ;;  %vm364_vm11 = vcmp.le.f32.partialorder %v1168_v57, %v346_v21  ;;  %v659_v21 = vld [vmem:[%s1545_s2 + $0x1d0] sm:$0xff] }
 0x16f   :  { %vm409_vm10 = vcmp.lt.s32.totalorder %v377_v9, %v378_v10  ;;  %v379_v26 = vsel %vm363_vm8, %v1190_v17, 512  ;;  %vm393_vm15 = vcmp.lt.s32.totalorder %v392_v25, %v376_v24  ;;  %v380_v33 = vsel %vm364_vm11, %v1198_v45, 512  ;;  %v611_v22 = vld [vmem:[%s1545_s2 + $0x50] sm:$0xff] }
 0x170   :  { %v351_v18 = vpop.xlane.xlu0 %350  ;;  %v1214_v29 = vsel %vm393_vm15, %v392_v25, %v376_v24  ;;  %v410_v30 = vsel %vm409_vm10, %v377_v9, %v378_v10  ;;  %v643_v23 = vld [vmem:[%s1545_s2 + $0x150] sm:$0xff]  ;;  %v626_v9 = vld [vmem:[%s1545_s2 + $0xc8] sm:$0xff]  ;;  %v625_v25 = vld [vmem:[%s1545_s2 + $0xc0] sm:$0xff] }
 0x171   :  { %vm365_vm12 = vcmp.le.f32.partialorder %v324_v50, %v351_v18  ;;  %vm366_vm13 = vcmp.le.f32.partialorder %v325_v51, %v351_v18  ;;  %vm367_vm14 = vcmp.le.f32.partialorder %v1170_v61, %v351_v18  ;;  %vm368_vm1 = vcmp.le.f32.partialorder %v1172_v1, %v351_v18  ;;  %v664_v61 = vld [vmem:[%s1545_s2 + $0x1f8] sm:$0xff]  ;;  %v663_v1 = vld [vmem:[%s1545_s2 + $0x1f0] sm:$0xff]  ;;  %v658_v10 = vld [vmem:[%s1545_s2 + $0x1c8] sm:$0xff] }
 0x172   :  { %v381_v27 = vsel %vm365_vm12, %v1184_v14, 512  ;;  %v382_v28 = vsel %vm366_vm13, %v1187_v15, 512  ;;  %v396_v32 = vshra.s32 %v1214_v29, 16  ;;  %vm411_vm3 = vcmp.lt.s32.totalorder %v410_v30, %v379_v26  ;;  %931 = vmatprep.subr.mxu1 %v664_v61  ;;  %v610_v18 = vld [vmem:[%s1545_s2 + $0x48] sm:$0xff]  ;;  %v636_v61 = vld [vmem:[%s1545_s2 + $0x118] sm:$0xff] }
 0x173   :  { %vm429_vm2 = vcmp.lt.s32.totalorder %v381_v27, %v382_v28  ;;  %v383_v35 = vsel %vm367_vm14, %v1190_v17, 512  ;;  %v384_v39 = vsel %vm368_vm1, %v1198_v45, 512  ;;  %v412_v40 = vsel %vm411_vm3, %v410_v30, %v379_v26  ;;  %932 = vmatpush3.msra.mxu1 %v648_v63  ;;  %v642_v24 = vld [vmem:[%s1545_s2 + $0x148] sm:$0xff]  ;;  %v657_v26 = vld [vmem:[%s1545_s2 + $0x1c0] sm:$0xff]  ;;  %v624_v30 = vld [vmem:[%s1545_s2 + $0xb8] sm:$0xff] }
 0x174   :  { %v356_v31 = vpop.xlane.xlu1 %355  ;;  %v430_v34 = vsel %vm429_vm2, %v381_v27, %v382_v28  ;;  %v1222_v38 = vcvt.s32.f32 %v396_v32  ;;  %vm413_vm10 = vcmp.lt.s32.totalorder %v412_v40, %v380_v33  ;;  %933 = vmatprep.subr.mxu1 %v663_v1  ;;  %v609_v27 = vld [vmem:[%s1545_s2 + $0x40] sm:$0xff]  ;;  %v608_v32 = vld [vmem:[%s1545_s2 + $0x38] sm:$0xff]  ;;  %v395_v62 = vand.u32 65535, %v1214_v29 }
 0x175   :  { %vm369_vm4 = vcmp.le.f32.partialorder %v328_v4, %v356_v31  ;;  %vm370_vm5 = vcmp.le.f32.partialorder %v329_v5, %v356_v31  ;;  %vm371_vm6 = vcmp.le.f32.partialorder %v1176_v55, %v356_v31  ;;  %vm372_vm7 = vcmp.le.f32.partialorder %v1179_v12, %v356_v31  ;;  %v630_v4 = vld [vmem:[%s1545_s2 + $0xe8] sm:$0xff]  ;;  %934 = vmatpush3.msra.mxu1 %v647_v53  ;;  %v629_v55 = vld [vmem:[%s1545_s2 + $0xe0] sm:$0xff]  ;;  %v656_v31 = vld [vmem:[%s1545_s2 + $0x1b8] sm:$0xff] }
 0x176   :  { %v385_v36 = vsel %vm369_vm4, %v1184_v14, 512  ;;  %v386_v37 = vsel %vm370_vm5, %v1187_v15, 512  ;;  %vm431_vm9 = vcmp.lt.s32.totalorder %v430_v34, %v383_v35  ;;  %v387_v41 = vsel %vm371_vm6, %v1190_v17, 512  ;;  %399 = vmin.xlane.f32.xlu0 %v1222_v38  ;;  %v662_v5 = vld [vmem:[%s1545_s2 + $0x1e8] sm:$0xff]  ;;  %891 = vmatprep.subr.mxu0 %v630_v4  ;;  %v645_v12 = vld [vmem:[%s1545_s2 + $0x160] sm:$0xff] }
 0x177   :  { %vm449_vm8 = vcmp.lt.s32.totalorder %v385_v36, %v386_v37  ;;  %v432_v42 = vsel %vm431_vm9, %v430_v34, %v383_v35  ;;  %v1230_v44 = vsel %vm413_vm10, %v412_v40, %v380_v33  ;;  %v388_v49 = vsel %vm372_vm7, %v1198_v45, 512  ;;  %935 = vmatprep.subr.mxu1 %v662_v5  ;;  %892 = vmatpush3.msra.mxu0 %v614_v6  ;;  %v641_v28 = vld [vmem:[%s1545_s2 + $0x140] sm:$0xff]  ;;  %v640_v33 = vld [vmem:[%s1545_s2 + $0x138] sm:$0xff]  ;;  %v623_v34 = vld [vmem:[%s1545_s2 + $0xb0] sm:$0xff] }
 0x178   :  { %v450_v43 = vsel %vm449_vm8, %v385_v36, %v386_v37  ;;  %vm433_vm11 = vcmp.lt.s32.totalorder %v432_v42, %v384_v39  ;;  %v416_v47 = vshra.s32 %v1230_v44, 16  ;;  %936 = vmatpush3.msra.mxu1 %v646_v7  ;;  %893 = vmatprep.subr.mxu0 %v629_v55  ;;  %v655_v35 = vld [vmem:[%s1545_s2 + $0x1b0] sm:$0xff]  ;;  %v654_v40 = vld [vmem:[%s1545_s2 + $0x1a8] sm:$0xff]  ;;  %v397_v52 = vcvt.s32.f32 %v395_v62 }
 0x179   :  { %vm451_vm12 = vcmp.lt.s32.totalorder %v450_v43, %v387_v41  ;;  %v1233_v48 = vsel %vm433_vm11, %v432_v42, %v384_v39  ;;  %937 = vmatprep.subr.mxu1 %v661_v8  ;;  %894 = vmatpush3.msra.mxu0 %v613_v11  ;;  %v607_v36 = vld [vmem:[%s1545_s2 + $0x30] sm:$0xff]  ;;  %v622_v39 = vld [vmem:[%s1545_s2 + $0xa8] sm:$0xff]  ;;  %v415_v2 = vand.u32 65535, %v1230_v44 }
 0x17a   :  { %v452_v50 = vsel %vm451_vm12, %v450_v43, %v387_v41  ;;  %v436_v51 = vshra.s32 %v1233_v48, 16  ;;  %v1237_v54 = vcvt.s32.f32 %v416_v47  ;;  %938 = vmatpush3.msra.mxu1 %v645_v12  ;;  %895 = vmatprep.subr.mxu0 %v628_v13  ;;  %v639_v37 = vld [vmem:[%s1545_s2 + $0x130] sm:$0xff]  ;;  %v606_v41 = vld [vmem:[%s1545_s2 + $0x28] sm:$0xff]  ;;  %v621_v43 = vld [vmem:[%s1545_s2 + $0xa0] sm:$0xff]  ;;  %v435_v53 = vand.u32 65535, %v1233_v48 }
 0x17b   :  { %vm453_vm13 = vcmp.lt.s32.totalorder %v452_v50, %v388_v49  ;;  %939 = vmatprep.subr.mxu1 %v660_v0  ;;  %896 = vmatpush3.msra.mxu0 %v612_v16  ;;  %v638_v42 = vld [vmem:[%s1545_s2 + $0x128] sm:$0xff]  ;;  %v653_v47 = vld [vmem:[%s1545_s2 + $0x1a0] sm:$0xff]  ;;  %v417_v5 = vcvt.s32.f32 %v415_v2  ;;  %v619_v48 = vld [vmem:[%s1545_s2 + $0x90] sm:$0xff] }
 0x17c   :  { %v1239_v56 = vsel %vm453_vm13, %v452_v50, %v388_v49  ;;  %v1241_v57 = vcvt.s32.f32 %v436_v51  ;;  %419 = vmin.xlane.f32.xlu1 %v1237_v54  ;;  %940 = vmatpush3.msra.mxu1 %v644_v19  ;;  %v605_v49 = vld [vmem:[%s1545_s2 + $0x20] sm:$0xff]  ;;  %v620_v51 = vld [vmem:[%s1545_s2 + $0x98] sm:$0xff]  ;;  %v437_v55 = vcvt.s32.f32 %v435_v53  ;;  %v650_v12 = vld [vmem:[%s1545_s2 + $0x188] sm:$0xff] }
 0x17d   :  { %v456_v58 = vshra.s32 %v1239_v56, 16  ;;  %897 = vmatprep.subr.mxu0 %v627_v20  ;;  %941 = vmatprep.subr.mxu1 %v659_v21  ;;  %v637_v50 = vld [vmem:[%s1545_s2 + $0x120] sm:$0xff]  ;;  %v455_v6 = vand.u32 65535, %v1239_v56  ;;  %v603_v56 = vld [vmem:[%s1545_s2 + $0x10] sm:$0xff]  ;;  %v602_v13 = vld [vmem:[%s1545_s2 + $0x8] sm:$0xff] }
 0x17e   :  { %439 = vmin.xlane.f32.xlu0 %v1241_v57  ;;  %898 = vmatpush3.msra.mxu0 %v611_v22  ;;  %v634_v0 = vld [vmem:[%s1545_s2 + $0x108] sm:$0xff]  ;;  %v617_v16 = vld [vmem:[%s1545_s2 + $0x80] sm:$0xff] }
 0x17f   :  { %v1246_v59 = vcvt.s32.f32 %v456_v58  ;;  %942 = vmatpush3.msra.mxu1 %v643_v23  ;;  %899 = vmatprep.subr.mxu0 %v626_v9  ;;  %v652_v58 = vld [vmem:[%s1545_s2 + $0x198] sm:$0xff]  ;;  %v457_v11 = vcvt.s32.f32 %v455_v6  ;;  %v649_v19 = vld [vmem:[%s1545_s2 + $0x180] sm:$0xff] }
 0x180   :  { %943 = vmatprep.subr.mxu1 %v658_v10  ;;  %900 = vmatpush3.msra.mxu0 %v610_v18  ;;  %v601_v20 = vld [vmem:[%s1545_s2] sm:$0xff] }
 0x181   :  { %459 = vmin.xlane.f32.xlu1 %v1246_v59  ;;  %944 = vmatpush3.msra.mxu1 %v642_v24  ;;  %v633_v21 = vld [vmem:[%s1545_s2 + $0x100] sm:$0xff] }
 0x182   :  { %901 = vmatprep.subr.mxu0 %v625_v25  ;;  %945 = vmatprep.subr.mxu1 %v657_v26 }
 0x183   :  { %902 = vmatpush3.msra.mxu0 %v609_v27  ;;  %946 = vmatpush3.msra.mxu1 %v641_v28  ;;  %v978_v28 = vmov 1.0  }
 0x184   :  { %903 = vmatprep.subr.mxu0 %v624_v30  ;;  %947 = vmatprep.subr.mxu1 %v656_v31 }
 0x185   :  { %904 = vmatpush3.msra.mxu0 %v608_v32  ;;  %948 = vmatpush3.msra.mxu1 %v640_v33 }
 0x186   :  { %905 = vmatprep.subr.mxu0 %v623_v34  ;;  %949 = vmatprep.subr.mxu1 %v655_v35 }
 0x187   :  { %906 = vmatpush3.msra.mxu0 %v607_v36  ;;  %950 = vmatpush3.msra.mxu1 %v639_v37 }
 0x188   :  { %907 = vmatprep.subr.mxu0 %v622_v39  ;;  %951 = vmatprep.subr.mxu1 %v654_v40 }
 0x189   :  { %908 = vmatpush3.msra.mxu0 %v606_v41  ;;  %952 = vmatpush3.msra.mxu1 %v638_v42 }
 0x18a   :  { %909 = vmatprep.subr.mxu0 %v621_v43  ;;  %953 = vmatprep.subr.mxu1 %v653_v47 }
 0x18b   :  { %910 = vmatpush3.msra.mxu0 %v605_v49  ;;  %954 = vmatpush3.msra.mxu1 %v637_v50 }
 0x18c   :  { %911 = vmatprep.subr.mxu0 %v620_v51  ;;  %955 = vmatprep.subr.mxu1 %v652_v58 }
 0x18d   :  { %912 = vmatpush3.msra.mxu0 %v604_v60  ;;  %956 = vmatpush3.msra.mxu1 %v636_v61 }
 0x18e   :  { %913 = vmatprep.subr.mxu0 %v619_v48 }
 0x18f   :  { %914 = vmatpush3.msra.mxu0 %v603_v56 }
 0x1ff   :  { %v400_v63 = vpop.xlane.xlu0 %399 }
 0x200   :  { %vm401_vm14 = vcmp.eq.f32.partialorder %v1222_v38, %v400_v63  ;;  %v406_v22 = vcvt.f32.s32 %v400_v63 }
 0x201   :  { %v402_v1 = vsel %vm401_vm14, %v397_v52, inf }
 0x202   :  { %403 = vmin.xlane.f32.xlu0 %v402_v1  ;;  %v407_v9 = vshll.u32 %v406_v22, 16 }
 0x205   :  { %v420_v4 = vpop.xlane.xlu1 %419 }
 0x206   :  { %vm421_vm15 = vcmp.eq.f32.partialorder %v1237_v54, %v420_v4  ;;  %v651_v54 = vld [vmem:[%s1545_s2 + $0x190] sm:$0xff]  ;;  %v426_v18 = vcvt.f32.s32 %v420_v4 }
 0x207   :  { %v440_v7 = vpop.xlane.xlu0 %439  ;;  %v422_v8 = vsel %vm421_vm15, %v417_v5, inf  ;;  %957 = vmatprep.subr.mxu1 %v651_v54 }
 0x208   :  { %vm441_vm1 = vcmp.eq.f32.partialorder %v1241_v57, %v440_v7  ;;  %423 = vmin.xlane.f32.xlu1 %v422_v8  ;;  %v635_v57 = vld [vmem:[%s1545_s2 + $0x110] sm:$0xff]  ;;  %v446_v25 = vcvt.f32.s32 %v440_v7  ;;  %v427_v30 = vshll.u32 %v426_v18, 16 }
 0x209   :  { %v442_v29 = vsel %vm441_vm1, %v437_v55, inf  ;;  %958 = vmatpush3.msra.mxu1 %v635_v57 }
 0x20a   :  { %443 = vmin.xlane.f32.xlu0 %v442_v29  ;;  %v460_v38 = vpop.xlane.xlu1 %459  ;;  %959 = vmatprep.subr.mxu1 %v650_v12  ;;  %v447_v33 = vshll.u32 %v446_v25, 16 }
 0x20b   :  { %vm461_vm2 = vcmp.eq.f32.partialorder %v1246_v59, %v460_v38  ;;  %v618_v59 = vld [vmem:[%s1545_s2 + $0x88] sm:$0xff]  ;;  %960 = vmatpush3.msra.mxu1 %v634_v0  ;;  %v466_v26 = vcvt.f32.s32 %v460_v38 }
 0x20c   :  { %v462_v44 = vsel %vm461_vm2, %v457_v11, inf  ;;  %915 = vmatprep.subr.mxu0 %v618_v59  ;;  %961 = vmatprep.subr.mxu1 %v649_v19 }
 0x20d   :  { %463 = vmin.xlane.f32.xlu1 %v462_v44  ;;  %916 = vmatpush3.msra.mxu0 %v602_v13  ;;  %v467_v35 = vshll.u32 %v466_v26, 16 }
 0x20e   :  { %917 = vmatprep.subr.mxu0 %v617_v16  ;;  %962 = vmatpush3.msra.mxu1 %v633_v21 }
 0x20f   :  { %918 = vmatpush3.msra.mxu0 %v601_v20 }
 0x28b   :  { %v404_v23 = vpop.xlane.xlu0 %403 }
 0x28c   :  { %v405_v10 = vcvt.f32.s32 %v404_v23 }
 0x28e   :  { %v408_v24 = vadd.s32 %v407_v9, %v405_v10 }
 0x290   :  { %vm470_vm3 = vcmp.eq.s32.totalorder %v1187_v15, %v408_v24  ;;  %vm472_vm4 = vcmp.eq.s32.totalorder %v1198_v45, %v408_v24  ;;  %vm469_vm5 = vcmp.eq.s32.totalorder %v1184_v14, %v408_v24  ;;  %vm471_vm6 = vcmp.eq.s32.totalorder %v1190_v17, %v408_v24 }
 0x291   :  { %v424_v27 = vpop.xlane.xlu1 %423  ;;  %871 = vmatprep.mubr.msk.f32.mxu0 %vm470_vm3, %v978_v28  ;;  %879 = vmatprep.mubr.msk.f32.mxu1 %vm472_vm4, %v978_v28  ;;  %v856_v37 = vsel %vm470_vm3, 1.0, %v977_v3  ;;  %v858_v39 = vsel %vm472_vm4, 1.0, %v977_v3  ;;  %v855_v41 = vsel %vm469_vm5, 1.0, %v977_v3  ;;  %v857_v42 = vsel %vm471_vm6, 1.0, %v977_v3 }
 0x292   :  { %v425_v31 = vcvt.f32.s32 %v424_v27  ;;  %872 = vmatmul.mubr.msk.f32.vlgmr.msra.gmra.mxu0 %vm469_vm5, %v978_v28  ;;  %880 = vmatmul.mubr.msk.f32.vlgmr.msra.gmra.mxu1 %vm471_vm6, %v978_v28  ;;  %vm592_vm4 = vcmp.eq.s32.totalorder %v1138_v46, 0 }
 0x293   :  { %v444_v32 = vpop.xlane.xlu0 %443 }
 0x294   :  { %v445_v34 = vcvt.f32.s32 %v444_v32  ;;  %v428_v36 = vadd.s32 %v427_v30, %v425_v31 }
 0x296   :  { %v448_v40 = vadd.s32 %v447_v33, %v445_v34  ;;  %vm474_vm7 = vcmp.eq.s32.totalorder %v1187_v15, %v428_v36  ;;  %vm476_vm8 = vcmp.eq.s32.totalorder %v1198_v45, %v428_v36  ;;  %vm473_vm9 = vcmp.eq.s32.totalorder %v1184_v14, %v428_v36  ;;  %v464_v43 = vpop.xlane.xlu1 %463 }
 0x297   :  { %vm475_vm10 = vcmp.eq.s32.totalorder %v1190_v17, %v428_v36  ;;  %v860_v47 = vsel %vm474_vm7, 1.0, %v977_v3  ;;  %873 = vmatprep.mubr.msk.f32.mxu0 %vm474_vm7, %v978_v28  ;;  %v862_v49 = vsel %vm476_vm8, 1.0, %v977_v3  ;;  %881 = vmatprep.mubr.msk.f32.mxu1 %vm476_vm8, %v978_v28  ;;  %v859_v50 = vsel %vm473_vm9, 1.0, %v977_v3 }
 0x298   :  { %v861_v51 = vsel %vm475_vm10, 1.0, %v977_v3  ;;  %v565_v58 = vadd.f32 %v860_v47, %v856_v37  ;;  %v583_v60 = vadd.f32 %v862_v49, %v858_v39  ;;  %v556_v61 = vadd.f32 %v859_v50, %v855_v41  ;;  %874 = vmatmul.mubr.msk.f32.gmra.mxu0 %vm473_vm9, %v978_v28  ;;  %882 = vmatmul.mubr.msk.f32.gmra.mxu1 %vm475_vm10, %v978_v28 }
 0x299   :  { %v574_v62 = vadd.f32 %v861_v51, %v857_v42  ;;  %v465_v63 = vcvt.f32.s32 %v464_v43  ;;  %vm478_vm11 = vcmp.eq.s32.totalorder %v1187_v15, %v448_v40  ;;  %vm480_vm12 = vcmp.eq.s32.totalorder %v1198_v45, %v448_v40 }
 0x29a   :  { %vm477_vm13 = vcmp.eq.s32.totalorder %v1184_v14, %v448_v40  ;;  %v864_v52 = vsel %vm478_vm11, 1.0, %v977_v3  ;;  %875 = vmatprep.mubr.msk.f32.mxu0 %vm478_vm11, %v978_v28  ;;  %v866_v1 = vsel %vm480_vm12, 1.0, %v977_v3  ;;  %883 = vmatprep.mubr.msk.f32.mxu1 %vm480_vm12, %v978_v28  ;;  %vm479_vm14 = vcmp.eq.s32.totalorder %v1190_v17, %v448_v40 }
 0x29b   :  { %v863_v2 = vsel %vm477_vm13, 1.0, %v977_v3  ;;  %v468_v53 = vadd.s32 %v467_v35, %v465_v63  ;;  %v566_v4 = vadd.f32 %v864_v52, %v565_v58  ;;  %v584_v5 = vadd.f32 %v866_v1, %v583_v60 }
 0x29c   :  { %v557_v6 = vadd.f32 %v863_v2, %v556_v61  ;;  %876 = vmatmul.mubr.msk.f32.gmra.mxu0 %vm477_vm13, %v978_v28  ;;  %v865_v7 = vsel %vm479_vm14, 1.0, %v977_v3  ;;  %884 = vmatmul.mubr.msk.f32.gmra.mxu1 %vm479_vm14, %v978_v28 }
 0x29d   :  { %v575_v55 = vadd.f32 %v865_v7, %v574_v62  ;;  %vm482_vm15 = vcmp.eq.s32.totalorder %v1187_v15, %v468_v53  ;;  %vm484_vm1 = vcmp.eq.s32.totalorder %v1198_v45, %v468_v53  ;;  %vm481_vm2 = vcmp.eq.s32.totalorder %v1184_v14, %v468_v53 }
 0x29e   :  { %v868_v8 = vsel %vm482_vm15, 1.0, %v977_v3  ;;  %877 = vmatprep.mubr.msk.f32.mxu0 %vm482_vm15, %v978_v28  ;;  %v870_v29 = vsel %vm484_vm1, 1.0, %v977_v3  ;;  %885 = vmatprep.mubr.msk.f32.mxu1 %vm484_vm1, %v978_v28  ;;  %v867_v38 = vsel %vm481_vm2, 1.0, %v977_v3  ;;  %vm483_vm3 = vcmp.eq.s32.totalorder %v1190_v17, %v468_v53 }
 0x29f   :  { %v567_v11 = vadd.f32 %v868_v8, %v566_v4  ;;  %v585_v44 = vadd.f32 %v870_v29, %v584_v5  ;;  %v558_v48 = vadd.f32 %v867_v38, %v557_v6  ;;  %v869_v15 = vsel %vm483_vm3, 1.0, %v977_v3 }
 0x2a0   :  { %878 = vmatmul.mubr.msk.f32.gmra.mxu0 %vm481_vm2, %v978_v28  ;;  %v576_v14 = vadd.f32 %v869_v15, %v575_v55  ;;  %886 = vmatmul.mubr.msk.f32.gmra.mxu1 %vm483_vm3, %v978_v28 }
 0x2a1   :  { %v568_v45 = vrot.slane %v567_v11, 4  ;;  %v586_v54 = vrot.slane %v585_v44, 4  ;;  %v559_v56 = vrot.slane %v558_v48, 4 }
 0x2a2   :  { %v577_v57 = vrot.slane %v576_v14, 4 }
 0x2a3   :  { %v569_v59 = vadd.f32 %v568_v45, %v567_v11  ;;  %v587_v12 = vadd.f32 %v586_v54, %v585_v44  ;;  %v560_v13 = vadd.f32 %v559_v56, %v558_v48 }
 0x2a4   :  { %v578_v0 = vadd.f32 %v577_v57, %v576_v14 }
 0x2a5   :  { %v570_v16 = vrot.slane %v569_v59, 2  ;;  %v588_v17 = vrot.slane %v587_v12, 2  ;;  %v561_v19 = vrot.slane %v560_v13, 2 }
 0x2a6   :  { %v579_v20 = vrot.slane %v578_v0, 2 }
 0x2a7   :  { %v571_v21 = vadd.f32 %v570_v16, %v569_v59  ;;  %v589_v22 = vadd.f32 %v588_v17, %v587_v12  ;;  %v562_v3 = vadd.f32 %v561_v19, %v560_v13 }
 0x2a8   :  { %v580_v23 = vadd.f32 %v579_v20, %v578_v0 }
 0x2a9   :  { %v572_v9 = vrot.slane %v571_v21, 1  ;;  %v590_v10 = vrot.slane %v589_v22, 1  ;;  %v563_v18 = vrot.slane %v562_v3, 1 }
 0x2aa   :  { %v581_v24 = vrot.slane %v580_v23, 1 }
 0x2ab   :  { %v573_v25 = vadd.f32 %v572_v9, %v571_v21  ;;  %v591_v26 = vadd.f32 %v590_v10, %v589_v22  ;;  %v564_v27 = vadd.f32 %v563_v18, %v562_v3 }
 0x2ac   :  { %v582_v28 = vadd.f32 %v581_v24, %v580_v23 }
 0x2ad   :  { %v594_v30 = vsel %vm592_vm4, %v573_v25, 0.0  ;;  %v596_v31 = vsel %vm592_vm4, %v591_v26, 0.0  ;;  %v593_v32 = vsel %vm592_vm4, %v564_v27, 0.0 }
 0x2ae   :  { %598 = vst [vmem:[%s1546_s5 + $0x8] sm:$0xff] %v594_v30  ;;  %600 = vst [vmem:[%s1546_s5 + $0x18] sm:$0xff] %v596_v31  ;;  %v595_v46 = vsel %vm592_vm4, %v582_v28, 0.0 }
 0x2af   :  { %597 = vst [vmem:[%s1546_s5] sm:$0xff] %v593_v32  ;;  %599 = vst [vmem:[%s1546_s5 + $0x10] sm:$0xff] %v595_v46 }
 0x352   :  { %v919_v33 = vpop.f32.mrf.mxu0  ;;  %v963_v34 = vpop.f32.mrf.mxu1 }
 0x354   :  { %v920_v35 = vpop.f32.mrf.mxu0  ;;  %v964_v36 = vpop.f32.mrf.mxu1 }
 0x355   :  { %v921_v37 = vadd.f32 %v920_v35, %v919_v33  ;;  %v965_v39 = vadd.f32 %v964_v36, %v963_v34 }
 0x357   :  { %v817_v40 = vadd.f32 %v965_v39, %v921_v37 }
 0x358   :  { %v922_v41 = vpop.f32.mrf.mxu0  ;;  %v966_v42 = vpop.f32.mrf.mxu1 }
 0x359   :  { %835 = vst.msk [vmem:[%s1547_s4] sm:$0xff] %vm55_vm0, %v817_v40 }
 0x35a   :  { %v923_v43 = vpop.f32.mrf.mxu0  ;;  %v967_v49 = vpop.f32.mrf.mxu1 }
 0x35b   :  { %v924_v47 = vadd.f32 %v923_v43, %v922_v41  ;;  %v968_v50 = vadd.f32 %v967_v49, %v966_v42 }
 0x35c   :  { %v925_v51 = vpop.f32.mrf.mxu0  ;;  %v969_v58 = vpop.f32.mrf.mxu1 }
 0x35d   :  { %v822_v60 = vadd.f32 %v968_v50, %v924_v47 }
 0x35e   :  { %v926_v61 = vpop.f32.mrf.mxu0  ;;  %v970_v63 = vpop.f32.mrf.mxu1 }
 0x35f   :  { %v927_v62 = vadd.f32 %v926_v61, %v925_v51  ;;  %836 = vst.msk [vmem:[%s1547_s4 + $0x8] sm:$0xff] %vm55_vm0, %v822_v60  ;;  %v971_v52 = vadd.f32 %v970_v63, %v969_v58 }
 0x360   :  { %v928_v1 = vpop.f32.mrf.mxu0  ;;  %v972_v2 = vpop.f32.mrf.mxu1 }
 0x361   :  { %v827_v53 = vadd.f32 %v971_v52, %v927_v62 }
 0x362   :  { %v929_v4 = vpop.f32.mrf.mxu0  ;;  %v973_v6 = vpop.f32.mrf.mxu1 }
 0x363   :  { %v930_v5 = vadd.f32 %v929_v4, %v928_v1  ;;  %837 = vst.msk [vmem:[%s1547_s4 + $0x10] sm:$0xff] %vm55_vm0, %v827_v53  ;;  %v974_v7 = vadd.f32 %v973_v6, %v972_v2 }
 0x365   :  { %v832_v55 = vadd.f32 %v974_v7, %v930_v5 }
 0x367   :  { %838 = vst.msk [vmem:[%s1547_s4 + $0x18] sm:$0xff] %vm55_vm0, %v832_v55 }

// kernel: vqvae_forward.11
= control target key start
LH: loop header
LB: loop body
LE: loop exit
PB: predicated region body
PF: predicated region fallthrough
CT: control target
= control target key end

     0   :  { %s1043_s12 = smov 0   ;;  %s1045_s13 = smov 0   ;;  %s1127_s0 = inlined_call_operand.vmem [shape: bf16[4,32,256], index: 0, kind: input, shape index: {}]   ;;  %s1128_s1 = inlined_call_operand.vmem [shape: bf16[4,256,256], index: 1, kind: input, shape index: {}]   ;;  %s1129_s2 = inlined_call_operand.vmem [shape: f32[1,256], index: 2, kind: input, shape index: {}]   ;;  %s1130_s3 = inlined_call_operand.vmem [shape: f32[4,32,256], index: 3, kind: output, shape index: {}]  }
   0x1   :  { %s1047_s14 = smov 0  }
   0x2 LB: > { %s39_s15 = sadd.s32 1, %s1017_s13  ;;  %p841_p0 = scmp.ge.s32.totalorder %s1021_s14, 1  ;;  %s1021_s14 = sphi %s1047_s14, %s13_s14   ;;  %s1017_s13 = sphi %s1045_s13, %s1132_s13   ;;  %s1013_s12 = sphi %s1043_s12, %s1131_s12  }
   0x3   : > { %p41_p1 = scmp.ge.s32.totalorder %s39_s15, 4  ;;  %p217_p2 = scmp.lt.s32.totalorder %s1021_s14, 5 }
   0x5   : > { %s1134_s15 = smov (%p41_p1, %s39_s15), 0  ;;  %p218_p3 = pnand %p841_p0, %p217_p2 }
   0x6   : > { %p279_p4 = scmp.lt.s32.totalorder (!%p218_p3), %s1013_s12, 3 }
   0x7   : > { %221 = sbr.rel (%p218_p3) target bundleno = 284 (0x11c), region = 32 }
   0xc   : > { %s1136_s12 = smov (!%p279_p4, %s1013_s12), 3  ;;  %v648_v36 = vlaneseq  ;;  %v646_v39 = vld [vmem:[%s1129_s2] sm:$0x3] }
   0xd   : > { %s887_s16 = sshll.u32 %s1136_s12, 8  ;;  %s886_s20 = sshll.u32 %s1136_s12, 5 }
   0xe   : > { %s1067_s19 = scalar_lea.vmem %s1128_s1, %s887_s16  ;;  %s1085_s23 = scalar_lea.vmem %s1127_s0, %s886_s20  ;;  %v649_v37 = vshrl.u32 %v648_v36, 7 }
   0xf   : > { %v945_v0 = vld [vmem:[%s1067_s19 + $0x74] ss:$8 sps:$4 sm:$0xff]   ;;  %v947_v1 = vld [vmem:[%s1067_s19 + $0x70] ss:$8 sps:$4 sm:$0xff]   ;;  %v948_v2 = vld [vmem:[%s1067_s19 + $0x64] ss:$8 sps:$4 sm:$0xff]  }
  0x10   : > { %566 = vmatprep.subr.bf16.mxu0 %v945_v0  ;;  %889 = vmatprep.subr.bf16.mxu1 %v945_v0  ;;  %v950_v3 = vld [vmem:[%s1067_s19 + $0x60] ss:$8 sps:$4 sm:$0xff]   ;;  %v951_v4 = vld [vmem:[%s1067_s19 + $0x54] ss:$8 sps:$4 sm:$0xff]   ;;  %v953_v5 = vld [vmem:[%s1067_s19 + $0x50] ss:$8 sps:$4 sm:$0xff]  }
  0x11   : > { %567 = vmatpush1.bf16.msra.mxu0 %v947_v1  ;;  %905 = vmatpush1.bf16.msra.mxu1 %v947_v1  ;;  %v954_v6 = vld [vmem:[%s1067_s19 + $0x44] ss:$8 sps:$4 sm:$0xff]   ;;  %v956_v7 = vld [vmem:[%s1067_s19 + $0x40] ss:$8 sps:$4 sm:$0xff]   ;;  %v957_v8 = vld [vmem:[%s1067_s19 + $0x34] ss:$8 sps:$4 sm:$0xff]  }
  0x12   : > { %568 = vmatprep.subr.bf16.mxu0 %v948_v2  ;;  %890 = vmatprep.subr.bf16.mxu1 %v948_v2  ;;  %v959_v9 = vld [vmem:[%s1067_s19 + $0x30] ss:$8 sps:$4 sm:$0xff]   ;;  %v960_v10 = vld [vmem:[%s1067_s19 + $0x24] ss:$8 sps:$4 sm:$0xff]   ;;  %v962_v11 = vld [vmem:[%s1067_s19 + $0x20] ss:$8 sps:$4 sm:$0xff]  }
  0x13   : > { %v963_v12 = vld [vmem:[%s1067_s19 + $0x14] ss:$8 sps:$4 sm:$0xff]   ;;  %v995_v13 = vld [vmem:[%s1085_s23 + $0x4] ss:$8 sps:$4 sm:$0xff]   ;;  %v965_v14 = vld [vmem:[%s1067_s19 + $0x10] ss:$8 sps:$4 sm:$0xff]  }
  0x14   : > { %v998_v15 = vld [vmem:[%s1085_s23 + $0x14] ss:$8 sps:$4 sm:$0xff]   ;;  %v966_v16 = vld [vmem:[%s1067_s19 + $0x4] ss:$8 sps:$4 sm:$0xff]   ;;  %598 = vmatprep.mubr.bf16.mxu0 %v995_v13  ;;  %v968_v17 = vld [vmem:[%s1067_s19] ss:$8 sps:$4 sm:$0xff]  }
  0x15   : > { %569 = vmatpush1.bf16.msra.mxu0 %v950_v3  ;;  %906 = vmatpush1.bf16.msra.mxu1 %v950_v3  ;;  %v969_v18 = vld [vmem:[%s1067_s19 + $0xf4] ss:$8 sps:$4 sm:$0xff]   ;;  %v971_v19 = vld [vmem:[%s1067_s19 + $0xf0] ss:$8 sps:$4 sm:$0xff]   ;;  %v972_v20 = vld [vmem:[%s1067_s19 + $0xe4] ss:$8 sps:$4 sm:$0xff]  }
  0x16   : > { %570 = vmatprep.subr.bf16.mxu0 %v951_v4  ;;  %891 = vmatprep.subr.bf16.mxu1 %v951_v4  ;;  %v974_v21 = vld [vmem:[%s1067_s19 + $0xe0] ss:$8 sps:$4 sm:$0xff]   ;;  %v975_v22 = vld [vmem:[%s1067_s19 + $0xd4] ss:$8 sps:$4 sm:$0xff]   ;;  %v977_v23 = vld [vmem:[%s1067_s19 + $0xd0] ss:$8 sps:$4 sm:$0xff]  }
  0x17   : > { %608 = vmatprep.mubr.bf16.mxu1 %v998_v15  ;;  %v978_v24 = vld [vmem:[%s1067_s19 + $0xc4] ss:$8 sps:$4 sm:$0xff]   ;;  %v980_v25 = vld [vmem:[%s1067_s19 + $0xc0] ss:$8 sps:$4 sm:$0xff]   ;;  %v981_v26 = vld [vmem:[%s1067_s19 + $0xb4] ss:$8 sps:$4 sm:$0xff]  }
  0x18   : > { %v983_v27 = vld [vmem:[%s1067_s19 + $0xb0] ss:$8 sps:$4 sm:$0xff]   ;;  %v984_v28 = vld [vmem:[%s1067_s19 + $0xa4] ss:$8 sps:$4 sm:$0xff]   ;;  %v986_v29 = vld [vmem:[%s1067_s19 + $0xa0] ss:$8 sps:$4 sm:$0xff]  }
  0x19   : > { %571 = vmatpush1.bf16.msra.mxu0 %v953_v5  ;;  %907 = vmatpush1.bf16.msra.mxu1 %v953_v5  ;;  %v987_v30 = vld [vmem:[%s1067_s19 + $0x94] ss:$8 sps:$4 sm:$0xff]   ;;  %v989_v31 = vld [vmem:[%s1067_s19 + $0x90] ss:$8 sps:$4 sm:$0xff]   ;;  %v990_v32 = vld [vmem:[%s1067_s19 + $0x84] ss:$8 sps:$4 sm:$0xff]  }
  0x1a   : > { %572 = vmatprep.subr.bf16.mxu0 %v954_v6  ;;  %892 = vmatprep.subr.bf16.mxu1 %v954_v6  ;;  %v992_v33 = vld [vmem:[%s1067_s19 + $0x80] ss:$8 sps:$4 sm:$0xff]   ;;  %v996_v35 = vld [vmem:[%s1085_s23 + $0x10] ss:$8 sps:$4 sm:$0xff]   ;;  %v650_v38 = vsub.s32 0, %v649_v37  ;;  %v654_v40 = vsub.s32 1, %v649_v37 }
  0x1b   : > { %v993_v34 = vld [vmem:[%s1085_s23] ss:$8 sps:$4 sm:$0xff]   ;;  %s888_s26 = sshll.u32 %s1136_s12, 6 }
  0x1c   : > { %v651_v41 = vrot.slane %v646_v39, %v650_v38  ;;  %v655_v42 = vrot.slane %v646_v39, %v654_v40  ;;  %s327_s29 = scalar_lea.vmem %s1130_s3, %s888_s26 }
  0x1d   : > { %573 = vmatpush1.bf16.msra.mxu0 %v956_v7  ;;  %908 = vmatpush1.bf16.msra.mxu1 %v956_v7 }
  0x1e   : > { %574 = vmatprep.subr.bf16.mxu0 %v957_v8  ;;  %893 = vmatprep.subr.bf16.mxu1 %v957_v8 }
  0x21   : > { %575 = vmatpush1.bf16.msra.mxu0 %v959_v9  ;;  %909 = vmatpush1.bf16.msra.mxu1 %v959_v9 }
  0x22   : > { %576 = vmatprep.subr.bf16.mxu0 %v960_v10  ;;  %894 = vmatprep.subr.bf16.mxu1 %v960_v10 }
  0x25   : > { %577 = vmatpush1.bf16.msra.mxu0 %v962_v11  ;;  %910 = vmatpush1.bf16.msra.mxu1 %v962_v11 }
  0x26   : > { %578 = vmatprep.subr.bf16.mxu0 %v963_v12  ;;  %895 = vmatprep.subr.bf16.mxu1 %v963_v12 }
  0x29   : > { %579 = vmatpush1.bf16.msra.mxu0 %v965_v14  ;;  %911 = vmatpush1.bf16.msra.mxu1 %v965_v14 }
  0x2a   : > { %580 = vmatprep.subr.bf16.mxu0 %v966_v16  ;;  %896 = vmatprep.subr.bf16.mxu1 %v966_v16 }
  0x2d   : > { %581 = vmatpush1.bf16.msra.mxu0 %v968_v17  ;;  %912 = vmatpush1.bf16.msra.mxu1 %v968_v17 }
  0x2e   : > { %582 = vmatprep.subr.bf16.mxu0 %v969_v18  ;;  %897 = vmatprep.subr.bf16.mxu1 %v969_v18 }
  0x31   : > { %583 = vmatpush2.bf16.msra.mxu0 %v971_v19  ;;  %913 = vmatpush2.bf16.msra.mxu1 %v971_v19 }
  0x32   : > { %584 = vmatprep.subr.bf16.mxu0 %v972_v20  ;;  %898 = vmatprep.subr.bf16.mxu1 %v972_v20 }
  0x35   : > { %585 = vmatpush2.bf16.msra.mxu0 %v974_v21  ;;  %914 = vmatpush2.bf16.msra.mxu1 %v974_v21 }
  0x36   : > { %586 = vmatprep.subr.bf16.mxu0 %v975_v22  ;;  %899 = vmatprep.subr.bf16.mxu1 %v975_v22 }
  0x39   : > { %587 = vmatpush2.bf16.msra.mxu0 %v977_v23  ;;  %915 = vmatpush2.bf16.msra.mxu1 %v977_v23 }
  0x3a   : > { %588 = vmatprep.subr.bf16.mxu0 %v978_v24  ;;  %900 = vmatprep.subr.bf16.mxu1 %v978_v24 }
  0x3d   : > { %589 = vmatpush2.bf16.msra.mxu0 %v980_v25  ;;  %916 = vmatpush2.bf16.msra.mxu1 %v980_v25 }
  0x3e   : > { %590 = vmatprep.subr.bf16.mxu0 %v981_v26  ;;  %901 = vmatprep.subr.bf16.mxu1 %v981_v26 }
  0x41   : > { %591 = vmatpush2.bf16.msra.mxu0 %v983_v27  ;;  %917 = vmatpush2.bf16.msra.mxu1 %v983_v27 }
  0x42   : > { %592 = vmatprep.subr.bf16.mxu0 %v984_v28  ;;  %902 = vmatprep.subr.bf16.mxu1 %v984_v28 }
  0x45   : > { %593 = vmatpush2.bf16.msra.mxu0 %v986_v29  ;;  %918 = vmatpush2.bf16.msra.mxu1 %v986_v29 }
  0x46   : > { %594 = vmatprep.subr.bf16.mxu0 %v987_v30  ;;  %903 = vmatprep.subr.bf16.mxu1 %v987_v30 }
  0x49   : > { %595 = vmatpush2.bf16.msra.mxu0 %v989_v31  ;;  %919 = vmatpush2.bf16.msra.mxu1 %v989_v31 }
  0x4a   : > { %596 = vmatprep.subr.bf16.mxu0 %v990_v32  ;;  %904 = vmatprep.subr.bf16.mxu1 %v990_v32 }
  0x4d   : > { %597 = vmatpush2.bf16.msra.mxu0 %v992_v33  ;;  %920 = vmatpush2.bf16.msra.mxu1 %v992_v33 }
  0x50   : > { %599 = vmatmul.mubr.bf16.vlgmr.msra.gmra.mxu0 %v993_v34  ;;  %609 = vmatmul.mubr.bf16.vlgmr.msra.gmra.mxu1 %v996_v35 }
 0x110   : > { %v600_v43 = vpop.f32.mrf.mxu0  ;;  %v610_v44 = vpop.f32.mrf.mxu1 }
 0x111   : > { %v658_v45 = vadd.f32 %v651_v41, %v600_v43  ;;  %v662_v46 = vadd.f32 %v651_v41, %v610_v44 }
 0x112   : > { %v602_v47 = vpop.f32.mrf.mxu0  ;;  %v612_v48 = vpop.f32.mrf.mxu1 }
 0x113   : > { %v666_v49 = vmax.f32 %v658_v45, 0.0  ;;  %v670_v50 = vmax.f32 %v662_v46, 0.0  ;;  %v659_v51 = vadd.f32 %v655_v42, %v602_v47  ;;  %v663_v52 = vadd.f32 %v655_v42, %v612_v48 }
 0x114   : > { %v604_v53 = vpop.f32.mrf.mxu0  ;;  %v614_v54 = vpop.f32.mrf.mxu1 }
 0x115   : > { %674 = vst [vmem:[%s327_s29] sm:$0xff] %v666_v49  ;;  %678 = vst [vmem:[%s327_s29 + $0x20] sm:$0xff] %v670_v50  ;;  %v667_v55 = vmax.f32 %v659_v51, 0.0  ;;  %v671_v56 = vmax.f32 %v663_v52, 0.0  ;;  %v660_v57 = vadd.f32 %v651_v41, %v604_v53  ;;  %v664_v58 = vadd.f32 %v651_v41, %v614_v54 }
 0x116   : > { %v606_v59 = vpop.f32.mrf.mxu0  ;;  %v616_v60 = vpop.f32.mrf.mxu1 }
 0x117   : > { %675 = vst [vmem:[%s327_s29 + $0x8] sm:$0xff] %v667_v55  ;;  %679 = vst [vmem:[%s327_s29 + $0x28] sm:$0xff] %v671_v56  ;;  %v668_v61 = vmax.f32 %v660_v57, 0.0  ;;  %v672_v62 = vmax.f32 %v664_v58, 0.0  ;;  %v661_v63 = vadd.f32 %v655_v42, %v606_v59  ;;  %v665_v0 = vadd.f32 %v655_v42, %v616_v60 }
 0x119   : > { %676 = vst [vmem:[%s327_s29 + $0x10] sm:$0xff] %v668_v61  ;;  %680 = vst [vmem:[%s327_s29 + $0x30] sm:$0xff] %v672_v62  ;;  %v669_v1 = vmax.f32 %v661_v63, 0.0  ;;  %v673_v2 = vmax.f32 %v665_v0, 0.0 }
 0x11b   : > { %677 = vst [vmem:[%s327_s29 + $0x18] sm:$0xff] %v669_v1  ;;  %681 = vst [vmem:[%s327_s29 + $0x38] sm:$0xff] %v673_v2 }
 0x11c PF: > { %s13_s14 = sadd.s32 1, %s1021_s14   ;;  %s1131_s12 = smov %s1017_s13 }
 0x11d   : > { %p10_p5 = scmp.ge.s32.totalorder %s13_s14, 6   ;;  %s1132_s13 = smov %s1134_s15 }
 0x11f   :  { %12 = sbr.rel (!%p10_p5) target bundleno = 2 (0x2), region = 76 }

// kernel: vqvae_forward.12
= control target key start
LH: loop header
LB: loop body
LE: loop exit
PB: predicated region body
PF: predicated region fallthrough
CT: control target
= control target key end

     0   :  { %s1728_s12 = smov 0   ;;  %s1730_s13 = smov 0   ;;  %s1980_s0 = inlined_call_operand.vmem [shape: bf16[4,128,1024], index: 0, kind: input, shape index: {}]   ;;  %s1981_s1 = inlined_call_operand.vmem [shape: bf16[4,1024,128], index: 1, kind: input, shape index: {}]   ;;  %s1982_s2 = inlined_call_operand.vmem [shape: f32[1,128], index: 2, kind: input, shape index: {}]   ;;  %s1983_s3 = inlined_call_operand.vmem [shape: f32[4,128,128], index: 3, kind: output, shape index: {}]  }
   0x1   :  { %s1732_s14 = smov 0   ;;  %s1734_s15 = smov 0  }
   0x2   :  { %s1736_s16 = smov 0   ;;  %s1738_s17 = smov 0  }
   0x3   :  { %s1740_s18 = smov 0  }
   0x4 LB: > { %s28_s19 = sadd.s32 1, %s1697_s16  ;;  %s39_s20 = sadd.s32 1, %s1701_s17  ;;  %s1705_s18 = sphi %s1740_s18, %s13_s18   ;;  %s1701_s17 = sphi %s1738_s17, %s1989_s17   ;;  %s1697_s16 = sphi %s1736_s16, %s1988_s16   ;;  %s1693_s15 = sphi %s1734_s15, %s1987_s15   ;;  %s1689_s14 = sphi %s1732_s14, %s1986_s14   ;;  %s1685_s13 = sphi %s1730_s13, %s1985_s13   ;;  %s1681_s12 = sphi %s1728_s12, %s1984_s12  }
   0x5   : > { %p29_p0 = scmp.ge.s32.totalorder %s28_s19, 2  ;;  %p57_p1 = scmp.ne.s32.totalorder %s1685_s13, %s1681_s12 }
   0x6   : > { %p58_p2 = scmp.eq.s32.totalorder %s1705_s18, 0  ;;  %s50_s24 = sadd.s32 1, %s1685_s13 }
   0x7   : > { %s1991_s19 = smov (%p29_p0, %s28_s19), 0  ;;  %s1993_s20 = smov (!%p29_p0, %s39_s20), %s1701_s17 }
   0x8   : > { %p59_p3 = por %p58_p2, %p57_p1  ;;  %p41_p4 = scmp.ge.s32.totalorder %s1993_s20, 4 }
   0x9   : > { %s46_s21 = ssub.s32 %s1697_s16, %s1991_s19  ;;  %p1304_p6 = scmp.ge.s32.totalorder %s1705_s18, 8 }
   0xa   : > { %s1995_s20 = smov (%p41_p4, %s1993_s20), 0 }
   0xb   : > { %s43_s22 = ssub.s32 %s1701_s17, %s1995_s20  ;;  %175 = sbr.rel (%p1304_p6) target bundleno = 39 (0x27), region = 20 }
   0xc   : > { %s47_s23 = sor.u32 %s46_s21, %s43_s22 }
   0xd   : > { %p48_p5 = scmp.eq.s32.totalorder %s47_s23, 0 }
   0xf   : > { %s1779_s25 = scalar_select %p48_p5, %s1685_s13, %s50_s24  }
  0x10   : > { %178 = sbr.rel (!%p59_p3) target bundleno = 39 (0x27), region = 24  ;;  %s180_s26 = sand.u32 (%p59_p3), 1, %s1685_s13  }
  0x11   : > { %s1306_s27 = sshll.u32 (%p59_p3), %s1697_s16, 2  ;;  %s1305_s28 = sshll.u32 (%p59_p3), %s180_s26, 8 }
  0x12   : > { %s1307_s29 = sshll.u32 (%p59_p3), %s1701_s17, 7  ;;  %s1793_s8 = scalar_lea.vmem (%p59_p3), [#allocation3], %s1305_s28 }
  0x13   : > { %s188_s30 = sadd.s32 (%p59_p3), %s1307_s29, %s1306_s27 }
  0x14   : > { %s1308_s4 = sshll.u32 (%p59_p3), %s188_s30, 2 }
  0x15   : > { %s1788_s7 = scalar_lea.vmem %s1980_s0, %s1308_s4 }
  0x16   : > { %v203_v0 = vld [vmem:[%s1788_s7] sm:$0xff]  ;;  %v205_v1 = vld [vmem:[%s1788_s7 + $0x8] sm:$0xff] }
  0x17   : > { %v207_v2 = vld [vmem:[%s1788_s7 + $0x20] sm:$0xff]  ;;  %204 = vst [vmem:[%s1793_s8] sm:$0xff] %v203_v0  ;;  %206 = vst [vmem:[%s1793_s8 + $0x8] sm:$0xff] %v205_v1  ;;  %v209_v3 = vld [vmem:[%s1788_s7 + $0x28] sm:$0xff] }
  0x18   : > { %208 = vst [vmem:[%s1793_s8 + $0x10] sm:$0xff] %v207_v2  ;;  %v211_v4 = vld [vmem:[%s1788_s7 + $0x40] sm:$0xff]  ;;  %v213_v5 = vld [vmem:[%s1788_s7 + $0x48] sm:$0xff]  ;;  %210 = vst [vmem:[%s1793_s8 + $0x18] sm:$0xff] %v209_v3 }
  0x19   : > { %212 = vst [vmem:[%s1793_s8 + $0x20] sm:$0xff] %v211_v4  ;;  %214 = vst [vmem:[%s1793_s8 + $0x28] sm:$0xff] %v213_v5  ;;  %v215_v6 = vld [vmem:[%s1788_s7 + $0x60] sm:$0xff]  ;;  %v217_v7 = vld [vmem:[%s1788_s7 + $0x68] sm:$0xff] }
  0x1a   : > { %v219_v8 = vld [vmem:[%s1788_s7 + $0x80] sm:$0xff]  ;;  %216 = vst [vmem:[%s1793_s8 + $0x30] sm:$0xff] %v215_v6  ;;  %218 = vst [vmem:[%s1793_s8 + $0x38] sm:$0xff] %v217_v7  ;;  %v221_v9 = vld [vmem:[%s1788_s7 + $0x88] sm:$0xff] }
  0x1b   : > { %220 = vst [vmem:[%s1793_s8 + $0x40] sm:$0xff] %v219_v8  ;;  %v223_v10 = vld [vmem:[%s1788_s7 + $0xa0] sm:$0xff]  ;;  %v225_v11 = vld [vmem:[%s1788_s7 + $0xa8] sm:$0xff]  ;;  %222 = vst [vmem:[%s1793_s8 + $0x48] sm:$0xff] %v221_v9 }
  0x1c   : > { %224 = vst [vmem:[%s1793_s8 + $0x50] sm:$0xff] %v223_v10  ;;  %226 = vst [vmem:[%s1793_s8 + $0x58] sm:$0xff] %v225_v11  ;;  %v227_v12 = vld [vmem:[%s1788_s7 + $0xc0] sm:$0xff]  ;;  %v229_v13 = vld [vmem:[%s1788_s7 + $0xc8] sm:$0xff] }
  0x1d   : > { %v231_v14 = vld [vmem:[%s1788_s7 + $0xe0] sm:$0xff]  ;;  %228 = vst [vmem:[%s1793_s8 + $0x60] sm:$0xff] %v227_v12  ;;  %230 = vst [vmem:[%s1793_s8 + $0x68] sm:$0xff] %v229_v13  ;;  %v233_v15 = vld [vmem:[%s1788_s7 + $0xe8] sm:$0xff] }
  0x1e   : > { %232 = vst [vmem:[%s1793_s8 + $0x70] sm:$0xff] %v231_v14  ;;  %v235_v16 = vld [vmem:[%s1788_s7 + $0x100] sm:$0xff]  ;;  %v237_v17 = vld [vmem:[%s1788_s7 + $0x108] sm:$0xff]  ;;  %234 = vst [vmem:[%s1793_s8 + $0x78] sm:$0xff] %v233_v15 }
  0x1f   : > { %236 = vst [vmem:[%s1793_s8 + $0x80] sm:$0xff] %v235_v16  ;;  %238 = vst [vmem:[%s1793_s8 + $0x88] sm:$0xff] %v237_v17  ;;  %v239_v18 = vld [vmem:[%s1788_s7 + $0x120] sm:$0xff]  ;;  %v241_v19 = vld [vmem:[%s1788_s7 + $0x128] sm:$0xff] }
  0x20   : > { %v243_v20 = vld [vmem:[%s1788_s7 + $0x140] sm:$0xff]  ;;  %240 = vst [vmem:[%s1793_s8 + $0x90] sm:$0xff] %v239_v18  ;;  %242 = vst [vmem:[%s1793_s8 + $0x98] sm:$0xff] %v241_v19  ;;  %v245_v21 = vld [vmem:[%s1788_s7 + $0x148] sm:$0xff] }
  0x21   : > { %244 = vst [vmem:[%s1793_s8 + $0xa0] sm:$0xff] %v243_v20  ;;  %v247_v22 = vld [vmem:[%s1788_s7 + $0x160] sm:$0xff]  ;;  %v249_v23 = vld [vmem:[%s1788_s7 + $0x168] sm:$0xff]  ;;  %246 = vst [vmem:[%s1793_s8 + $0xa8] sm:$0xff] %v245_v21 }
  0x22   : > { %248 = vst [vmem:[%s1793_s8 + $0xb0] sm:$0xff] %v247_v22  ;;  %250 = vst [vmem:[%s1793_s8 + $0xb8] sm:$0xff] %v249_v23  ;;  %v251_v24 = vld [vmem:[%s1788_s7 + $0x180] sm:$0xff]  ;;  %v253_v25 = vld [vmem:[%s1788_s7 + $0x188] sm:$0xff] }
  0x23   : > { %v255_v26 = vld [vmem:[%s1788_s7 + $0x1a0] sm:$0xff]  ;;  %252 = vst [vmem:[%s1793_s8 + $0xc0] sm:$0xff] %v251_v24  ;;  %254 = vst [vmem:[%s1793_s8 + $0xc8] sm:$0xff] %v253_v25  ;;  %v257_v27 = vld [vmem:[%s1788_s7 + $0x1a8] sm:$0xff] }
  0x24   : > { %256 = vst [vmem:[%s1793_s8 + $0xd0] sm:$0xff] %v255_v26  ;;  %v259_v28 = vld [vmem:[%s1788_s7 + $0x1c0] sm:$0xff]  ;;  %v261_v29 = vld [vmem:[%s1788_s7 + $0x1c8] sm:$0xff]  ;;  %258 = vst [vmem:[%s1793_s8 + $0xd8] sm:$0xff] %v257_v27 }
  0x25   : > { %260 = vst [vmem:[%s1793_s8 + $0xe0] sm:$0xff] %v259_v28  ;;  %262 = vst [vmem:[%s1793_s8 + $0xe8] sm:$0xff] %v261_v29  ;;  %v263_v30 = vld [vmem:[%s1788_s7 + $0x1e0] sm:$0xff]  ;;  %v265_v31 = vld [vmem:[%s1788_s7 + $0x1e8] sm:$0xff] }
  0x26   : > { %264 = vst [vmem:[%s1793_s8 + $0xf0] sm:$0xff] %v263_v30  ;;  %266 = vst [vmem:[%s1793_s8 + $0xf8] sm:$0xff] %v265_v31 }
  0x27 PF: > { %p1309_p7 = scmp.ge.s32.totalorder %s1705_s18, 1  ;;  %p287_p8 = scmp.lt.s32.totalorder %s1705_s18, 9 }
  0x29   : > { %p288_p9 = pnand %p1309_p7, %p287_p8 }
  0x2a   : > { %s294_s9 = sand.u32 (!%p288_p9), 1, %s1681_s12   ;;  %s1311_s10 = sshll.u32 (!%p288_p9), %s1689_s14, 6 }
  0x2b   : > { %291 = sbr.rel (%p288_p9) target bundleno = 373 (0x175), region = 51  ;;  %s1310_s11 = sshll.u32 (!%p288_p9), %s294_s9, 8 }
  0x2c   : > { %p342_p10 = scmp.lt.s32.totalorder (!%p288_p9), %s1693_s15, 3  ;;  %p344_p11 = scmp.lt.s32.totalorder (!%p288_p9), %s1311_s10, 127 }
  0x2d   : > { %s1872_s12 = scalar_lea.vmem (!%p288_p9), [#allocation3], %s1310_s11  ;;  %p1316_p12 = scmp.ne.s32.totalorder (!%p288_p9), %s1689_s14, 0 }
  0x30   : > { %s1997_s15 = smov (!%p342_p10, %s1693_s15), 3  ;;  %s1999_s10 = smov (!%p344_p11, %s1311_s10), 127 }
  0x31   : > { %s1312_s21 = sshll.u32 %s1997_s15, 7  ;;  %374 = sbr.rel (%p1316_p12) target bundleno = 63 (0x3f), region = 59 }
  0x32   : > { %s350_s22 = sadd.s32 %s1312_s21, %s1999_s10  ;;  %s1865_s26 = scalar_lea.vmem %s1983_s3, %s1312_s21 }
  0x33   : > { %s1313_s27 = sshll.u32 %s350_s22, 2 }
  0x34   : > { %s1870_s30 = scalar_lea.vmem %s1981_s1, %s1313_s27 }
  0x36   : > { %v1707_v32 = vmov 0.0  }
  0x37   : > { %375 = vst [vmem:[#allocation2 + $0x30] sm:$0xff] %v1707_v32  ;;  %376 = vst [vmem:[#allocation2] sm:$0xff] %v1707_v32 }
  0x38   : > { %377 = vst [vmem:[#allocation2 + $0x58] sm:$0xff] %v1707_v32  ;;  %378 = vst [vmem:[#allocation2 + $0x18] sm:$0xff] %v1707_v32 }
  0x39   : > { %379 = vst [vmem:[#allocation2 + $0x50] sm:$0xff] %v1707_v32  ;;  %380 = vst [vmem:[#allocation2 + $0x68] sm:$0xff] %v1707_v32 }
  0x3a   : > { %381 = vst [vmem:[#allocation2 + $0x8] sm:$0xff] %v1707_v32  ;;  %382 = vst [vmem:[#allocation2 + $0x48] sm:$0xff] %v1707_v32 }
  0x3b   : > { %383 = vst [vmem:[#allocation2 + $0x40] sm:$0xff] %v1707_v32  ;;  %384 = vst [vmem:[#allocation2 + $0x20] sm:$0xff] %v1707_v32 }
  0x3c   : > { %385 = vst [vmem:[#allocation2 + $0x10] sm:$0xff] %v1707_v32  ;;  %386 = vst [vmem:[#allocation2 + $0x38] sm:$0xff] %v1707_v32 }
  0x3d   : > { %387 = vst [vmem:[#allocation2 + $0x60] sm:$0xff] %v1707_v32  ;;  %388 = vst [vmem:[#allocation2 + $0x70] sm:$0xff] %v1707_v32 }
  0x3e   : > { %389 = vst [vmem:[#allocation2 + $0x78] sm:$0xff] %v1707_v32  ;;  %390 = vst [vmem:[#allocation2 + $0x28] sm:$0xff] %v1707_v32 }
  0x3f PF: > { %v1571_v33 = vld [vmem:[%s1870_s30 + $0x78] sm:$0xff]   ;;  %v1575_v37 = vld [vmem:[%s1870_s30 + $0x70] sm:$0xff]   ;;  %v1579_v41 = vld [vmem:[%s1870_s30 + $0x68] sm:$0xff]   ;;  %p1381_p13 = scmp.ne.s32.totalorder %s1689_s14, 1 }
  0x40   : > { %v1572_v34 = vld [vmem:[%s1870_s30 + $0xf8] sm:$0xff]   ;;  %1386 = vmatprep.subr.bf16.mxu0 %v1571_v33  ;;  %v1576_v38 = vld [vmem:[%s1870_s30 + $0xf0] sm:$0xff]   ;;  %v1580_v42 = vld [vmem:[%s1870_s30 + $0xe8] sm:$0xff]  }
  0x41   : > { %v1573_v35 = vld [vmem:[%s1870_s30 + $0x38] sm:$0xff]   ;;  %1450 = vmatprep.subr.bf16.mxu1 %v1572_v34  ;;  %v1577_v39 = vld [vmem:[%s1870_s30 + $0x30] sm:$0xff]   ;;  %v1581_v43 = vld [vmem:[%s1870_s30 + $0x28] sm:$0xff]  }
  0x42   : > { %v1574_v36 = vld [vmem:[%s1870_s30 + $0xb8] sm:$0xff]   ;;  %1387 = vmatpush3.bf16.msra.mxu0 %v1573_v35  ;;  %v1578_v40 = vld [vmem:[%s1870_s30 + $0xb0] sm:$0xff]   ;;  %v1582_v44 = vld [vmem:[%s1870_s30 + $0xa8] sm:$0xff]  }
  0x43   : > { %1451 = vmatpush3.bf16.msra.mxu1 %v1574_v36  ;;  %1388 = vmatprep.subr.bf16.mxu0 %v1575_v37  ;;  %v1583_v45 = vld [vmem:[%s1870_s30 + $0x60] sm:$0xff]   ;;  %v1587_v49 = vld [vmem:[%s1870_s30 + $0x58] sm:$0xff]   ;;  %v1591_v53 = vld [vmem:[%s1870_s30 + $0x50] sm:$0xff]  }
  0x44   : > { %1452 = vmatprep.subr.bf16.mxu1 %v1576_v38  ;;  %v1584_v46 = vld [vmem:[%s1870_s30 + $0xe0] sm:$0xff]   ;;  %v1588_v50 = vld [vmem:[%s1870_s30 + $0xd8] sm:$0xff]   ;;  %v1592_v54 = vld [vmem:[%s1870_s30 + $0xd0] sm:$0xff]  }
  0x45   : > { %v1585_v47 = vld [vmem:[%s1870_s30 + $0x20] sm:$0xff]   ;;  %v1589_v51 = vld [vmem:[%s1870_s30 + $0x18] sm:$0xff]   ;;  %v1593_v55 = vld [vmem:[%s1870_s30 + $0x10] sm:$0xff]  }
  0x46   : > { %1389 = vmatpush3.bf16.msra.mxu0 %v1577_v39  ;;  %v1586_v48 = vld [vmem:[%s1870_s30 + $0xa0] sm:$0xff]   ;;  %v1590_v52 = vld [vmem:[%s1870_s30 + $0x98] sm:$0xff]   ;;  %v1594_v56 = vld [vmem:[%s1870_s30 + $0x90] sm:$0xff]  }
  0x47   : > { %1453 = vmatpush3.bf16.msra.mxu1 %v1578_v40  ;;  %1390 = vmatprep.subr.bf16.mxu0 %v1579_v41  ;;  %v1595_v57 = vld [vmem:[%s1870_s30 + $0x48] sm:$0xff]   ;;  %v1599_v61 = vld [vmem:[%s1870_s30 + $0x40] sm:$0xff]   ;;  %v391_v40 = vld [vmem:[#allocation2 + $0x30] sm:$0xff] }
  0x48   : > { %1454 = vmatprep.subr.bf16.mxu1 %v1580_v42  ;;  %v1596_v58 = vld [vmem:[%s1870_s30 + $0xc8] sm:$0xff]   ;;  %v1600_v62 = vld [vmem:[%s1870_s30 + $0xc0] sm:$0xff]  }
  0x49   : > { %v1597_v59 = vld [vmem:[%s1870_s30 + $0x8] sm:$0xff]   ;;  %v1601_v63 = vld [vmem:[%s1870_s30] sm:$0xff]  }
  0x4a   : > { %1391 = vmatpush3.bf16.msra.mxu0 %v1581_v43  ;;  %v1598_v60 = vld [vmem:[%s1870_s30 + $0x88] sm:$0xff]   ;;  %v1602_v0 = vld [vmem:[%s1870_s30 + $0x80] sm:$0xff]  }
  0x4b   : > { %1455 = vmatpush3.bf16.msra.mxu1 %v1582_v44  ;;  %1392 = vmatprep.subr.bf16.mxu0 %v1583_v45  ;;  %v1603_v1 = vld [vmem:[%s1872_s12] ss:$16 sps:$4 sm:$0xff]   ;;  %v1605_v2 = vld [vmem:[%s1872_s12 + $0x4] ss:$16 sps:$4 sm:$0xff]   ;;  %v1606_v3 = vld [vmem:[%s1872_s12 + $0x8] ss:$16 sps:$4 sm:$0xff]  }
  0x4c   : > { %1456 = vmatprep.subr.bf16.mxu1 %v1584_v46  ;;  %v1608_v4 = vld [vmem:[%s1872_s12 + $0xc] ss:$16 sps:$4 sm:$0xff]   ;;  %887 = vmatprep.mubr.bf16.mxu0 %v1605_v2  ;;  %v1609_v5 = vld [vmem:[%s1872_s12 + $0x24] ss:$16 sps:$4 sm:$0xff]   ;;  %v1613_v7 = vld [vmem:[%s1872_s12 + $0x20] ss:$16 sps:$4 sm:$0xff]  }
  0x4d   : > { %984 = vmatprep.mubr.bf16.mxu1 %v1608_v4  ;;  %v1611_v6 = vld [vmem:[%s1872_s12 + $0x2c] ss:$16 sps:$4 sm:$0xff]   ;;  %v1614_v8 = vld [vmem:[%s1872_s12 + $0x28] ss:$16 sps:$4 sm:$0xff]   ;;  %v1615_v9 = vld [vmem:[%s1872_s12 + $0x44] ss:$16 sps:$4 sm:$0xff]  }
  0x4e   : > { %1393 = vmatpush3.bf16.msra.mxu0 %v1585_v47  ;;  %v1617_v10 = vld [vmem:[%s1872_s12 + $0x4c] ss:$16 sps:$4 sm:$0xff]   ;;  %v1619_v11 = vld [vmem:[%s1872_s12 + $0x40] ss:$16 sps:$4 sm:$0xff]   ;;  %v1620_v12 = vld [vmem:[%s1872_s12 + $0x48] ss:$16 sps:$4 sm:$0xff]  }
  0x4f   : > { %1457 = vmatpush3.bf16.msra.mxu1 %v1586_v48  ;;  %1394 = vmatprep.subr.bf16.mxu0 %v1587_v49  ;;  %v1621_v13 = vld [vmem:[%s1872_s12 + $0x64] ss:$16 sps:$4 sm:$0xff]   ;;  %v1623_v14 = vld [vmem:[%s1872_s12 + $0x6c] ss:$16 sps:$4 sm:$0xff]   ;;  %v1625_v15 = vld [vmem:[%s1872_s12 + $0x60] ss:$16 sps:$4 sm:$0xff]  }
  0x50   : > { %1458 = vmatprep.subr.bf16.mxu1 %v1588_v50  ;;  %v1626_v16 = vld [vmem:[%s1872_s12 + $0x68] ss:$16 sps:$4 sm:$0xff]   ;;  %v1627_v17 = vld [vmem:[%s1872_s12 + $0x84] ss:$16 sps:$4 sm:$0xff]   ;;  %v1629_v18 = vld [vmem:[%s1872_s12 + $0x8c] ss:$16 sps:$4 sm:$0xff]  }
  0x51   : > { %v1631_v19 = vld [vmem:[%s1872_s12 + $0x80] ss:$16 sps:$4 sm:$0xff]   ;;  %v1632_v20 = vld [vmem:[%s1872_s12 + $0x88] ss:$16 sps:$4 sm:$0xff]   ;;  %v1633_v21 = vld [vmem:[%s1872_s12 + $0xa4] ss:$16 sps:$4 sm:$0xff]  }
  0x52   : > { %1395 = vmatpush3.bf16.msra.mxu0 %v1589_v51  ;;  %v1635_v22 = vld [vmem:[%s1872_s12 + $0xac] ss:$16 sps:$4 sm:$0xff]   ;;  %v1637_v23 = vld [vmem:[%s1872_s12 + $0xa0] ss:$16 sps:$4 sm:$0xff]   ;;  %v1638_v24 = vld [vmem:[%s1872_s12 + $0xa8] ss:$16 sps:$4 sm:$0xff]  }
  0x53   : > { %1459 = vmatpush3.bf16.msra.mxu1 %v1590_v52  ;;  %1396 = vmatprep.subr.bf16.mxu0 %v1591_v53  ;;  %v1639_v25 = vld [vmem:[%s1872_s12 + $0xc4] ss:$16 sps:$4 sm:$0xff]   ;;  %v1641_v26 = vld [vmem:[%s1872_s12 + $0xcc] ss:$16 sps:$4 sm:$0xff]   ;;  %v1643_v27 = vld [vmem:[%s1872_s12 + $0xc0] ss:$16 sps:$4 sm:$0xff]  }
  0x54   : > { %1460 = vmatprep.subr.bf16.mxu1 %v1592_v54  ;;  %v1644_v28 = vld [vmem:[%s1872_s12 + $0xc8] ss:$16 sps:$4 sm:$0xff]   ;;  %v1645_v29 = vld [vmem:[%s1872_s12 + $0xe4] ss:$16 sps:$4 sm:$0xff]   ;;  %v1647_v30 = vld [vmem:[%s1872_s12 + $0xec] ss:$16 sps:$4 sm:$0xff]  }
  0x55   : > { %v1649_v31 = vld [vmem:[%s1872_s12 + $0xe0] ss:$16 sps:$4 sm:$0xff]   ;;  %v1650_v32 = vld [vmem:[%s1872_s12 + $0xe8] ss:$16 sps:$4 sm:$0xff]  }
  0x56   : > { %1397 = vmatpush3.bf16.msra.mxu0 %v1593_v55  ;;  %v392_v49 = vld [vmem:[#allocation2] sm:$0xff] }
  0x57   : > { %1461 = vmatpush3.bf16.msra.mxu1 %v1594_v56  ;;  %1398 = vmatprep.subr.bf16.mxu0 %v1595_v57 }
  0x58   : > { %1462 = vmatprep.subr.bf16.mxu1 %v1596_v58  ;;  %v393_v58 = vld [vmem:[#allocation2 + $0x58] sm:$0xff] }
  0x5a   : > { %1399 = vmatpush3.bf16.msra.mxu0 %v1597_v59 }
  0x5b   : > { %1463 = vmatpush3.bf16.msra.mxu1 %v1598_v60  ;;  %1400 = vmatprep.subr.bf16.mxu0 %v1599_v61 }
  0x5c   : > { %1464 = vmatprep.subr.bf16.mxu1 %v1600_v62 }
  0x5e   : > { %1401 = vmatpush3.bf16.msra.mxu0 %v1601_v63 }
  0x5f   : > { %1465 = vmatpush3.bf16.msra.mxu1 %v1602_v0 }
  0x61   : > { %888 = vmatmul.mubr.bf16.vlgmr.msra.gmra.mxu0 %v1603_v1 }
  0x62   : > { %985 = vmatmul.mubr.bf16.vlgmr.msra.gmra.mxu1 %v1606_v3  ;;  %895 = vmatprep.mubr.bf16.mxu0 %v1609_v5  ;;  %v394_v3 = vld [vmem:[#allocation2 + $0x18] sm:$0xff] }
  0x63   : > { %992 = vmatprep.mubr.bf16.mxu1 %v1611_v6 }
  0x69   : > { %896 = vmatmul.mubr.bf16.gmra.mxu0 %v1613_v7 }
  0x6a   : > { %993 = vmatmul.mubr.bf16.gmra.mxu1 %v1614_v8  ;;  %903 = vmatprep.mubr.bf16.mxu0 %v1615_v9 }
  0x6b   : > { %1000 = vmatprep.mubr.bf16.mxu1 %v1617_v10 }
  0x71   : > { %904 = vmatmul.mubr.bf16.gmra.mxu0 %v1619_v11 }
  0x72   : > { %1001 = vmatmul.mubr.bf16.gmra.mxu1 %v1620_v12  ;;  %911 = vmatprep.mubr.bf16.mxu0 %v1621_v13  ;;  %v395_v12 = vld [vmem:[#allocation2 + $0x50] sm:$0xff] }
  0x73   : > { %1008 = vmatprep.mubr.bf16.mxu1 %v1623_v14 }
  0x79   : > { %912 = vmatmul.mubr.bf16.gmra.mxu0 %v1625_v15 }
  0x7a   : > { %1009 = vmatmul.mubr.bf16.gmra.mxu1 %v1626_v16  ;;  %919 = vmatprep.mubr.bf16.mxu0 %v1627_v17 }
  0x7b   : > { %1016 = vmatprep.mubr.bf16.mxu1 %v1629_v18 }
  0x81   : > { %920 = vmatmul.mubr.bf16.gmra.mxu0 %v1631_v19 }
  0x82   : > { %1017 = vmatmul.mubr.bf16.gmra.mxu1 %v1632_v20  ;;  %927 = vmatprep.mubr.bf16.mxu0 %v1633_v21  ;;  %v396_v21 = vld [vmem:[#allocation2 + $0x68] sm:$0xff] }
  0x83   : > { %1024 = vmatprep.mubr.bf16.mxu1 %v1635_v22 }
  0x89   : > { %928 = vmatmul.mubr.bf16.gmra.mxu0 %v1637_v23 }
  0x8a   : > { %1025 = vmatmul.mubr.bf16.gmra.mxu1 %v1638_v24  ;;  %935 = vmatprep.mubr.bf16.mxu0 %v1639_v25 }
  0x8b   : > { %1032 = vmatprep.mubr.bf16.mxu1 %v1641_v26 }
  0x91   : > { %936 = vmatmul.mubr.bf16.gmra.mxu0 %v1643_v27 }
  0x92   : > { %1033 = vmatmul.mubr.bf16.gmra.mxu1 %v1644_v28  ;;  %943 = vmatprep.mubr.bf16.mxu0 %v1645_v29 }
  0x93   : > { %1040 = vmatprep.mubr.bf16.mxu1 %v1647_v30  ;;  %v397_v30 = vld [vmem:[#allocation2 + $0x8] sm:$0xff] }
  0x99   : > { %944 = vmatmul.mubr.bf16.gmra.mxu0 %v1649_v31 }
  0x9a   : > { %1041 = vmatmul.mubr.bf16.gmra.mxu1 %v1650_v32 }
 0x121   : > { %v1402_v33 = vpop.f32.mrf.mxu0 }
 0x122   : > { %v1466_v34 = vpop.f32.mrf.mxu1 }
 0x123   : > { %v1403_v35 = vpop.f32.mrf.mxu0 }
 0x124   : > { %v1404_v36 = vadd.f32 %v1403_v35, %v1402_v33  ;;  %v1467_v37 = vpop.f32.mrf.mxu1 }
 0x125   : > { %v1468_v38 = vadd.f32 %v1467_v37, %v1466_v34  ;;  %v1405_v39 = vpop.f32.mrf.mxu0 }
 0x126   : > { %v1469_v41 = vpop.f32.mrf.mxu1 }
 0x127   : > { %v987_v42 = vadd.f32 %v1468_v38, %v1404_v36  ;;  %v1406_v43 = vpop.f32.mrf.mxu0 }
 0x128   : > { %v1407_v44 = vadd.f32 %v1406_v43, %v1405_v39  ;;  %v1470_v45 = vpop.f32.mrf.mxu1  ;;  %v398_v39 = vld [vmem:[#allocation2 + $0x48] sm:$0xff] }
 0x129   : > { %v1049_v46 = vadd.f32 %v987_v42, %v391_v40  ;;  %v1471_v47 = vadd.f32 %v1470_v45, %v1469_v41  ;;  %v1408_v48 = vpop.f32.mrf.mxu0 }
 0x12a   : > { %v1472_v50 = vpop.f32.mrf.mxu1 }
 0x12b   : > { %1065 = vst [vmem:[#allocation2 + $0x30] sm:$0xff] %v1049_v46  ;;  %v990_v51 = vadd.f32 %v1471_v47, %v1407_v44  ;;  %v1409_v52 = vpop.f32.mrf.mxu0 }
 0x12c   : > { %v1410_v53 = vadd.f32 %v1409_v52, %v1408_v48  ;;  %v1473_v54 = vpop.f32.mrf.mxu1  ;;  %v399_v48 = vld [vmem:[#allocation2 + $0x40] sm:$0xff] }
 0x12d   : > { %v1050_v55 = vadd.f32 %v990_v51, %v392_v49  ;;  %v1474_v56 = vadd.f32 %v1473_v54, %v1472_v50  ;;  %v1411_v57 = vpop.f32.mrf.mxu0 }
 0x12e   : > { %v1475_v59 = vpop.f32.mrf.mxu1 }
 0x12f   : > { %1066 = vst [vmem:[#allocation2] sm:$0xff] %v1050_v55  ;;  %v995_v60 = vadd.f32 %v1474_v56, %v1410_v53  ;;  %v1412_v61 = vpop.f32.mrf.mxu0 }
 0x130   : > { %v1413_v62 = vadd.f32 %v1412_v61, %v1411_v57  ;;  %v1476_v63 = vpop.f32.mrf.mxu1  ;;  %v400_v57 = vld [vmem:[#allocation2 + $0x20] sm:$0xff] }
 0x131   : > { %v1051_v0 = vadd.f32 %v995_v60, %v393_v58  ;;  %v1477_v1 = vadd.f32 %v1476_v63, %v1475_v59  ;;  %v1414_v2 = vpop.f32.mrf.mxu0 }
 0x132   : > { %v1478_v4 = vpop.f32.mrf.mxu1 }
 0x133   : > { %1067 = vst [vmem:[#allocation2 + $0x58] sm:$0xff] %v1051_v0  ;;  %v998_v5 = vadd.f32 %v1477_v1, %v1413_v62  ;;  %v1415_v6 = vpop.f32.mrf.mxu0 }
 0x134   : > { %v1416_v7 = vadd.f32 %v1415_v6, %v1414_v2  ;;  %v1479_v8 = vpop.f32.mrf.mxu1  ;;  %v401_v2 = vld [vmem:[#allocation2 + $0x10] sm:$0xff] }
 0x135   : > { %v1052_v9 = vadd.f32 %v998_v5, %v394_v3  ;;  %v1480_v10 = vadd.f32 %v1479_v8, %v1478_v4  ;;  %v1417_v11 = vpop.f32.mrf.mxu0 }
 0x136   : > { %v1481_v13 = vpop.f32.mrf.mxu1 }
 0x137   : > { %1068 = vst [vmem:[#allocation2 + $0x18] sm:$0xff] %v1052_v9  ;;  %v1003_v14 = vadd.f32 %v1480_v10, %v1416_v7  ;;  %v1418_v15 = vpop.f32.mrf.mxu0 }
 0x138   : > { %v1419_v16 = vadd.f32 %v1418_v15, %v1417_v11  ;;  %v1482_v17 = vpop.f32.mrf.mxu1  ;;  %v402_v11 = vld [vmem:[#allocation2 + $0x38] sm:$0xff] }
 0x139   : > { %v1053_v18 = vadd.f32 %v1003_v14, %v395_v12  ;;  %v1483_v19 = vadd.f32 %v1482_v17, %v1481_v13  ;;  %v1420_v20 = vpop.f32.mrf.mxu0 }
 0x13a   : > { %v1484_v22 = vpop.f32.mrf.mxu1 }
 0x13b   : > { %1069 = vst [vmem:[#allocation2 + $0x50] sm:$0xff] %v1053_v18  ;;  %v1006_v23 = vadd.f32 %v1483_v19, %v1419_v16  ;;  %v1421_v24 = vpop.f32.mrf.mxu0 }
 0x13c   : > { %v1422_v25 = vadd.f32 %v1421_v24, %v1420_v20  ;;  %v1485_v26 = vpop.f32.mrf.mxu1  ;;  %v403_v20 = vld [vmem:[#allocation2 + $0x60] sm:$0xff] }
 0x13d   : > { %v1054_v27 = vadd.f32 %v1006_v23, %v396_v21  ;;  %v1486_v28 = vadd.f32 %v1485_v26, %v1484_v22  ;;  %v1423_v29 = vpop.f32.mrf.mxu0 }
 0x13e   : > { %v1487_v31 = vpop.f32.mrf.mxu1 }
 0x13f   : > { %1070 = vst [vmem:[#allocation2 + $0x68] sm:$0xff] %v1054_v27  ;;  %v1011_v32 = vadd.f32 %v1486_v28, %v1422_v25  ;;  %v1424_v33 = vpop.f32.mrf.mxu0 }
 0x140   : > { %v1425_v34 = vadd.f32 %v1424_v33, %v1423_v29  ;;  %v1488_v35 = vpop.f32.mrf.mxu1  ;;  %v404_v29 = vld [vmem:[#allocation2 + $0x70] sm:$0xff] }
 0x141   : > { %v1055_v36 = vadd.f32 %v1011_v32, %v397_v30  ;;  %v1489_v37 = vadd.f32 %v1488_v35, %v1487_v31  ;;  %v1426_v38 = vpop.f32.mrf.mxu0 }
 0x142   : > { %v1490_v40 = vpop.f32.mrf.mxu1 }
 0x143   : > { %1071 = vst [vmem:[#allocation2 + $0x8] sm:$0xff] %v1055_v36  ;;  %v1014_v41 = vadd.f32 %v1489_v37, %v1425_v34  ;;  %v1427_v42 = vpop.f32.mrf.mxu0 }
 0x144   : > { %v1428_v43 = vadd.f32 %v1427_v42, %v1426_v38  ;;  %v1491_v44 = vpop.f32.mrf.mxu1  ;;  %v405_v38 = vld [vmem:[#allocation2 + $0x78] sm:$0xff] }
 0x145   : > { %v1056_v45 = vadd.f32 %v1014_v41, %v398_v39  ;;  %v1492_v46 = vadd.f32 %v1491_v44, %v1490_v40  ;;  %v1429_v47 = vpop.f32.mrf.mxu0 }
 0x146   : > { %v1493_v49 = vpop.f32.mrf.mxu1 }
 0x147   : > { %1072 = vst [vmem:[#allocation2 + $0x48] sm:$0xff] %v1056_v45  ;;  %v1019_v50 = vadd.f32 %v1492_v46, %v1428_v43  ;;  %v1430_v51 = vpop.f32.mrf.mxu0  ;;  %v406_v46 = vld [vmem:[#allocation2 + $0x28] sm:$0xff] }
 0x148   : > { %v1431_v52 = vadd.f32 %v1430_v51, %v1429_v47  ;;  %v1494_v53 = vpop.f32.mrf.mxu1 }
 0x149   : > { %v1057_v54 = vadd.f32 %v1019_v50, %v399_v48  ;;  %v1495_v55 = vadd.f32 %v1494_v53, %v1493_v49  ;;  %v1432_v56 = vpop.f32.mrf.mxu0 }
 0x14a   : > { %v1496_v58 = vpop.f32.mrf.mxu1 }
 0x14b   : > { %1073 = vst [vmem:[#allocation2 + $0x40] sm:$0xff] %v1057_v54  ;;  %v1022_v59 = vadd.f32 %v1495_v55, %v1431_v52  ;;  %v1433_v60 = vpop.f32.mrf.mxu0 }
 0x14c   : > { %v1434_v61 = vadd.f32 %v1433_v60, %v1432_v56  ;;  %v1497_v62 = vpop.f32.mrf.mxu1 }
 0x14d   : > { %v1058_v63 = vadd.f32 %v1022_v59, %v400_v57  ;;  %v1498_v0 = vadd.f32 %v1497_v62, %v1496_v58  ;;  %v1435_v1 = vpop.f32.mrf.mxu0 }
 0x14e   : > { %v1499_v3 = vpop.f32.mrf.mxu1 }
 0x14f   : > { %1074 = vst [vmem:[#allocation2 + $0x20] sm:$0xff] %v1058_v63  ;;  %v1027_v4 = vadd.f32 %v1498_v0, %v1434_v61  ;;  %v1436_v5 = vpop.f32.mrf.mxu0 }
 0x150   : > { %v1437_v6 = vadd.f32 %v1436_v5, %v1435_v1  ;;  %v1500_v7 = vpop.f32.mrf.mxu1 }
 0x151   : > { %v1059_v8 = vadd.f32 %v1027_v4, %v401_v2  ;;  %v1501_v9 = vadd.f32 %v1500_v7, %v1499_v3  ;;  %v1438_v10 = vpop.f32.mrf.mxu0 }
 0x152   : > { %v1502_v12 = vpop.f32.mrf.mxu1 }
 0x153   : > { %1075 = vst [vmem:[#allocation2 + $0x10] sm:$0xff] %v1059_v8  ;;  %v1030_v13 = vadd.f32 %v1501_v9, %v1437_v6  ;;  %v1439_v14 = vpop.f32.mrf.mxu0 }
 0x154   : > { %v1440_v15 = vadd.f32 %v1439_v14, %v1438_v10  ;;  %v1503_v16 = vpop.f32.mrf.mxu1 }
 0x155   : > { %v1060_v17 = vadd.f32 %v1030_v13, %v402_v11  ;;  %v1504_v18 = vadd.f32 %v1503_v16, %v1502_v12  ;;  %v1441_v19 = vpop.f32.mrf.mxu0 }
 0x156   : > { %v1505_v21 = vpop.f32.mrf.mxu1 }
 0x157   : > { %1076 = vst [vmem:[#allocation2 + $0x38] sm:$0xff] %v1060_v17  ;;  %v1035_v22 = vadd.f32 %v1504_v18, %v1440_v15  ;;  %v1442_v23 = vpop.f32.mrf.mxu0 }
 0x158   : > { %v1443_v24 = vadd.f32 %v1442_v23, %v1441_v19  ;;  %v1506_v25 = vpop.f32.mrf.mxu1 }
 0x159   : > { %v1061_v26 = vadd.f32 %v1035_v22, %v403_v20  ;;  %v1507_v27 = vadd.f32 %v1506_v25, %v1505_v21  ;;  %v1444_v28 = vpop.f32.mrf.mxu0 }
 0x15a   : > { %v1508_v30 = vpop.f32.mrf.mxu1 }
 0x15b   : > { %1077 = vst [vmem:[#allocation2 + $0x60] sm:$0xff] %v1061_v26  ;;  %v1038_v31 = vadd.f32 %v1507_v27, %v1443_v24  ;;  %v1445_v32 = vpop.f32.mrf.mxu0 }
 0x15c   : > { %v1446_v33 = vadd.f32 %v1445_v32, %v1444_v28  ;;  %v1509_v34 = vpop.f32.mrf.mxu1 }
 0x15d   : > { %v1062_v35 = vadd.f32 %v1038_v31, %v404_v29  ;;  %v1510_v36 = vadd.f32 %v1509_v34, %v1508_v30  ;;  %v1447_v37 = vpop.f32.mrf.mxu0 }
 0x15e   : > { %v1511_v39 = vpop.f32.mrf.mxu1 }
 0x15f   : > { %1078 = vst [vmem:[#allocation2 + $0x70] sm:$0xff] %v1062_v35  ;;  %v1043_v40 = vadd.f32 %v1510_v36, %v1446_v33  ;;  %v1448_v41 = vpop.f32.mrf.mxu0 }
 0x160   : > { %v1449_v42 = vadd.f32 %v1448_v41, %v1447_v37  ;;  %v1512_v43 = vpop.f32.mrf.mxu1 }
 0x161   : > { %v1063_v44 = vadd.f32 %v1043_v40, %v405_v38  ;;  %v1513_v45 = vadd.f32 %v1512_v43, %v1511_v39 }
 0x163   : > { %1079 = vst [vmem:[#allocation2 + $0x78] sm:$0xff] %v1063_v44  ;;  %v1046_v47 = vadd.f32 %v1513_v45, %v1449_v42  ;;  %1084 = sbr.rel (%p1381_p13) target bundleno = 373 (0x175), region = 63 }
 0x165   : > { %v1064_v48 = vadd.f32 %v1046_v47, %v406_v46 }
 0x167   : > { %1080 = vst [vmem:[#allocation2 + $0x28] sm:$0xff] %v1064_v48 }
 0x168   : > { %v1085_v49 = vld [vmem:[#allocation2 + $0x30] sm:$0xff]  ;;  %v1382_v50 = vld [vmem:[%s1982_s2] ss:$0 sm:$0xff]  ;;  %v1087_v54 = vld [vmem:[#allocation2 + $0x58] sm:$0xff] }
 0x169   : > { %v1086_v51 = vld [vmem:[#allocation2] sm:$0xff]  ;;  %v1108_v52 = vadd.f32 %v1382_v50, %v1085_v49  ;;  %v1088_v55 = vld [vmem:[#allocation2 + $0x18] sm:$0xff]  ;;  %v1089_v56 = vld [vmem:[#allocation2 + $0x50] sm:$0xff]  ;;  %v1110_v57 = vadd.f32 %v1382_v50, %v1087_v54 }
 0x16a   : > { %v1109_v53 = vadd.f32 %v1382_v50, %v1086_v51  ;;  %v1111_v58 = vadd.f32 %v1382_v50, %v1088_v55  ;;  %v1112_v59 = vadd.f32 %v1382_v50, %v1089_v56  ;;  %v1090_v60 = vld [vmem:[#allocation2 + $0x68] sm:$0xff]  ;;  %v1093_v3 = vld [vmem:[#allocation2 + $0x40] sm:$0xff]  ;;  %v1095_v5 = vld [vmem:[#allocation2 + $0x10] sm:$0xff] }
 0x16b   : > { %v1091_v61 = vld [vmem:[#allocation2 + $0x8] sm:$0xff]  ;;  %v1124_v63 = vmax.f32 %v1108_v52, 0.0  ;;  %v1113_v1 = vadd.f32 %v1382_v50, %v1090_v60  ;;  %v1094_v4 = vld [vmem:[#allocation2 + $0x20] sm:$0xff]  ;;  %v1126_v6 = vmax.f32 %v1110_v57, 0.0  ;;  %v1096_v10 = vld [vmem:[#allocation2 + $0x38] sm:$0xff]  ;;  %v1116_v15 = vadd.f32 %v1382_v50, %v1093_v3 }
 0x16c   : > { %v1092_v62 = vld [vmem:[#allocation2 + $0x48] sm:$0xff]  ;;  %v1125_v0 = vmax.f32 %v1109_v53, 0.0  ;;  %v1114_v2 = vadd.f32 %v1382_v50, %v1091_v61  ;;  %v1127_v7 = vmax.f32 %v1111_v58, 0.0  ;;  %v1128_v8 = vmax.f32 %v1112_v59, 0.0  ;;  %v1097_v11 = vld [vmem:[#allocation2 + $0x60] sm:$0xff]  ;;  %v1098_v12 = vld [vmem:[#allocation2 + $0x70] sm:$0xff] }
 0x16d   : > { %v1115_v9 = vadd.f32 %v1382_v50, %v1092_v62  ;;  %1140 = vst [vmem:[%s1865_s26] sm:$0xff] %v1124_v63  ;;  %v1129_v13 = vmax.f32 %v1113_v1, 0.0  ;;  %v1117_v16 = vadd.f32 %v1382_v50, %v1094_v4  ;;  %v1099_v17 = vld [vmem:[#allocation2 + $0x78] sm:$0xff]  ;;  %1142 = vst [vmem:[%s1865_s26 + $0x10] sm:$0xff] %v1126_v6  ;;  %v1118_v20 = vadd.f32 %v1382_v50, %v1095_v5 }
 0x16e   : > { %1141 = vst [vmem:[%s1865_s26 + $0x8] sm:$0xff] %v1125_v0  ;;  %v1130_v14 = vmax.f32 %v1114_v2, 0.0  ;;  %v1100_v18 = vld [vmem:[#allocation2 + $0x28] sm:$0xff]  ;;  %1143 = vst [vmem:[%s1865_s26 + $0x18] sm:$0xff] %v1127_v7  ;;  %v1119_v21 = vadd.f32 %v1382_v50, %v1096_v10  ;;  %v1120_v22 = vadd.f32 %v1382_v50, %v1097_v11  ;;  %v1132_v23 = vmax.f32 %v1116_v15, 0.0 }
 0x16f   : > { %1144 = vst [vmem:[%s1865_s26 + $0x20] sm:$0xff] %v1128_v8  ;;  %v1131_v19 = vmax.f32 %v1115_v9, 0.0  ;;  %1145 = vst [vmem:[%s1865_s26 + $0x28] sm:$0xff] %v1129_v13  ;;  %v1133_v24 = vmax.f32 %v1117_v16, 0.0  ;;  %v1121_v25 = vadd.f32 %v1382_v50, %v1098_v12  ;;  %v1122_v26 = vadd.f32 %v1382_v50, %v1099_v17 }
 0x170   : > { %1146 = vst [vmem:[%s1865_s26 + $0x30] sm:$0xff] %v1130_v14  ;;  %v1134_v27 = vmax.f32 %v1118_v20, 0.0  ;;  %v1135_v28 = vmax.f32 %v1119_v21, 0.0  ;;  %v1136_v29 = vmax.f32 %v1120_v22, 0.0  ;;  %v1123_v30 = vadd.f32 %v1382_v50, %v1100_v18  ;;  %1148 = vst [vmem:[%s1865_s26 + $0x40] sm:$0xff] %v1132_v23 }
 0x171   : > { %1147 = vst [vmem:[%s1865_s26 + $0x38] sm:$0xff] %v1131_v19  ;;  %1149 = vst [vmem:[%s1865_s26 + $0x48] sm:$0xff] %v1133_v24  ;;  %v1137_v31 = vmax.f32 %v1121_v25, 0.0  ;;  %v1138_v32 = vmax.f32 %v1122_v26, 0.0 }
 0x172   : > { %1150 = vst [vmem:[%s1865_s26 + $0x50] sm:$0xff] %v1134_v27  ;;  %1151 = vst [vmem:[%s1865_s26 + $0x58] sm:$0xff] %v1135_v28  ;;  %v1139_v33 = vmax.f32 %v1123_v30, 0.0 }
 0x173   : > { %1152 = vst [vmem:[%s1865_s26 + $0x60] sm:$0xff] %v1136_v29  ;;  %1153 = vst [vmem:[%s1865_s26 + $0x68] sm:$0xff] %v1137_v31 }
 0x174   : > { %1154 = vst [vmem:[%s1865_s26 + $0x70] sm:$0xff] %v1138_v32  ;;  %1155 = vst [vmem:[%s1865_s26 + $0x78] sm:$0xff] %v1139_v33 }
 0x175 PF: > { %s13_s18 = sadd.s32 1, %s1705_s18   ;;  %s1984_s12 = smov %s1685_s13 }
 0x176   : > { %p10_p0 = scmp.ge.s32.totalorder %s13_s18, 10   ;;  %s1985_s13 = smov %s1779_s25 }
 0x177   : > { %s1986_s14 = smov %s1697_s16  ;;  %s1987_s15 = smov %s1701_s17 }
 0x178   : > { %s1988_s16 = smov %s1991_s19  ;;  %s1989_s17 = smov %s1995_s20 }
 0x179   :  { %12 = sbr.rel (!%p10_p0) target bundleno = 4 (0x4), region = 104 }

// kernel: vqvae_forward.13
= control target key start
LH: loop header
LB: loop body
LE: loop exit
PB: predicated region body
PF: predicated region fallthrough
CT: control target
= control target key end

     0   :  { %s2596_s12 = smov 0   ;;  %s2598_s13 = smov 0   ;;  %s3005_s0 = inlined_call_operand.vmem [shape: bf16[1,512,1152], index: 0, kind: input, shape index: {}]   ;;  %s3006_s1 = inlined_call_operand.vmem [shape: bf16[1,1152,128], index: 1, kind: input, shape index: {}]   ;;  %s3007_s2 = inlined_call_operand.vmem [shape: f32[1,128], index: 2, kind: input, shape index: {}]   ;;  %s3008_s3 = inlined_call_operand.vmem [shape: f32[1,512,128], index: 3, kind: output, shape index: {}]  }
   0x1   :  { %s2600_s14 = smov 0   ;;  %s2602_s15 = smov 0  }
   0x2   :  { %s2604_s16 = smov 0   ;;  %s2606_s17 = smov 0  }
   0x3   :  { %s2608_s18 = smov 0  }
   0x4 LB: > { %s28_s19 = sadd.s32 1, %s2565_s16  ;;  %s35_s20 = sadd.s32 1, %s2569_s17  ;;  %s2573_s18 = sphi %s2608_s18, %s13_s18   ;;  %s2569_s17 = sphi %s2606_s17, %s3014_s17   ;;  %s2565_s16 = sphi %s2604_s16, %s3013_s16   ;;  %s2561_s15 = sphi %s2602_s15, %s3012_s15   ;;  %s2557_s14 = sphi %s2600_s14, %s3011_s14   ;;  %s2553_s13 = sphi %s2598_s13, %s3010_s13   ;;  %s2549_s12 = sphi %s2596_s12, %s3009_s12  }
   0x5   : > { %p29_p0 = scmp.ge.s32.totalorder %s28_s19, 3  ;;  %p57_p1 = scmp.ne.s32.totalorder %s2553_s13, %s2549_s12 }
   0x6   : > { %p58_p2 = scmp.eq.s32.totalorder %s2573_s18, 0  ;;  %s50_s24 = sadd.s32 1, %s2553_s13 }
   0x7   : > { %s3016_s19 = smov (%p29_p0, %s28_s19), 0  ;;  %s3018_s20 = smov (!%p29_p0, %s35_s20), %s2569_s17 }
   0x8   : > { %p59_p3 = por %p58_p2, %p57_p1  ;;  %p37_p4 = scmp.ge.s32.totalorder %s3018_s20, 2 }
   0x9   : > { %s46_s21 = ssub.s32 %s2565_s16, %s3016_s19  ;;  %p1862_p6 = scmp.ge.s32.totalorder %s2573_s18, 6 }
   0xa   : > { %s3020_s20 = smov (%p37_p4, %s3018_s20), 0 }
   0xb   : > { %s44_s22 = ssub.s32 %s2569_s17, %s3020_s20  ;;  %175 = sbr.rel (%p1862_p6) target bundleno = 62 (0x3e), region = 20 }
   0xc   : > { %s47_s23 = sor.u32 %s46_s21, %s44_s22 }
   0xd   : > { %p48_p5 = scmp.eq.s32.totalorder %s47_s23, 0 }
   0xf   : > { %s2647_s25 = scalar_select %p48_p5, %s2553_s13, %s50_s24  }
  0x10   : > { %178 = sbr.rel (!%p59_p3) target bundleno = 62 (0x3e), region = 24  ;;  %s180_s26 = sand.u32 (%p59_p3), 1, %s2553_s13  }
  0x11   : > { %s184_s27 = smul.u32 (%p59_p3), 3, %s2565_s16 }
  0x12   : > { %s2243_s28 = smul.u32 (%p59_p3), 384, %s180_s26 }
  0x13   : > { %s2244_s29 = smul.u32 (%p59_p3), 288, %s2569_s17 }
  0x14   : > { %s2661_s8 = scalar_lea.vmem (%p59_p3), [#allocation3], %s2243_s28 }
  0x15   : > { %s186_s30 = sadd.s32 %s2244_s29, %s184_s27 }
  0x16   : > { %s1865_s4 = sshll.u32 %s186_s30, 2 }
  0x17   : > { %s2656_s7 = scalar_lea.vmem %s3005_s0, %s1865_s4 }
  0x18   : > { %v205_v0 = vld [vmem:[%s2656_s7] sm:$0xff]  ;;  %v209_v2 = vld [vmem:[%s2656_s7 + $0x48] sm:$0xff]  ;;  %v213_v4 = vld [vmem:[%s2656_s7 + $0x90] sm:$0xff] }
  0x19   : > { %v207_v1 = vld [vmem:[%s2656_s7 + $0x24] sm:$0xff]  ;;  %206 = vst [vmem:[%s2661_s8] sm:$0xff] %v205_v0  ;;  %210 = vst [vmem:[%s2661_s8 + $0x18] sm:$0xff] %v209_v2  ;;  %v211_v3 = vld [vmem:[%s2656_s7 + $0x6c] sm:$0xff] }
  0x1a   : > { %208 = vst [vmem:[%s2661_s8 + $0xc] sm:$0xff] %v207_v1  ;;  %v215_v5 = vld [vmem:[%s2656_s7 + $0xb4] sm:$0xff]  ;;  %212 = vst [vmem:[%s2661_s8 + $0x24] sm:$0xff] %v211_v3  ;;  %v219_v7 = vld [vmem:[%s2656_s7 + $0xfc] sm:$0xff] }
  0x1b   : > { %214 = vst [vmem:[%s2661_s8 + $0x30] sm:$0xff] %v213_v4  ;;  %216 = vst [vmem:[%s2661_s8 + $0x3c] sm:$0xff] %v215_v5  ;;  %v217_v6 = vld [vmem:[%s2656_s7 + $0xd8] sm:$0xff]  ;;  %v221_v8 = vld [vmem:[%s2656_s7 + $0x120] sm:$0xff] }
  0x1c   : > { %218 = vst [vmem:[%s2661_s8 + $0x48] sm:$0xff] %v217_v6  ;;  %220 = vst [vmem:[%s2661_s8 + $0x54] sm:$0xff] %v219_v7  ;;  %v223_v9 = vld [vmem:[%s2656_s7 + $0x144] sm:$0xff]  ;;  %v227_v11 = vld [vmem:[%s2656_s7 + $0x18c] sm:$0xff] }
  0x1d   : > { %222 = vst [vmem:[%s2661_s8 + $0x60] sm:$0xff] %v221_v8  ;;  %v225_v10 = vld [vmem:[%s2656_s7 + $0x168] sm:$0xff]  ;;  %224 = vst [vmem:[%s2661_s8 + $0x6c] sm:$0xff] %v223_v9  ;;  %v229_v12 = vld [vmem:[%s2656_s7 + $0x1b0] sm:$0xff] }
  0x1e   : > { %226 = vst [vmem:[%s2661_s8 + $0x78] sm:$0xff] %v225_v10  ;;  %228 = vst [vmem:[%s2661_s8 + $0x84] sm:$0xff] %v227_v11  ;;  %v231_v13 = vld [vmem:[%s2656_s7 + $0x1d4] sm:$0xff]  ;;  %v235_v15 = vld [vmem:[%s2656_s7 + $0x21c] sm:$0xff] }
  0x1f   : > { %v233_v14 = vld [vmem:[%s2656_s7 + $0x1f8] sm:$0xff]  ;;  %230 = vst [vmem:[%s2661_s8 + $0x90] sm:$0xff] %v229_v12  ;;  %232 = vst [vmem:[%s2661_s8 + $0x9c] sm:$0xff] %v231_v13  ;;  %v237_v16 = vld [vmem:[%s2656_s7 + $0x240] sm:$0xff] }
  0x20   : > { %234 = vst [vmem:[%s2661_s8 + $0xa8] sm:$0xff] %v233_v14  ;;  %v239_v17 = vld [vmem:[%s2656_s7 + $0x264] sm:$0xff]  ;;  %236 = vst [vmem:[%s2661_s8 + $0xb4] sm:$0xff] %v235_v15  ;;  %v243_v19 = vld [vmem:[%s2656_s7 + $0x2ac] sm:$0xff] }
  0x21   : > { %238 = vst [vmem:[%s2661_s8 + $0xc0] sm:$0xff] %v237_v16  ;;  %240 = vst [vmem:[%s2661_s8 + $0xcc] sm:$0xff] %v239_v17  ;;  %v241_v18 = vld [vmem:[%s2656_s7 + $0x288] sm:$0xff]  ;;  %v245_v20 = vld [vmem:[%s2656_s7 + $0x2d0] sm:$0xff] }
  0x22   : > { %242 = vst [vmem:[%s2661_s8 + $0xd8] sm:$0xff] %v241_v18  ;;  %244 = vst [vmem:[%s2661_s8 + $0xe4] sm:$0xff] %v243_v19  ;;  %v247_v21 = vld [vmem:[%s2656_s7 + $0x2f4] sm:$0xff]  ;;  %v251_v23 = vld [vmem:[%s2656_s7 + $0x33c] sm:$0xff] }
  0x23   : > { %246 = vst [vmem:[%s2661_s8 + $0xf0] sm:$0xff] %v245_v20  ;;  %v249_v22 = vld [vmem:[%s2656_s7 + $0x318] sm:$0xff]  ;;  %248 = vst [vmem:[%s2661_s8 + $0xfc] sm:$0xff] %v247_v21  ;;  %v253_v24 = vld [vmem:[%s2656_s7 + $0x360] sm:$0xff] }
  0x24   : > { %250 = vst [vmem:[%s2661_s8 + $0x108] sm:$0xff] %v249_v22  ;;  %252 = vst [vmem:[%s2661_s8 + $0x114] sm:$0xff] %v251_v23  ;;  %v255_v25 = vld [vmem:[%s2656_s7 + $0x384] sm:$0xff]  ;;  %v259_v27 = vld [vmem:[%s2656_s7 + $0x3cc] sm:$0xff] }
  0x25   : > { %v257_v26 = vld [vmem:[%s2656_s7 + $0x3a8] sm:$0xff]  ;;  %254 = vst [vmem:[%s2661_s8 + $0x120] sm:$0xff] %v253_v24  ;;  %256 = vst [vmem:[%s2661_s8 + $0x12c] sm:$0xff] %v255_v25  ;;  %v261_v28 = vld [vmem:[%s2656_s7 + $0x3f0] sm:$0xff] }
  0x26   : > { %258 = vst [vmem:[%s2661_s8 + $0x138] sm:$0xff] %v257_v26  ;;  %v263_v29 = vld [vmem:[%s2656_s7 + $0x414] sm:$0xff]  ;;  %260 = vst [vmem:[%s2661_s8 + $0x144] sm:$0xff] %v259_v27  ;;  %v267_v31 = vld [vmem:[%s2656_s7 + $0x45c] sm:$0xff] }
  0x27   : > { %262 = vst [vmem:[%s2661_s8 + $0x150] sm:$0xff] %v261_v28  ;;  %264 = vst [vmem:[%s2661_s8 + $0x15c] sm:$0xff] %v263_v29  ;;  %v265_v30 = vld [vmem:[%s2656_s7 + $0x438] sm:$0xff]  ;;  %v1866_v32 = vld [vmem:[%s2656_s7 + $0x8] sm:$0xf] }
  0x28   : > { %266 = vst [vmem:[%s2661_s8 + $0x168] sm:$0xff] %v265_v30  ;;  %268 = vst [vmem:[%s2661_s8 + $0x174] sm:$0xff] %v267_v31  ;;  %v1868_v33 = vld [vmem:[%s2656_s7 + $0x2c] sm:$0xf]  ;;  %v1870_v34 = vld [vmem:[%s2656_s7 + $0x50] sm:$0xf] }
  0x29   : > { %1867 = vst [vmem:[%s2661_s8 + $0x8] sm:$0xf] %v1866_v32  ;;  %v1872_v35 = vld [vmem:[%s2656_s7 + $0x74] sm:$0xf]  ;;  %1869 = vst [vmem:[%s2661_s8 + $0x14] sm:$0xf] %v1868_v33 }
  0x2a   : > { %1871 = vst [vmem:[%s2661_s8 + $0x20] sm:$0xf] %v1870_v34  ;;  %1873 = vst [vmem:[%s2661_s8 + $0x2c] sm:$0xf] %v1872_v35  ;;  %v1874_v36 = vld [vmem:[%s2656_s7 + $0x98] sm:$0xf] }
  0x2b   : > { %v1876_v37 = vld [vmem:[%s2656_s7 + $0xbc] sm:$0xf]  ;;  %v1878_v38 = vld [vmem:[%s2656_s7 + $0xe0] sm:$0xf]  ;;  %1875 = vst [vmem:[%s2661_s8 + $0x38] sm:$0xf] %v1874_v36 }
  0x2c   : > { %1877 = vst [vmem:[%s2661_s8 + $0x44] sm:$0xf] %v1876_v37  ;;  %1879 = vst [vmem:[%s2661_s8 + $0x50] sm:$0xf] %v1878_v38  ;;  %v1880_v39 = vld [vmem:[%s2656_s7 + $0x104] sm:$0xf] }
  0x2d   : > { %v1882_v40 = vld [vmem:[%s2656_s7 + $0x128] sm:$0xf]  ;;  %v1884_v41 = vld [vmem:[%s2656_s7 + $0x14c] sm:$0xf]  ;;  %1881 = vst [vmem:[%s2661_s8 + $0x5c] sm:$0xf] %v1880_v39 }
  0x2e   : > { %1883 = vst [vmem:[%s2661_s8 + $0x68] sm:$0xf] %v1882_v40  ;;  %1885 = vst [vmem:[%s2661_s8 + $0x74] sm:$0xf] %v1884_v41  ;;  %v1886_v42 = vld [vmem:[%s2656_s7 + $0x170] sm:$0xf] }
  0x2f   : > { %v1888_v43 = vld [vmem:[%s2656_s7 + $0x194] sm:$0xf]  ;;  %v1890_v44 = vld [vmem:[%s2656_s7 + $0x1b8] sm:$0xf]  ;;  %1887 = vst [vmem:[%s2661_s8 + $0x80] sm:$0xf] %v1886_v42 }
  0x30   : > { %1889 = vst [vmem:[%s2661_s8 + $0x8c] sm:$0xf] %v1888_v43  ;;  %1891 = vst [vmem:[%s2661_s8 + $0x98] sm:$0xf] %v1890_v44  ;;  %v1892_v45 = vld [vmem:[%s2656_s7 + $0x1dc] sm:$0xf] }
  0x31   : > { %v1894_v46 = vld [vmem:[%s2656_s7 + $0x200] sm:$0xf]  ;;  %v1896_v47 = vld [vmem:[%s2656_s7 + $0x224] sm:$0xf]  ;;  %1893 = vst [vmem:[%s2661_s8 + $0xa4] sm:$0xf] %v1892_v45 }
  0x32   : > { %1895 = vst [vmem:[%s2661_s8 + $0xb0] sm:$0xf] %v1894_v46  ;;  %1897 = vst [vmem:[%s2661_s8 + $0xbc] sm:$0xf] %v1896_v47  ;;  %v1898_v48 = vld [vmem:[%s2656_s7 + $0x248] sm:$0xf] }
  0x33   : > { %v1900_v49 = vld [vmem:[%s2656_s7 + $0x26c] sm:$0xf]  ;;  %v1902_v50 = vld [vmem:[%s2656_s7 + $0x290] sm:$0xf]  ;;  %1899 = vst [vmem:[%s2661_s8 + $0xc8] sm:$0xf] %v1898_v48 }
  0x34   : > { %1901 = vst [vmem:[%s2661_s8 + $0xd4] sm:$0xf] %v1900_v49  ;;  %1903 = vst [vmem:[%s2661_s8 + $0xe0] sm:$0xf] %v1902_v50  ;;  %v1904_v51 = vld [vmem:[%s2656_s7 + $0x2b4] sm:$0xf] }
  0x35   : > { %v1906_v52 = vld [vmem:[%s2656_s7 + $0x2d8] sm:$0xf]  ;;  %v1908_v53 = vld [vmem:[%s2656_s7 + $0x2fc] sm:$0xf]  ;;  %1905 = vst [vmem:[%s2661_s8 + $0xec] sm:$0xf] %v1904_v51 }
  0x36   : > { %1907 = vst [vmem:[%s2661_s8 + $0xf8] sm:$0xf] %v1906_v52  ;;  %1909 = vst [vmem:[%s2661_s8 + $0x104] sm:$0xf] %v1908_v53  ;;  %v1910_v54 = vld [vmem:[%s2656_s7 + $0x320] sm:$0xf] }
  0x37   : > { %v1912_v55 = vld [vmem:[%s2656_s7 + $0x344] sm:$0xf]  ;;  %v1914_v56 = vld [vmem:[%s2656_s7 + $0x368] sm:$0xf]  ;;  %1911 = vst [vmem:[%s2661_s8 + $0x110] sm:$0xf] %v1910_v54 }
  0x38   : > { %1913 = vst [vmem:[%s2661_s8 + $0x11c] sm:$0xf] %v1912_v55  ;;  %1915 = vst [vmem:[%s2661_s8 + $0x128] sm:$0xf] %v1914_v56  ;;  %v1916_v57 = vld [vmem:[%s2656_s7 + $0x38c] sm:$0xf] }
  0x39   : > { %v1918_v58 = vld [vmem:[%s2656_s7 + $0x3b0] sm:$0xf]  ;;  %v1920_v59 = vld [vmem:[%s2656_s7 + $0x3d4] sm:$0xf]  ;;  %1917 = vst [vmem:[%s2661_s8 + $0x134] sm:$0xf] %v1916_v57 }
  0x3a   : > { %1919 = vst [vmem:[%s2661_s8 + $0x140] sm:$0xf] %v1918_v58  ;;  %1921 = vst [vmem:[%s2661_s8 + $0x14c] sm:$0xf] %v1920_v59  ;;  %v1922_v60 = vld [vmem:[%s2656_s7 + $0x3f8] sm:$0xf] }
  0x3b   : > { %v1924_v61 = vld [vmem:[%s2656_s7 + $0x41c] sm:$0xf]  ;;  %v1926_v62 = vld [vmem:[%s2656_s7 + $0x440] sm:$0xf]  ;;  %1923 = vst [vmem:[%s2661_s8 + $0x158] sm:$0xf] %v1922_v60 }
  0x3c   : > { %1925 = vst [vmem:[%s2661_s8 + $0x164] sm:$0xf] %v1924_v61  ;;  %1927 = vst [vmem:[%s2661_s8 + $0x170] sm:$0xf] %v1926_v62  ;;  %v1928_v63 = vld [vmem:[%s2656_s7 + $0x464] sm:$0xf] }
  0x3d   : > { %1929 = vst [vmem:[%s2661_s8 + $0x17c] sm:$0xf] %v1928_v63 }
  0x3e PF: > { %p1930_p7 = scmp.ge.s32.totalorder %s2573_s18, 1  ;;  %p361_p8 = scmp.lt.s32.totalorder %s2573_s18, 7 }
  0x40   : > { %p362_p9 = pnand %p1930_p7, %p361_p8 }
  0x41   : > { %s368_s9 = sand.u32 (!%p362_p9), 1, %s2549_s12   ;;  %s415_s10 = smul.u32 (!%p362_p9), 48, %s2557_s14 }
  0x42   : > { %365 = sbr.rel (%p362_p9) target bundleno = 506 (0x1fa), region = 54  ;;  %s1932_s21 = sshll.u32 (!%p362_p9), %s2561_s15, 5 }
  0x43   : > { %s2245_s11 = smul.u32 (!%p362_p9), 384, %s368_s9  ;;  %p418_p10 = scmp.lt.s32.totalorder (!%p362_p9), %s415_s10, 143 }
  0x44   : > { %p434_p11 = scmp.lt.s32.totalorder (!%p362_p9), %s1932_s21, 63  ;;  %p1934_p12 = scmp.ne.s32.totalorder (!%p362_p9), %s2557_s14, 0 }
  0x45   : > { %s2803_s12 = scalar_lea.vmem (!%p362_p9), [#allocation3], %s2245_s11 }
  0x47   : > { %s3022_s10 = smov (!%p418_p10, %s415_s10), 143  ;;  %s3024_s21 = smov (!%p434_p11, %s1932_s21), 63 }
  0x48   : > { %s1931_s22 = sshll.u32 %s3022_s10, 2  ;;  %s1933_s27 = sshll.u32 %s3024_s21, 3 }
  0x49   : > { %s2796_s26 = scalar_lea.vmem %s3006_s1, %s1931_s22  ;;  %s2801_s30 = scalar_lea.vmem %s3008_s3, %s1933_s27 }
  0x4a   : > { %448 = sbr.rel (%p1934_p12) target bundleno = 96 (0x60), region = 62 }
  0x4f   : > { %v2575_v0 = vmov 0.0  }
  0x50   : > { %449 = vst [vmem:[#allocation2 + $0xb0] sm:$0xff] %v2575_v0  ;;  %450 = vst [vmem:[#allocation2] sm:$0xff] %v2575_v0 }
  0x51   : > { %451 = vst [vmem:[#allocation2 + $0xd8] sm:$0xff] %v2575_v0  ;;  %452 = vst [vmem:[#allocation2 + $0x18] sm:$0xff] %v2575_v0 }
  0x52   : > { %453 = vst [vmem:[#allocation2 + $0x50] sm:$0xff] %v2575_v0  ;;  %454 = vst [vmem:[#allocation2 + $0x68] sm:$0xff] %v2575_v0 }
  0x53   : > { %455 = vst [vmem:[#allocation2 + $0x30] sm:$0xff] %v2575_v0  ;;  %456 = vst [vmem:[#allocation2 + $0x48] sm:$0xff] %v2575_v0 }
  0x54   : > { %457 = vst [vmem:[#allocation2 + $0x80] sm:$0xff] %v2575_v0  ;;  %458 = vst [vmem:[#allocation2 + $0x88] sm:$0xff] %v2575_v0 }
  0x55   : > { %459 = vst [vmem:[#allocation2 + $0xe8] sm:$0xff] %v2575_v0  ;;  %460 = vst [vmem:[#allocation2 + $0xb8] sm:$0xff] %v2575_v0 }
  0x56   : > { %461 = vst [vmem:[#allocation2 + $0x60] sm:$0xff] %v2575_v0  ;;  %462 = vst [vmem:[#allocation2 + $0xf0] sm:$0xff] %v2575_v0 }
  0x57   : > { %463 = vst [vmem:[#allocation2 + $0x8] sm:$0xff] %v2575_v0  ;;  %464 = vst [vmem:[#allocation2 + $0x78] sm:$0xff] %v2575_v0 }
  0x58   : > { %465 = vst [vmem:[#allocation2 + $0x38] sm:$0xff] %v2575_v0  ;;  %466 = vst [vmem:[#allocation2 + $0x58] sm:$0xff] %v2575_v0 }
  0x59   : > { %467 = vst [vmem:[#allocation2 + $0x40] sm:$0xff] %v2575_v0  ;;  %468 = vst [vmem:[#allocation2 + $0xc8] sm:$0xff] %v2575_v0 }
  0x5a   : > { %469 = vst [vmem:[#allocation2 + $0xe0] sm:$0xff] %v2575_v0  ;;  %470 = vst [vmem:[#allocation2 + $0x90] sm:$0xff] %v2575_v0 }
  0x5b   : > { %471 = vst [vmem:[#allocation2 + $0x70] sm:$0xff] %v2575_v0  ;;  %472 = vst [vmem:[#allocation2 + $0xc0] sm:$0xff] %v2575_v0 }
  0x5c   : > { %473 = vst [vmem:[#allocation2 + $0xa8] sm:$0xff] %v2575_v0  ;;  %474 = vst [vmem:[#allocation2 + $0xd0] sm:$0xff] %v2575_v0 }
  0x5d   : > { %475 = vst [vmem:[#allocation2 + $0x10] sm:$0xff] %v2575_v0  ;;  %476 = vst [vmem:[#allocation2 + $0x28] sm:$0xff] %v2575_v0 }
  0x5e   : > { %477 = vst [vmem:[#allocation2 + $0xa0] sm:$0xff] %v2575_v0  ;;  %478 = vst [vmem:[#allocation2 + $0xf8] sm:$0xff] %v2575_v0 }
  0x5f   : > { %479 = vst [vmem:[#allocation2 + $0x20] sm:$0xff] %v2575_v0  ;;  %480 = vst [vmem:[#allocation2 + $0x98] sm:$0xff] %v2575_v0 }
  0x60 PF: > { %v2303_v1 = vld [vmem:[%s2796_s26 + $0x78] sm:$0xff]   ;;  %v2305_v3 = vld [vmem:[%s2796_s26 + $0x70] sm:$0xff]   ;;  %v2307_v5 = vld [vmem:[%s2796_s26 + $0x68] sm:$0xff]   ;;  %p2007_p13 = scmp.ne.s32.totalorder %s2557_s14, 2 }
  0x61   : > { %v2304_v2 = vld [vmem:[%s2796_s26 + $0x38] sm:$0xff]   ;;  %2043 = vmatprep.subr.bf16.mxu0 %v2303_v1  ;;  %2227 = vmatprep.subr.bf16.mxu1 %v2303_v1  ;;  %v2306_v4 = vld [vmem:[%s2796_s26 + $0x30] sm:$0xff]   ;;  %v2308_v6 = vld [vmem:[%s2796_s26 + $0x28] sm:$0xff]  }
  0x62   : > { %2044 = vmatpush3.bf16.msra.mxu0 %v2304_v2  ;;  %2235 = vmatpush3.bf16.msra.mxu1 %v2304_v2  ;;  %v2309_v7 = vld [vmem:[%s2796_s26 + $0x60] sm:$0xff]   ;;  %v2311_v9 = vld [vmem:[%s2796_s26 + $0x58] sm:$0xff]   ;;  %v2313_v11 = vld [vmem:[%s2796_s26 + $0x50] sm:$0xff]  }
  0x63   : > { %2045 = vmatprep.subr.bf16.mxu0 %v2305_v3  ;;  %2228 = vmatprep.subr.bf16.mxu1 %v2305_v3  ;;  %v2310_v8 = vld [vmem:[%s2796_s26 + $0x20] sm:$0xff]   ;;  %v2312_v10 = vld [vmem:[%s2796_s26 + $0x18] sm:$0xff]   ;;  %v2314_v14 = vld [vmem:[%s2796_s26 + $0x10] sm:$0xff]  }
  0x64   : > { %v2321_v12 = vld [vmem:[%s2803_s12 + $0x4] ss:$12 sps:$4 sm:$0xff]   ;;  %v2315_v15 = vld [vmem:[%s2796_s26 + $0x48] sm:$0xff]   ;;  %v2325_v19 = vld [vmem:[%s2796_s26 + $0xb8] sm:$0xff]  }
  0x65   : > { %v2324_v13 = vld [vmem:[%s2803_s12 + $0x124] ss:$12 sps:$4 sm:$0xff]   ;;  %1057 = vmatprep.mubr.bf16.mxu0 %v2321_v12  ;;  %v2316_v16 = vld [vmem:[%s2796_s26 + $0x8] sm:$0xff]   ;;  %v2335_v29 = vld [vmem:[%s2803_s12 + $0x34] ss:$12 sps:$4 sm:$0xff]  }
  0x66   : > { %2046 = vmatpush3.bf16.msra.mxu0 %v2306_v4  ;;  %2236 = vmatpush3.bf16.msra.mxu1 %v2306_v4  ;;  %v2317_v17 = vld [vmem:[%s2796_s26 + $0x40] sm:$0xff]   ;;  %v2327_v22 = vld [vmem:[%s2803_s12 + $0x1c] ss:$12 sps:$4 sm:$0xff]   ;;  %v2326_v23 = vld [vmem:[%s2796_s26 + $0xb0] sm:$0xff]  }
  0x67   : > { %2047 = vmatprep.subr.bf16.mxu0 %v2307_v5  ;;  %2229 = vmatprep.subr.bf16.mxu1 %v2307_v5  ;;  %v2318_v18 = vld [vmem:[%s2796_s26] sm:$0xff]   ;;  %v2329_v24 = vld [vmem:[%s2803_s12 + $0x13c] ss:$12 sps:$4 sm:$0xff]   ;;  %v2342_v34 = vld [vmem:[%s2796_s26 + $0x90] sm:$0xff]  }
  0x68   : > { %1153 = vmatprep.mubr.bf16.mxu1 %v2324_v13  ;;  %v2319_v20 = vld [vmem:[%s2803_s12] ss:$12 sps:$4 sm:$0xff]   ;;  %v2331_v25 = vld [vmem:[%s2803_s12 + $0x18] ss:$12 sps:$4 sm:$0xff]   ;;  %v2339_v32 = vld [vmem:[%s2803_s12 + $0x30] ss:$12 sps:$4 sm:$0xff]  }
  0x69   : > { %v2322_v21 = vld [vmem:[%s2803_s12 + $0x120] ss:$12 sps:$4 sm:$0xff]   ;;  %v2332_v27 = vld [vmem:[%s2803_s12 + $0x138] ss:$12 sps:$4 sm:$0xff]   ;;  %v2340_v33 = vld [vmem:[%s2803_s12 + $0x150] ss:$12 sps:$4 sm:$0xff]  }
  0x6a   : > { %2048 = vmatpush3.bf16.msra.mxu0 %v2308_v6  ;;  %2237 = vmatpush3.bf16.msra.mxu1 %v2308_v6  ;;  %v2333_v26 = vld [vmem:[%s2796_s26 + $0xa8] sm:$0xff]   ;;  %v2334_v28 = vld [vmem:[%s2796_s26 + $0xa0] sm:$0xff]   ;;  %v2341_v31 = vld [vmem:[%s2796_s26 + $0x98] sm:$0xff]  }
  0x6b   : > { %2049 = vmatprep.subr.bf16.mxu0 %v2309_v7  ;;  %2230 = vmatprep.subr.bf16.mxu1 %v2309_v7  ;;  %v2337_v30 = vld [vmem:[%s2803_s12 + $0x154] ss:$12 sps:$4 sm:$0xff]   ;;  %v2343_v35 = vld [vmem:[%s2803_s12 + $0x4c] ss:$12 sps:$4 sm:$0xff]   ;;  %v2351_v40 = vld [vmem:[%s2803_s12 + $0x64] ss:$12 sps:$4 sm:$0xff]  }
  0x6c   : > { %v2345_v36 = vld [vmem:[%s2803_s12 + $0x16c] ss:$12 sps:$4 sm:$0xff]   ;;  %v2347_v38 = vld [vmem:[%s2803_s12 + $0x48] ss:$12 sps:$4 sm:$0xff]   ;;  %v2350_v41 = vld [vmem:[%s2796_s26 + $0x80] sm:$0xff]  }
  0x6d   : > { %v2349_v37 = vld [vmem:[%s2796_s26 + $0x88] sm:$0xff]   ;;  %v2358_v46 = vld [vmem:[%s2803_s12 + $0x38] ss:$12 sps:$4 sm:$0xff]   ;;  %v2360_v48 = vld [vmem:[%s2803_s12 + $0x50] ss:$12 sps:$4 sm:$0xff]  }
  0x6e   : > { %2050 = vmatpush3.bf16.msra.mxu0 %v2310_v8  ;;  %2238 = vmatpush3.bf16.msra.mxu1 %v2310_v8  ;;  %v2348_v39 = vld [vmem:[%s2803_s12 + $0x168] ss:$12 sps:$4 sm:$0xff]   ;;  %v2354_v43 = vld [vmem:[%s2803_s12 + $0x60] ss:$12 sps:$4 sm:$0xff]   ;;  %v2359_v47 = vld [vmem:[%s2803_s12 + $0x78] ss:$12 sps:$4 sm:$0xff]  }
  0x6f   : > { %2051 = vmatprep.subr.bf16.mxu0 %v2311_v9  ;;  %2231 = vmatprep.subr.bf16.mxu1 %v2311_v9  ;;  %v2353_v42 = vld [vmem:[%s2803_s12 + $0x8] ss:$12 sps:$4 sm:$0xff]   ;;  %v2355_v44 = vld [vmem:[%s2803_s12 + $0x20] ss:$12 sps:$4 sm:$0xff]   ;;  %v2364_v51 = vld [vmem:[%s2803_s12 + $0x90] ss:$12 sps:$4 sm:$0xff]  }
  0x70   : > { %v2356_v45 = vld [vmem:[%s2803_s12 + $0x7c] ss:$12 sps:$4 sm:$0xff]   ;;  %v2361_v49 = vld [vmem:[%s2803_s12 + $0x94] ss:$12 sps:$4 sm:$0xff]   ;;  %v2366_v53 = vld [vmem:[%s2803_s12 + $0xac] ss:$12 sps:$4 sm:$0xff]  }
  0x71   : > { %v2363_v50 = vld [vmem:[%s2803_s12 + $0x68] ss:$12 sps:$4 sm:$0xff]   ;;  %v2365_v52 = vld [vmem:[%s2803_s12 + $0x80] ss:$12 sps:$4 sm:$0xff]   ;;  %v2368_v54 = vld [vmem:[%s2803_s12 + $0x98] ss:$12 sps:$4 sm:$0xff]  }
  0x72   : > { %2052 = vmatpush3.bf16.msra.mxu0 %v2312_v10  ;;  %2239 = vmatpush3.bf16.msra.mxu1 %v2312_v10  ;;  %v2369_v55 = vld [vmem:[%s2803_s12 + $0xa8] ss:$12 sps:$4 sm:$0xff]   ;;  %v2370_v56 = vld [vmem:[%s2803_s12 + $0xb0] ss:$12 sps:$4 sm:$0xff]   ;;  %v2374_v59 = vld [vmem:[%s2803_s12 + $0xc0] ss:$12 sps:$4 sm:$0xff]  }
  0x73   : > { %2053 = vmatprep.subr.bf16.mxu0 %v2313_v11  ;;  %2232 = vmatprep.subr.bf16.mxu1 %v2313_v11  ;;  %v2371_v57 = vld [vmem:[%s2803_s12 + $0xc4] ss:$12 sps:$4 sm:$0xff]   ;;  %v2373_v58 = vld [vmem:[%s2803_s12 + $0xc8] ss:$12 sps:$4 sm:$0xff]   ;;  %v2375_v60 = vld [vmem:[%s2803_s12 + $0xe0] ss:$12 sps:$4 sm:$0xff]  }
  0x74   : > { %v2376_v61 = vld [vmem:[%s2803_s12 + $0xdc] ss:$12 sps:$4 sm:$0xff]   ;;  %v2378_v62 = vld [vmem:[%s2803_s12 + $0xf8] ss:$12 sps:$4 sm:$0xff]   ;;  %v2381_v1 = vld [vmem:[%s2803_s12 + $0xf4] ss:$12 sps:$4 sm:$0xff]  }
  0x75   : > { %v2379_v63 = vld [vmem:[%s2803_s12 + $0xd8] ss:$12 sps:$4 sm:$0xff]   ;;  %v2380_v0 = vld [vmem:[%s2803_s12 + $0x110] ss:$12 sps:$4 sm:$0xff]   ;;  %v2383_v2 = vld [vmem:[%s2803_s12 + $0x128] ss:$12 sps:$4 sm:$0xff]  }
  0x76   : > { %2054 = vmatpush3.bf16.msra.mxu0 %v2314_v14  ;;  %2240 = vmatpush3.bf16.msra.mxu1 %v2314_v14  ;;  %v2384_v3 = vld [vmem:[%s2803_s12 + $0xf0] ss:$12 sps:$4 sm:$0xff]   ;;  %v2385_v4 = vld [vmem:[%s2803_s12 + $0x140] ss:$12 sps:$4 sm:$0xff]   ;;  %v2388_v6 = vld [vmem:[%s2803_s12 + $0x158] ss:$12 sps:$4 sm:$0xff]  }
  0x77   : > { %2055 = vmatprep.subr.bf16.mxu0 %v2315_v15  ;;  %2233 = vmatprep.subr.bf16.mxu1 %v2315_v15  ;;  %v2386_v5 = vld [vmem:[%s2803_s12 + $0x10c] ss:$12 sps:$4 sm:$0xff]   ;;  %v2389_v7 = vld [vmem:[%s2803_s12 + $0x108] ss:$12 sps:$4 sm:$0xff]   ;;  %v2390_v8 = vld [vmem:[%s2803_s12 + $0x170] ss:$12 sps:$4 sm:$0xff]  }
  0x7a   : > { %2056 = vmatpush3.bf16.msra.mxu0 %v2316_v16  ;;  %2241 = vmatpush3.bf16.msra.mxu1 %v2316_v16 }
  0x7b   : > { %2057 = vmatprep.subr.bf16.mxu0 %v2317_v17  ;;  %2234 = vmatprep.subr.bf16.mxu1 %v2317_v17 }
  0x7e   : > { %2058 = vmatpush3.bf16.msra.mxu0 %v2318_v18  ;;  %2242 = vmatpush3.bf16.msra.mxu1 %v2318_v18 }
  0x7f   : > { %2179 = vmatprep.subr.bf16.mxu1 %v2325_v19 }
  0x81   : > { %1058 = vmatmul.mubr.bf16.vlgmr.msra.gmra.mxu0 %v2319_v20  ;;  %1154 = vmatmul.mubr.bf16.vlgmr.msra.gmra.mxu1 %v2322_v21 }
  0x82   : > { %2180 = vmatpush3.bf16.msra.mxu1 %v2325_v19  ;;  %1065 = vmatprep.mubr.bf16.mxu0 %v2327_v22 }
  0x83   : > { %2181 = vmatprep.subr.bf16.mxu1 %v2326_v23  ;;  %1161 = vmatprep.mubr.bf16.mxu1 %v2329_v24 }
  0x86   : > { %2182 = vmatpush3.bf16.msra.mxu1 %v2326_v23 }
  0x87   : > { %2183 = vmatprep.subr.bf16.mxu1 %v2333_v26 }
  0x89   : > { %1066 = vmatmul.mubr.bf16.gmra.mxu0 %v2331_v25  ;;  %1162 = vmatmul.mubr.bf16.gmra.mxu1 %v2332_v27 }
  0x8a   : > { %2184 = vmatpush3.bf16.msra.mxu1 %v2333_v26  ;;  %1073 = vmatprep.mubr.bf16.mxu0 %v2335_v29 }
  0x8b   : > { %2185 = vmatprep.subr.bf16.mxu1 %v2334_v28  ;;  %1169 = vmatprep.mubr.bf16.mxu1 %v2337_v30 }
  0x8e   : > { %2186 = vmatpush3.bf16.msra.mxu1 %v2334_v28 }
  0x8f   : > { %2187 = vmatprep.subr.bf16.mxu1 %v2341_v31 }
  0x91   : > { %1074 = vmatmul.mubr.bf16.gmra.mxu0 %v2339_v32  ;;  %1170 = vmatmul.mubr.bf16.gmra.mxu1 %v2340_v33 }
  0x92   : > { %2188 = vmatpush3.bf16.msra.mxu1 %v2341_v31  ;;  %1081 = vmatprep.mubr.bf16.mxu0 %v2343_v35 }
  0x93   : > { %2189 = vmatprep.subr.bf16.mxu1 %v2342_v34  ;;  %1177 = vmatprep.mubr.bf16.mxu1 %v2345_v36 }
  0x96   : > { %2190 = vmatpush3.bf16.msra.mxu1 %v2342_v34 }
  0x97   : > { %2191 = vmatprep.subr.bf16.mxu1 %v2349_v37 }
  0x99   : > { %1082 = vmatmul.mubr.bf16.gmra.mxu0 %v2347_v38  ;;  %1178 = vmatmul.mubr.bf16.gmra.mxu1 %v2348_v39 }
  0x9a   : > { %2192 = vmatpush3.bf16.msra.mxu1 %v2349_v37  ;;  %1089 = vmatprep.mubr.bf16.mxu0 %v2351_v40 }
  0x9b   : > { %2193 = vmatprep.subr.bf16.mxu1 %v2350_v41  ;;  %2195 = vmatprep.mubr.bf16.mxu1 %v2353_v42 }
  0x9e   : > { %2194 = vmatpush3.bf16.msra.mxu1 %v2350_v41 }
  0xa1   : > { %1090 = vmatmul.mubr.bf16.gmra.mxu0 %v2354_v43  ;;  %2196 = vmatmul.mubr.bf16.vlgmr.msra.gmra.mxu1 %v2355_v44 }
  0xa2   : > { %1097 = vmatprep.mubr.bf16.mxu0 %v2356_v45  ;;  %2199 = vmatprep.mubr.bf16.mxu1 %v2358_v46 }
  0xa9   : > { %1098 = vmatmul.mubr.bf16.gmra.mxu0 %v2359_v47  ;;  %2200 = vmatmul.mubr.bf16.gmra.mxu1 %v2360_v48 }
  0xaa   : > { %1105 = vmatprep.mubr.bf16.mxu0 %v2361_v49  ;;  %2203 = vmatprep.mubr.bf16.mxu1 %v2363_v50  ;;  %v483_v49 = vld [vmem:[#allocation2 + $0xd8] sm:$0xff] }
  0xb1   : > { %1106 = vmatmul.mubr.bf16.gmra.mxu0 %v2364_v51  ;;  %2204 = vmatmul.mubr.bf16.gmra.mxu1 %v2365_v52 }
  0xb2   : > { %1113 = vmatprep.mubr.bf16.mxu0 %v2366_v53  ;;  %2207 = vmatprep.mubr.bf16.mxu1 %v2368_v54  ;;  %v481_v54 = vld [vmem:[#allocation2 + $0xb0] sm:$0xff] }
  0xb9   : > { %1114 = vmatmul.mubr.bf16.gmra.mxu0 %v2369_v55  ;;  %2208 = vmatmul.mubr.bf16.gmra.mxu1 %v2370_v56 }
  0xba   : > { %1121 = vmatprep.mubr.bf16.mxu0 %v2371_v57  ;;  %2211 = vmatprep.mubr.bf16.mxu1 %v2373_v58 }
  0xc1   : > { %1122 = vmatmul.mubr.bf16.gmra.mxu0 %v2374_v59  ;;  %2212 = vmatmul.mubr.bf16.gmra.mxu1 %v2375_v60  ;;  %v484_v60 = vld [vmem:[#allocation2 + $0x18] sm:$0xff] }
  0xc2   : > { %1129 = vmatprep.mubr.bf16.mxu0 %v2376_v61  ;;  %2215 = vmatprep.mubr.bf16.mxu1 %v2378_v62 }
  0xc9   : > { %1130 = vmatmul.mubr.bf16.gmra.mxu0 %v2379_v63  ;;  %2216 = vmatmul.mubr.bf16.gmra.mxu1 %v2380_v0 }
  0xca   : > { %1137 = vmatprep.mubr.bf16.mxu0 %v2381_v1  ;;  %2219 = vmatprep.mubr.bf16.mxu1 %v2383_v2  ;;  %v482_v2 = vld [vmem:[#allocation2] sm:$0xff] }
  0xd1   : > { %1138 = vmatmul.mubr.bf16.gmra.mxu0 %v2384_v3  ;;  %2220 = vmatmul.mubr.bf16.gmra.mxu1 %v2385_v4 }
  0xd2   : > { %1145 = vmatprep.mubr.bf16.mxu0 %v2386_v5  ;;  %2223 = vmatprep.mubr.bf16.mxu1 %v2388_v6 }
  0xd9   : > { %1146 = vmatmul.mubr.bf16.gmra.mxu0 %v2389_v7  ;;  %2224 = vmatmul.mubr.bf16.gmra.mxu1 %v2390_v8  ;;  %v487_v8 = vld [vmem:[#allocation2 + $0x30] sm:$0xff] }
 0x141   : > { %v2059_v9 = vpop.f32.mrf.mxu0  ;;  %v2131_v10 = vpop.f32.mrf.mxu1 }
 0x143   : > { %v2060_v11 = vpop.f32.mrf.mxu0  ;;  %v2132_v12 = vpop.f32.mrf.mxu1 }
 0x144   : > { %v2878_v13 = vadd.f32 %v2132_v12, %v2131_v10  ;;  %v2061_v51 = vadd.f32 %v2060_v11, %v2059_v9 }
 0x145   : > { %v2062_v14 = vpop.f32.mrf.mxu0  ;;  %v2134_v15 = vpop.f32.mrf.mxu1 }
 0x147   : > { %v2063_v16 = vpop.f32.mrf.mxu0  ;;  %v2135_v17 = vpop.f32.mrf.mxu1 }
 0x148   : > { %v2880_v18 = vadd.f32 %v2135_v17, %v2134_v15  ;;  %v2064_v62 = vadd.f32 %v2063_v16, %v2062_v14  ;;  %v485_v17 = vld [vmem:[#allocation2 + $0x50] sm:$0xff] }
 0x149   : > { %v2065_v19 = vpop.f32.mrf.mxu0  ;;  %v2137_v20 = vpop.f32.mrf.mxu1 }
 0x14b   : > { %v2066_v21 = vpop.f32.mrf.mxu0  ;;  %v2138_v22 = vpop.f32.mrf.mxu1 }
 0x14c   : > { %v2882_v23 = vadd.f32 %v2138_v22, %v2137_v20  ;;  %v2067_v47 = vadd.f32 %v2066_v21, %v2065_v19  ;;  %v488_v22 = vld [vmem:[#allocation2 + $0x48] sm:$0xff] }
 0x14d   : > { %v2068_v24 = vpop.f32.mrf.mxu0  ;;  %v2140_v25 = vpop.f32.mrf.mxu1 }
 0x14f   : > { %v2069_v26 = vpop.f32.mrf.mxu0  ;;  %v2141_v27 = vpop.f32.mrf.mxu1 }
 0x150   : > { %v2884_v28 = vadd.f32 %v2141_v27, %v2140_v25  ;;  %v2070_v56 = vadd.f32 %v2069_v26, %v2068_v24 }
 0x151   : > { %v2071_v29 = vpop.f32.mrf.mxu0  ;;  %v2143_v30 = vpop.f32.mrf.mxu1 }
 0x153   : > { %v2072_v31 = vpop.f32.mrf.mxu0  ;;  %v2144_v32 = vpop.f32.mrf.mxu1 }
 0x154   : > { %v2886_v33 = vadd.f32 %v2144_v32, %v2143_v30  ;;  %v2073_v10 = vadd.f32 %v2072_v31, %v2071_v29  ;;  %v486_v32 = vld [vmem:[#allocation2 + $0x68] sm:$0xff] }
 0x155   : > { %v2074_v34 = vpop.f32.mrf.mxu0  ;;  %v2146_v35 = vpop.f32.mrf.mxu1 }
 0x157   : > { %v2075_v36 = vpop.f32.mrf.mxu0  ;;  %v2147_v37 = vpop.f32.mrf.mxu1 }
 0x158   : > { %v2888_v38 = vadd.f32 %v2147_v37, %v2146_v35  ;;  %v2076_v25 = vadd.f32 %v2075_v36, %v2074_v34 }
 0x159   : > { %v2077_v39 = vpop.f32.mrf.mxu0  ;;  %v2890_v40 = vpop.f32.mrf.mxu1 }
 0x15b   : > { %v2078_v41 = vpop.f32.mrf.mxu0  ;;  %v2892_v42 = vpop.f32.mrf.mxu1 }
 0x15c   : > { %v2079_v4 = vadd.f32 %v2078_v41, %v2077_v39  ;;  %v491_v41 = vld [vmem:[#allocation2 + $0xe8] sm:$0xff] }
 0x15d   : > { %v2080_v43 = vpop.f32.mrf.mxu0  ;;  %v2894_v44 = vpop.f32.mrf.mxu1 }
 0x15f   : > { %v2081_v45 = vpop.f32.mrf.mxu0  ;;  %v2896_v46 = vpop.f32.mrf.mxu1 }
 0x160   : > { %v2082_v16 = vadd.f32 %v2081_v45, %v2080_v43 }
 0x161   : > { %v2083_v48 = vpop.f32.mrf.mxu0  ;;  %v2197_v50 = vpop.f32.mrf.mxu1 }
 0x162   : > { %v1229_v52 = vadd.f32 %v2197_v50, %v2067_v47 }
 0x163   : > { %v2084_v53 = vpop.f32.mrf.mxu0  ;;  %v1220_v55 = vpop.f32.mrf.mxu1 }
 0x164   : > { %v1349_v57 = vadd.f32 %v1229_v52, %v483_v49  ;;  %v1221_v58 = vadd.f32 %v2061_v51, %v1220_v55  ;;  %v2085_v45 = vadd.f32 %v2084_v53, %v2083_v48  ;;  %v489_v51 = vld [vmem:[#allocation2 + $0x80] sm:$0xff] }
 0x165   : > { %v2086_v59 = vpop.f32.mrf.mxu0  ;;  %v2198_v61 = vpop.f32.mrf.mxu1 }
 0x166   : > { %1381 = vst [vmem:[#allocation2 + $0xd8] sm:$0xff] %v1349_v57  ;;  %v1347_v63 = vadd.f32 %v1221_v58, %v481_v54  ;;  %v1232_v0 = vadd.f32 %v2198_v61, %v2070_v56  ;;  %v492_v56 = vld [vmem:[#allocation2 + $0xb8] sm:$0xff] }
 0x167   : > { %v2087_v1 = vpop.f32.mrf.mxu0  ;;  %v1223_v3 = vpop.f32.mrf.mxu1 }
 0x168   : > { %1379 = vst [vmem:[#allocation2 + $0xb0] sm:$0xff] %v1347_v63  ;;  %v1350_v5 = vadd.f32 %v1232_v0, %v484_v60  ;;  %v1224_v6 = vadd.f32 %v2064_v62, %v1223_v3  ;;  %v2088_v58 = vadd.f32 %v2087_v1, %v2086_v59  ;;  %v490_v63 = vld [vmem:[#allocation2 + $0x88] sm:$0xff] }
 0x169   : > { %v2089_v7 = vpop.f32.mrf.mxu0  ;;  %v2201_v9 = vpop.f32.mrf.mxu1  ;;  %v495_v1 = vld [vmem:[#allocation2 + $0x8] sm:$0xff] }
 0x16a   : > { %1382 = vst [vmem:[#allocation2 + $0x18] sm:$0xff] %v1350_v5  ;;  %v1348_v11 = vadd.f32 %v1224_v6, %v482_v2  ;;  %v1245_v12 = vadd.f32 %v2201_v9, %v2079_v4 }
 0x16b   : > { %v2090_v15 = vpop.f32.mrf.mxu0  ;;  %v1236_v14 = vpop.f32.mrf.mxu1 }
 0x16c   : > { %1380 = vst [vmem:[#allocation2] sm:$0xff] %v1348_v11  ;;  %v1353_v19 = vadd.f32 %v1245_v12, %v487_v8  ;;  %v1237_v20 = vadd.f32 %v2073_v10, %v1236_v14  ;;  %v2091_v31 = vadd.f32 %v2090_v15, %v2089_v7  ;;  %v493_v7 = vld [vmem:[#allocation2 + $0x60] sm:$0xff] }
 0x16d   : > { %v2092_v21 = vpop.f32.mrf.mxu0  ;;  %v2202_v24 = vpop.f32.mrf.mxu1 }
 0x16e   : > { %1385 = vst [vmem:[#allocation2 + $0x30] sm:$0xff] %v1353_v19  ;;  %v1351_v26 = vadd.f32 %v1237_v20, %v485_v17  ;;  %v1248_v27 = vadd.f32 %v2202_v24, %v2082_v16  ;;  %v494_v16 = vld [vmem:[#allocation2 + $0xf0] sm:$0xff]  ;;  %v496_v24 = vld [vmem:[#allocation2 + $0x78] sm:$0xff] }
 0x16f   : > { %v2093_v30 = vpop.f32.mrf.mxu0  ;;  %v1239_v29 = vpop.f32.mrf.mxu1 }
 0x170   : > { %1383 = vst [vmem:[#allocation2 + $0x50] sm:$0xff] %v1351_v26  ;;  %v1354_v35 = vadd.f32 %v1248_v27, %v488_v22  ;;  %v1240_v37 = vadd.f32 %v2076_v25, %v1239_v29  ;;  %v2094_v36 = vadd.f32 %v2093_v30, %v2092_v21 }
 0x171   : > { %v2095_v39 = vpop.f32.mrf.mxu0  ;;  %v2205_v43 = vpop.f32.mrf.mxu1 }
 0x172   : > { %1386 = vst [vmem:[#allocation2 + $0x48] sm:$0xff] %v1354_v35  ;;  %v1352_v47 = vadd.f32 %v1240_v37, %v486_v32  ;;  %v1261_v49 = vadd.f32 %v2205_v43, %v2091_v31  ;;  %v497_v37 = vld [vmem:[#allocation2 + $0x38] sm:$0xff] }
 0x173   : > { %v2096_v50 = vpop.f32.mrf.mxu0  ;;  %v1252_v34 = vpop.f32.mrf.mxu1 }
 0x174   : > { %1384 = vst [vmem:[#allocation2 + $0x68] sm:$0xff] %v1352_v47  ;;  %v1357_v52 = vadd.f32 %v1261_v49, %v491_v41  ;;  %v1253_v54 = vadd.f32 %v2085_v45, %v1252_v34  ;;  %v2097_v4 = vadd.f32 %v2096_v50, %v2095_v39 }
 0x175   : > { %v2098_v55 = vpop.f32.mrf.mxu0  ;;  %v2206_v57 = vpop.f32.mrf.mxu1 }
 0x176   : > { %1389 = vst [vmem:[#allocation2 + $0xe8] sm:$0xff] %v1357_v52  ;;  %v1355_v60 = vadd.f32 %v1253_v54, %v489_v51  ;;  %v1264_v61 = vadd.f32 %v2206_v57, %v2094_v36  ;;  %v498_v51 = vld [vmem:[#allocation2 + $0x58] sm:$0xff] }
 0x177   : > { %v2099_v62 = vpop.f32.mrf.mxu0  ;;  %v1255_v48 = vpop.f32.mrf.mxu1 }
 0x178   : > { %1387 = vst [vmem:[#allocation2 + $0x80] sm:$0xff] %v1355_v60  ;;  %v1358_v53 = vadd.f32 %v1264_v61, %v492_v56  ;;  %v1256_v0 = vadd.f32 %v2088_v58, %v1255_v48  ;;  %v2100_v12 = vadd.f32 %v2099_v62, %v2098_v55  ;;  %v499_v58 = vld [vmem:[#allocation2 + $0x40] sm:$0xff] }
 0x179   : > { %v2101_v2 = vpop.f32.mrf.mxu0  ;;  %v2209_v3 = vpop.f32.mrf.mxu1 }
 0x17a   : > { %1390 = vst [vmem:[#allocation2 + $0xb8] sm:$0xff] %v1358_v53  ;;  %v1356_v5 = vadd.f32 %v1256_v0, %v490_v63 }
 0x17b   : > { %v2102_v6 = vpop.f32.mrf.mxu0  ;;  %v1268_v8 = vpop.f32.mrf.mxu1 }
 0x17c   : > { %1388 = vst [vmem:[#allocation2 + $0x88] sm:$0xff] %v1356_v5  ;;  %v2103_v9 = vadd.f32 %v2102_v6, %v2101_v2  ;;  %v1269_v59 = vadd.f32 %v2097_v4, %v1268_v8  ;;  %v500_v2 = vld [vmem:[#allocation2 + $0xc8] sm:$0xff]  ;;  %v507_v4 = vld [vmem:[#allocation2 + $0x10] sm:$0xff] }
 0x17d   : > { %v2104_v10 = vpop.f32.mrf.mxu0  ;;  %v2210_v11 = vpop.f32.mrf.mxu1 }
 0x17e   : > { %v1277_v15 = vadd.f32 %v2209_v3, %v2103_v9  ;;  %v1359_v17 = vadd.f32 %v1269_v59, %v493_v7  ;;  %v505_v9 = vld [vmem:[#allocation2 + $0xa8] sm:$0xff] }
 0x17f   : > { %v2105_v14 = vpop.f32.mrf.mxu0  ;;  %v1271_v19 = vpop.f32.mrf.mxu1 }
 0x180   : > { %v1361_v20 = vadd.f32 %v1277_v15, %v495_v1  ;;  %1391 = vst [vmem:[#allocation2 + $0x60] sm:$0xff] %v1359_v17  ;;  %v2106_v21 = vadd.f32 %v2105_v14, %v2104_v10  ;;  %v1272_v22 = vadd.f32 %v2100_v12, %v1271_v19  ;;  %v501_v15 = vld [vmem:[#allocation2 + $0xe0] sm:$0xff]  ;;  %v508_v14 = vld [vmem:[#allocation2 + $0x28] sm:$0xff] }
 0x181   : > { %v2107_v25 = vpop.f32.mrf.mxu0  ;;  %v2213_v26 = vpop.f32.mrf.mxu1 }
 0x182   : > { %1393 = vst [vmem:[#allocation2 + $0x8] sm:$0xff] %v1361_v20  ;;  %v1280_v27 = vadd.f32 %v2210_v11, %v2106_v21  ;;  %v1360_v30 = vadd.f32 %v1272_v22, %v494_v16 }
 0x183   : > { %v2108_v32 = vpop.f32.mrf.mxu0  ;;  %v1284_v29 = vpop.f32.mrf.mxu1 }
 0x184   : > { %v1362_v31 = vadd.f32 %v1280_v27, %v496_v24  ;;  %1392 = vst [vmem:[#allocation2 + $0xf0] sm:$0xff] %v1360_v30  ;;  %v2109_v35 = vadd.f32 %v2108_v32, %v2107_v25  ;;  %v506_v24 = vld [vmem:[#allocation2 + $0xd0] sm:$0xff] }
 0x185   : > { %v2110_v39 = vpop.f32.mrf.mxu0  ;;  %v2214_v41 = vpop.f32.mrf.mxu1  ;;  %v502_v32 = vld [vmem:[#allocation2 + $0x90] sm:$0xff] }
 0x186   : > { %1394 = vst [vmem:[#allocation2 + $0x78] sm:$0xff] %v1362_v31  ;;  %v1285_v43 = vadd.f32 %v2109_v35, %v1284_v29  ;;  %v511_v31 = vld [vmem:[#allocation2 + $0x20] sm:$0xff] }
 0x187   : > { %v2111_v45 = vpop.f32.mrf.mxu0  ;;  %v1287_v47 = vpop.f32.mrf.mxu1 }
 0x188   : > { %v1363_v49 = vadd.f32 %v1285_v43, %v497_v37  ;;  %v2112_v50 = vadd.f32 %v2111_v45, %v2110_v39 }
 0x189   : > { %v2113_v34 = vpop.f32.mrf.mxu0  ;;  %v2898_v36 = vpop.f32.mrf.mxu1 }
 0x18a   : > { %1395 = vst [vmem:[#allocation2 + $0x38] sm:$0xff] %v1363_v49  ;;  %v1288_v52 = vadd.f32 %v2112_v50, %v1287_v47  ;;  %v503_v50 = vld [vmem:[#allocation2 + $0x70] sm:$0xff] }
 0x18b   : > { %v2114_v54 = vpop.f32.mrf.mxu0  ;;  %v1300_v55 = vpop.f32.mrf.mxu1 }
 0x18c   : > { %v1364_v56 = vadd.f32 %v1288_v52, %v498_v51  ;;  %v2115_v57 = vadd.f32 %v2114_v54, %v2113_v34  ;;  %v512_v34 = vld [vmem:[#allocation2 + $0x98] sm:$0xff] }
 0x18d   : > { %v2116_v60 = vpop.f32.mrf.mxu0  ;;  %v2900_v61 = vpop.f32.mrf.mxu1 }
 0x18e   : > { %1396 = vst [vmem:[#allocation2 + $0x58] sm:$0xff] %v1364_v56  ;;  %v1293_v62 = vadd.f32 %v2213_v26, %v2115_v57 }
 0x18f   : > { %v2117_v63 = vpop.f32.mrf.mxu0  ;;  %v1303_v48 = vpop.f32.mrf.mxu1 }
 0x190   : > { %v1365_v53 = vadd.f32 %v1293_v62, %v499_v58  ;;  %v2118_v0 = vadd.f32 %v2117_v63, %v2116_v60 }
 0x191   : > { %v2119_v3 = vpop.f32.mrf.mxu0  ;;  %v2221_v5 = vpop.f32.mrf.mxu1 }
 0x192   : > { %1397 = vst [vmem:[#allocation2 + $0x40] sm:$0xff] %v1365_v53  ;;  %v1296_v6 = vadd.f32 %v2214_v41, %v2118_v0  ;;  %v1325_v7 = vadd.f32 %v2221_v5, %v2882_v23  ;;  %v2151_v23 = vadd.f32 %v2892_v42, %v2890_v40  ;;  %v2154_v40 = vadd.f32 %v2896_v46, %v2894_v44  ;;  %v509_v41 = vld [vmem:[#allocation2 + $0xa0] sm:$0xff]  ;;  %v510_v46 = vld [vmem:[#allocation2 + $0xf8] sm:$0xff] }
 0x193   : > { %v2120_v8 = vpop.f32.mrf.mxu0  ;;  %v1316_v59 = vpop.f32.mrf.mxu1 }
 0x194   : > { %v1366_v1 = vadd.f32 %v1296_v6, %v500_v2  ;;  %v1373_v10 = vadd.f32 %v1325_v7, %v507_v4  ;;  %v2121_v11 = vadd.f32 %v2120_v8, %v2119_v3  ;;  %v1317_v12 = vadd.f32 %v2878_v13, %v1316_v59 }
 0x195   : > { %v2122_v17 = vpop.f32.mrf.mxu0  ;;  %v2222_v16 = vpop.f32.mrf.mxu1 }
 0x196   : > { %1398 = vst [vmem:[#allocation2 + $0xc8] sm:$0xff] %v1366_v1  ;;  %1405 = vst [vmem:[#allocation2 + $0x10] sm:$0xff] %v1373_v10  ;;  %v1301_v19 = vadd.f32 %v2121_v11, %v1300_v55  ;;  %v1371_v20 = vadd.f32 %v1317_v12, %v505_v9  ;;  %v1328_v21 = vadd.f32 %v2222_v16, %v2884_v28 }
 0x197   : > { %v2123_v22 = vpop.f32.mrf.mxu0  ;;  %v1319_v25 = vpop.f32.mrf.mxu1 }
 0x198   : > { %v1367_v26 = vadd.f32 %v1301_v19, %v501_v15  ;;  %1403 = vst [vmem:[#allocation2 + $0xa8] sm:$0xff] %v1371_v20  ;;  %v1374_v27 = vadd.f32 %v1328_v21, %v508_v14  ;;  %v2124_v13 = vadd.f32 %v2123_v22, %v2122_v17  ;;  %v1320_v30 = vadd.f32 %v2880_v18, %v1319_v25 }
 0x199   : > { %v2125_v29 = vpop.f32.mrf.mxu0  ;;  %v2225_v35 = vpop.f32.mrf.mxu1 }
 0x19a   : > { %1399 = vst [vmem:[#allocation2 + $0xe0] sm:$0xff] %v1367_v26  ;;  %1406 = vst [vmem:[#allocation2 + $0x28] sm:$0xff] %v1374_v27  ;;  %v1304_v37 = vadd.f32 %v2124_v13, %v1303_v48  ;;  %v1372_v28 = vadd.f32 %v1320_v30, %v506_v24  ;;  %v1341_v39 = vadd.f32 %v2225_v35, %v2151_v23 }
 0x19b   : > { %v2126_v42 = vpop.f32.mrf.mxu0  ;;  %v1332_v43 = vpop.f32.mrf.mxu1 }
 0x19c   : > { %v1368_v45 = vadd.f32 %v1304_v37, %v502_v32  ;;  %1404 = vst [vmem:[#allocation2 + $0xd0] sm:$0xff] %v1372_v28  ;;  %v1377_v47 = vadd.f32 %v1341_v39, %v511_v31  ;;  %v2127_v49 = vadd.f32 %v2126_v42, %v2125_v29  ;;  %v1333_v18 = vadd.f32 %v2886_v33, %v1332_v43  ;;  %v504_v33 = vld [vmem:[#allocation2 + $0xc0] sm:$0xff] }
 0x19d   : > { %v2128_v51 = vpop.f32.mrf.mxu0  ;;  %v2226_v52 = vpop.f32.mrf.mxu1 }
 0x19e   : > { %1400 = vst [vmem:[#allocation2 + $0x90] sm:$0xff] %v1368_v45  ;;  %1409 = vst [vmem:[#allocation2 + $0x20] sm:$0xff] %v1377_v47  ;;  %v1309_v54 = vadd.f32 %v2898_v36, %v2127_v49  ;;  %v1375_v55 = vadd.f32 %v1333_v18, %v509_v41  ;;  %v1344_v56 = vadd.f32 %v2226_v52, %v2154_v40 }
 0x19f   : > { %v2129_v44 = vpop.f32.mrf.mxu0  ;;  %v1335_v57 = vpop.f32.mrf.mxu1 }
 0x1a0   : > { %v1369_v58 = vadd.f32 %v1309_v54, %v503_v50  ;;  %1407 = vst [vmem:[#allocation2 + $0xa0] sm:$0xff] %v1375_v55  ;;  %v1378_v60 = vadd.f32 %v1344_v56, %v512_v34  ;;  %v2130_v62 = vadd.f32 %v2129_v44, %v2128_v51  ;;  %v1336_v63 = vadd.f32 %v2888_v38, %v1335_v57 }
 0x1a2   : > { %1401 = vst [vmem:[#allocation2 + $0x70] sm:$0xff] %v1369_v58  ;;  %1410 = vst [vmem:[#allocation2 + $0x98] sm:$0xff] %v1378_v60  ;;  %v1312_v48 = vadd.f32 %v2900_v61, %v2130_v62  ;;  %v1376_v53 = vadd.f32 %v1336_v63, %v510_v46  ;;  %1414 = sbr.rel (%p2007_p13) target bundleno = 506 (0x1fa), region = 66 }
 0x1a4   : > { %v1370_v0 = vadd.f32 %v1312_v48, %v504_v33  ;;  %1408 = vst [vmem:[#allocation2 + $0xf8] sm:$0xff] %v1376_v53 }
 0x1a6   : > { %1402 = vst [vmem:[#allocation2 + $0xc0] sm:$0xff] %v1370_v0 }
 0x1a7   : > { %v1415_v36 = vld [vmem:[#allocation2 + $0xb0] sm:$0xff]  ;;  %v2918_v2 = vld [vmem:[%s3007_s2] ss:$0 sm:$0xff]  ;;  %v1417_v5 = vld [vmem:[#allocation2 + $0xd8] sm:$0xff] }
 0x1a8   : > { %v1416_v3 = vld [vmem:[#allocation2] sm:$0xff]  ;;  %v1454_v38 = vadd.f32 %v2918_v2, %v1415_v36  ;;  %v1418_v61 = vld [vmem:[#allocation2 + $0x18] sm:$0xff]  ;;  %v1419_v6 = vld [vmem:[#allocation2 + $0x50] sm:$0xff]  ;;  %v1456_v7 = vadd.f32 %v2918_v2, %v1417_v5 }
 0x1a9   : > { %v1455_v4 = vadd.f32 %v2918_v2, %v1416_v3  ;;  %v1457_v8 = vadd.f32 %v2918_v2, %v1418_v61  ;;  %v1458_v9 = vadd.f32 %v2918_v2, %v1419_v6  ;;  %v1420_v59 = vld [vmem:[#allocation2 + $0x68] sm:$0xff]  ;;  %v1421_v1 = vld [vmem:[#allocation2 + $0x30] sm:$0xff]  ;;  %v1423_v14 = vld [vmem:[#allocation2 + $0x80] sm:$0xff] }
 0x1aa   : > { %v1422_v10 = vld [vmem:[#allocation2 + $0x48] sm:$0xff]  ;;  %v2009_v11 = vmul.f32 -1.442695, %v1454_v38  ;;  %v1459_v15 = vadd.f32 %v2918_v2, %v1420_v59  ;;  %v1460_v17 = vadd.f32 %v2918_v2, %v1421_v1  ;;  %v2011_v19 = vmul.f32 -1.442695, %v1456_v7  ;;  %v1426_v25 = vld [vmem:[#allocation2 + $0xb8] sm:$0xff] }
 0x1ab   : > { %v2010_v12 = vmul.f32 -1.442695, %v1455_v4  ;;  %v1424_v16 = vld [vmem:[#allocation2 + $0x88] sm:$0xff]  ;;  %v2012_v20 = vmul.f32 -1.442695, %v1457_v8  ;;  %v1461_v21 = vadd.f32 %v2918_v2, %v1422_v10  ;;  %v1462_v22 = vadd.f32 %v2918_v2, %v1423_v14  ;;  %v1427_v13 = vld [vmem:[#allocation2 + $0x60] sm:$0xff] }
 0x1ac   : > { %2391 = vpow2.f32 %v2009_v11  ;;  %v2013_v23 = vmul.f32 -1.442695, %v1458_v9  ;;  %v1425_v24 = vld [vmem:[#allocation2 + $0xe8] sm:$0xff]  ;;  %v2014_v26 = vmul.f32 -1.442695, %v1459_v15  ;;  %v1463_v27 = vadd.f32 %v2918_v2, %v1424_v16  ;;  %v1428_v29 = vld [vmem:[#allocation2 + $0xf0] sm:$0xff] }
 0x1ad   : > { %2393 = vpow2.f32 %v2010_v12  ;;  %v2015_v30 = vmul.f32 -1.442695, %v1460_v17  ;;  %v1464_v32 = vadd.f32 %v2918_v2, %v1425_v24  ;;  %v2016_v31 = vmul.f32 -1.442695, %v1461_v21  ;;  %v1429_v37 = vld [vmem:[#allocation2 + $0x8] sm:$0xff]  ;;  %v1430_v40 = vld [vmem:[#allocation2 + $0x78] sm:$0xff] }
 0x1ae   : > { %2395 = vpow2.f32 %v2011_v19  ;;  %v1465_v35 = vadd.f32 %v2918_v2, %v1426_v25  ;;  %v2017_v28 = vmul.f32 -1.442695, %v1462_v22  ;;  %v1466_v39 = vadd.f32 %v2918_v2, %v1427_v13  ;;  %v1431_v38 = vld [vmem:[#allocation2 + $0x38] sm:$0xff]  ;;  %v1433_v8 = vld [vmem:[#allocation2 + $0x40] sm:$0xff]  ;;  %v1434_v10 = vld [vmem:[#allocation2 + $0xc8] sm:$0xff] }
 0x1af   : > { %2397 = vpow2.f32 %v2012_v20  ;;  %v2018_v42 = vmul.f32 -1.442695, %v1463_v27  ;;  %v1467_v41 = vadd.f32 %v2918_v2, %v1428_v29  ;;  %v2019_v43 = vmul.f32 -1.442695, %v1464_v32  ;;  %v1432_v61 = vld [vmem:[#allocation2 + $0x58] sm:$0xff]  ;;  %v1435_v17 = vld [vmem:[#allocation2 + $0xe0] sm:$0xff] }
 0x1b0   : > { %2399 = vpow2.f32 %v2013_v23  ;;  %v1468_v45 = vadd.f32 %v2918_v2, %v1429_v37  ;;  %v2020_v47 = vmul.f32 -1.442695, %v1465_v35  ;;  %v1469_v49 = vadd.f32 %v2918_v2, %v1430_v40  ;;  %v1436_v20 = vld [vmem:[#allocation2 + $0x90] sm:$0xff]  ;;  %v1439_v37 = vld [vmem:[#allocation2 + $0xa8] sm:$0xff] }
 0x1b1   : > { %2401 = vpow2.f32 %v2014_v26  ;;  %v2021_v18 = vmul.f32 -1.442695, %v1466_v39  ;;  %v2022_v50 = vmul.f32 -1.442695, %v1467_v41  ;;  %v1470_v1 = vadd.f32 %v2918_v2, %v1431_v38  ;;  %v1437_v24 = vld [vmem:[#allocation2 + $0x70] sm:$0xff] }
 0x1b2   : > { %2403 = vpow2.f32 %v2015_v30  ;;  %v2023_v51 = vmul.f32 -1.442695, %v1468_v45  ;;  %v2024_v34 = vmul.f32 -1.442695, %v1469_v49  ;;  %v1471_v15 = vadd.f32 %v2918_v2, %v1432_v61  ;;  %v1438_v30 = vld [vmem:[#allocation2 + $0xc0] sm:$0xff] }
 0x1b3   : > { %2405 = vpow2.f32 %v2016_v31  ;;  %v1472_v19 = vadd.f32 %v2918_v2, %v1433_v8  ;;  %v1473_v22 = vadd.f32 %v2918_v2, %v1434_v10  ;;  %v2025_v27 = vmul.f32 -1.442695, %v1470_v1 }
 0x1b4   : > { %2407 = vpow2.f32 %v2017_v28  ;;  %v1474_v13 = vadd.f32 %v2918_v2, %v1435_v17  ;;  %v2026_v31 = vmul.f32 -1.442695, %v1471_v15  ;;  %v1475_v35 = vadd.f32 %v2918_v2, %v1436_v20 }
 0x1b5   : > { %2409 = vpow2.f32 %v2018_v42  ;;  %v2027_v39 = vmul.f32 -1.442695, %v1472_v19  ;;  %v1476_v40 = vadd.f32 %v2918_v2, %v1437_v24  ;;  %v1440_v42 = vld [vmem:[#allocation2 + $0xd0] sm:$0xff]  ;;  %v1477_v45 = vadd.f32 %v2918_v2, %v1438_v30 }
 0x1b6   : > { %2411 = vpow2.f32 %v2019_v43  ;;  %v2028_v43 = vmul.f32 -1.442695, %v1473_v22 }
 0x1b7   : > { %2413 = vpow2.f32 %v2020_v47  ;;  %v1441_v47 = vld [vmem:[#allocation2 + $0x10] sm:$0xff] }
 0x1b8   : > { %2415 = vpow2.f32 %v2021_v18  ;;  %v2029_v18 = vmul.f32 -1.442695, %v1474_v13 }
 0x1b9   : > { %v2392_v52 = vpop.eup %2391  ;;  %2417 = vpow2.f32 %v2022_v50  ;;  %v1478_v50 = vadd.f32 %v2918_v2, %v1439_v37 }
 0x1ba   : > { %v2394_v54 = vpop.eup %2393  ;;  %v1582_v55 = vadd.f32 1.0, %v2392_v52  ;;  %2419 = vpow2.f32 %v2023_v51  ;;  %v1442_v51 = vld [vmem:[#allocation2 + $0x28] sm:$0xff]  ;;  %v2030_v52 = vmul.f32 -1.442695, %v1475_v35 }
 0x1bb   : > { %v2396_v56 = vpop.eup %2395  ;;  %v1583_v44 = vadd.f32 1.0, %v2394_v54  ;;  %2421 = vpow2.f32 %v2024_v34  ;;  %v1479_v54 = vadd.f32 %v2918_v2, %v1440_v42 }
 0x1bc   : > { %v2398_v46 = vpop.eup %2397  ;;  %2423 = vrcp.f32 %v1582_v55  ;;  %v1584_v57 = vadd.f32 1.0, %v2396_v56  ;;  %v1443_v55 = vld [vmem:[#allocation2 + $0xa0] sm:$0xff] }
 0x1bd   : > { %v2400_v58 = vpop.eup %2399  ;;  %2425 = vrcp.f32 %v1583_v44  ;;  %v1585_v60 = vadd.f32 1.0, %v2398_v46  ;;  %v2031_v44 = vmul.f32 -1.442695, %v1476_v40  ;;  %v1480_v46 = vadd.f32 %v2918_v2, %v1441_v47 }
 0x1be   : > { %v2402_v62 = vpop.eup %2401  ;;  %2427 = vrcp.f32 %v1584_v57  ;;  %v1586_v63 = vadd.f32 1.0, %v2400_v58  ;;  %v1444_v57 = vld [vmem:[#allocation2 + $0xf8] sm:$0xff] }
 0x1bf   : > { %v2404_v33 = vpop.eup %2403  ;;  %2429 = vrcp.f32 %v1585_v60  ;;  %v1587_v48 = vadd.f32 1.0, %v2402_v62  ;;  %v2032_v60 = vmul.f32 -1.442695, %v1477_v45  ;;  %v1481_v62 = vadd.f32 %v2918_v2, %v1442_v51 }
 0x1c0   : > { %v2406_v53 = vpop.eup %2405  ;;  %2431 = vrcp.f32 %v1586_v63  ;;  %v1588_v0 = vadd.f32 1.0, %v2404_v33  ;;  %v1445_v63 = vld [vmem:[#allocation2 + $0x20] sm:$0xff]  ;;  %v1483_v38 = vadd.f32 %v2918_v2, %v1444_v57 }
 0x1c1   : > { %v2408_v36 = vpop.eup %2407  ;;  %2433 = vrcp.f32 %v1587_v48  ;;  %v1589_v3 = vadd.f32 1.0, %v2406_v53  ;;  %v2033_v48 = vmul.f32 -1.442695, %v1478_v50  ;;  %v1482_v53 = vadd.f32 %v2918_v2, %v1443_v55 }
 0x1c2   : > { %v2410_v4 = vpop.eup %2409  ;;  %2435 = vrcp.f32 %v1588_v0  ;;  %v1590_v5 = vadd.f32 1.0, %v2408_v36  ;;  %v1446_v0 = vld [vmem:[#allocation2 + $0x98] sm:$0xff]  ;;  %v1484_v61 = vadd.f32 %v2918_v2, %v1445_v63  ;;  %v2038_v10 = vmul.f32 -1.442695, %v1483_v38 }
 0x1c3   : > { %v2412_v6 = vpop.eup %2411  ;;  %2437 = vrcp.f32 %v1589_v3  ;;  %v1591_v7 = vadd.f32 1.0, %v2410_v4  ;;  %v2034_v3 = vmul.f32 -1.442695, %v1479_v54  ;;  %v1485_v8 = vadd.f32 %v2918_v2, %v1446_v0 }
 0x1c4   : > { %v2414_v9 = vpop.eup %2413  ;;  %2439 = vrcp.f32 %v1590_v5  ;;  %v1592_v59 = vadd.f32 1.0, %v2412_v6  ;;  %v2035_v5 = vmul.f32 -1.442695, %v1480_v46 }
 0x1c5   : > { %v2416_v11 = vpop.eup %2415  ;;  %2441 = vrcp.f32 %v1591_v7  ;;  %v1593_v12 = vadd.f32 1.0, %v2414_v9  ;;  %v2036_v7 = vmul.f32 -1.442695, %v1481_v62  ;;  %v2040_v17 = vmul.f32 -1.442695, %v1485_v8 }
 0x1c6   : > { %v2418_v14 = vpop.eup %2417  ;;  %2443 = vrcp.f32 %v1592_v59  ;;  %v1594_v16 = vadd.f32 1.0, %v2416_v11  ;;  %v2037_v59 = vmul.f32 -1.442695, %v1482_v53 }
 0x1c7   : > { %v2420_v21 = vpop.eup %2419  ;;  %2445 = vrcp.f32 %v1593_v12  ;;  %v1595_v23 = vadd.f32 1.0, %v2418_v14  ;;  %v2039_v12 = vmul.f32 -1.442695, %v1484_v61 }
 0x1c8   : > { %v2422_v25 = vpop.eup %2421  ;;  %2447 = vrcp.f32 %v1594_v16  ;;  %v1596_v26 = vadd.f32 1.0, %v2420_v21 }
 0x1c9   : > { %v2424_v32 = vpop.eup %2423  ;;  %2449 = vrcp.f32 %v1595_v23  ;;  %v1597_v29 = vadd.f32 1.0, %v2422_v25 }
 0x1ca   : > { %v2426_v28 = vpop.eup %2425  ;;  %1678 = vst [vmem:[%s2801_s30] sm:$0xff] %v2424_v32  ;;  %2451 = vrcp.f32 %v1596_v26 }
 0x1cb   : > { %v2428_v41 = vpop.eup %2427  ;;  %1679 = vst [vmem:[%s2801_s30 + $0x8] sm:$0xff] %v2426_v28  ;;  %2453 = vrcp.f32 %v1597_v29 }
 0x1cc   : > { %v2430_v49 = vpop.eup %2429  ;;  %1680 = vst [vmem:[%s2801_s30 + $0x10] sm:$0xff] %v2428_v41  ;;  %2455 = vpow2.f32 %v2025_v27 }
 0x1cd   : > { %v2432_v34 = vpop.eup %2431  ;;  %1681 = vst [vmem:[%s2801_s30 + $0x18] sm:$0xff] %v2430_v49  ;;  %2457 = vpow2.f32 %v2026_v31 }
 0x1ce   : > { %v2434_v56 = vpop.eup %2433  ;;  %1682 = vst [vmem:[%s2801_s30 + $0x20] sm:$0xff] %v2432_v34  ;;  %2459 = vpow2.f32 %v2027_v39 }
 0x1cf   : > { %v2436_v58 = vpop.eup %2435  ;;  %1683 = vst [vmem:[%s2801_s30 + $0x28] sm:$0xff] %v2434_v56  ;;  %2461 = vpow2.f32 %v2028_v43 }
 0x1d0   : > { %v2438_v33 = vpop.eup %2437  ;;  %1684 = vst [vmem:[%s2801_s30 + $0x30] sm:$0xff] %v2436_v58  ;;  %2463 = vpow2.f32 %v2029_v18 }
 0x1d1   : > { %v2440_v36 = vpop.eup %2439  ;;  %1685 = vst [vmem:[%s2801_s30 + $0x38] sm:$0xff] %v2438_v33  ;;  %2465 = vpow2.f32 %v2030_v52 }
 0x1d2   : > { %v2442_v4 = vpop.eup %2441  ;;  %1686 = vst [vmem:[%s2801_s30 + $0x40] sm:$0xff] %v2440_v36  ;;  %2467 = vpow2.f32 %v2031_v44 }
 0x1d3   : > { %v2444_v6 = vpop.eup %2443  ;;  %1687 = vst [vmem:[%s2801_s30 + $0x48] sm:$0xff] %v2442_v4  ;;  %2469 = vpow2.f32 %v2032_v60 }
 0x1d4   : > { %v2446_v9 = vpop.eup %2445  ;;  %1688 = vst [vmem:[%s2801_s30 + $0x50] sm:$0xff] %v2444_v6  ;;  %2471 = vpow2.f32 %v2033_v48 }
 0x1d5   : > { %v2448_v1 = vpop.eup %2447  ;;  %1689 = vst [vmem:[%s2801_s30 + $0x58] sm:$0xff] %v2446_v9  ;;  %2473 = vpow2.f32 %v2034_v3 }
 0x1d6   : > { %v2450_v11 = vpop.eup %2449  ;;  %1690 = vst [vmem:[%s2801_s30 + $0x60] sm:$0xff] %v2448_v1  ;;  %2475 = vpow2.f32 %v2035_v5 }
 0x1d7   : > { %v2452_v15 = vpop.eup %2451  ;;  %1691 = vst [vmem:[%s2801_s30 + $0x68] sm:$0xff] %v2450_v11  ;;  %2477 = vpow2.f32 %v2036_v7 }
 0x1d8   : > { %v2454_v14 = vpop.eup %2453  ;;  %1692 = vst [vmem:[%s2801_s30 + $0x70] sm:$0xff] %v2452_v15  ;;  %2479 = vpow2.f32 %v2037_v59 }
 0x1d9   : > { %v2456_v2 = vpop.eup %2455  ;;  %1693 = vst [vmem:[%s2801_s30 + $0x78] sm:$0xff] %v2454_v14  ;;  %2481 = vpow2.f32 %v2038_v10 }
 0x1da   : > { %v2458_v16 = vpop.eup %2457  ;;  %v1598_v19 = vadd.f32 1.0, %v2456_v2  ;;  %2483 = vpow2.f32 %v2039_v12 }
 0x1db   : > { %v2460_v20 = vpop.eup %2459  ;;  %v1599_v21 = vadd.f32 1.0, %v2458_v16  ;;  %2485 = vpow2.f32 %v2040_v17 }
 0x1dc   : > { %v2462_v23 = vpop.eup %2461  ;;  %2487 = vrcp.f32 %v1598_v19  ;;  %v1600_v22 = vadd.f32 1.0, %v2460_v20 }
 0x1dd   : > { %v2464_v24 = vpop.eup %2463  ;;  %2489 = vrcp.f32 %v1599_v21  ;;  %v1601_v25 = vadd.f32 1.0, %v2462_v23 }
 0x1de   : > { %v2466_v26 = vpop.eup %2465  ;;  %2491 = vrcp.f32 %v1600_v22  ;;  %v1602_v27 = vadd.f32 1.0, %v2464_v24 }
 0x1df   : > { %v2468_v13 = vpop.eup %2467  ;;  %2493 = vrcp.f32 %v1601_v25  ;;  %v1603_v30 = vadd.f32 1.0, %v2466_v26 }
 0x1e0   : > { %v2470_v32 = vpop.eup %2469  ;;  %2495 = vrcp.f32 %v1602_v27  ;;  %v1604_v29 = vadd.f32 1.0, %v2468_v13 }
 0x1e1   : > { %v2472_v31 = vpop.eup %2471  ;;  %2497 = vrcp.f32 %v1603_v30  ;;  %v1605_v35 = vadd.f32 1.0, %v2470_v32 }
 0x1e2   : > { %v2474_v37 = vpop.eup %2473  ;;  %2499 = vrcp.f32 %v1604_v29  ;;  %v1606_v28 = vadd.f32 1.0, %v2472_v31 }
 0x1e3   : > { %v2476_v39 = vpop.eup %2475  ;;  %2501 = vrcp.f32 %v1605_v35  ;;  %v1607_v40 = vadd.f32 1.0, %v2474_v37 }
 0x1e4   : > { %v2478_v42 = vpop.eup %2477  ;;  %2503 = vrcp.f32 %v1606_v28  ;;  %v1608_v41 = vadd.f32 1.0, %v2476_v39 }
 0x1e5   : > { %v2480_v43 = vpop.eup %2479  ;;  %2505 = vrcp.f32 %v1607_v40  ;;  %v1609_v45 = vadd.f32 1.0, %v2478_v42 }
 0x1e6   : > { %v2482_v47 = vpop.eup %2481  ;;  %2507 = vrcp.f32 %v1608_v41  ;;  %v1610_v49 = vadd.f32 1.0, %v2480_v43 }
 0x1e7   : > { %v2484_v18 = vpop.eup %2483  ;;  %2509 = vrcp.f32 %v1609_v45  ;;  %v1611_v50 = vadd.f32 1.0, %v2482_v47 }
 0x1e8   : > { %v2486_v51 = vpop.eup %2485  ;;  %2511 = vrcp.f32 %v1610_v49  ;;  %v1612_v34 = vadd.f32 1.0, %v2484_v18 }
 0x1e9   : > { %v2488_v52 = vpop.eup %2487  ;;  %2513 = vrcp.f32 %v1611_v50  ;;  %v1613_v54 = vadd.f32 1.0, %v2486_v51 }
 0x1ea   : > { %v2490_v55 = vpop.eup %2489  ;;  %1694 = vst [vmem:[%s2801_s30 + $0x80] sm:$0xff] %v2488_v52  ;;  %2515 = vrcp.f32 %v1612_v34 }
 0x1eb   : > { %v2492_v56 = vpop.eup %2491  ;;  %1695 = vst [vmem:[%s2801_s30 + $0x88] sm:$0xff] %v2490_v55  ;;  %2517 = vrcp.f32 %v1613_v54 }
 0x1ec   : > { %v2494_v44 = vpop.eup %2493  ;;  %1696 = vst [vmem:[%s2801_s30 + $0x90] sm:$0xff] %v2492_v56 }
 0x1ed   : > { %v2496_v46 = vpop.eup %2495  ;;  %1697 = vst [vmem:[%s2801_s30 + $0x98] sm:$0xff] %v2494_v44 }
 0x1ee   : > { %v2498_v57 = vpop.eup %2497  ;;  %1698 = vst [vmem:[%s2801_s30 + $0xa0] sm:$0xff] %v2496_v46 }
 0x1ef   : > { %v2500_v58 = vpop.eup %2499  ;;  %1699 = vst [vmem:[%s2801_s30 + $0xa8] sm:$0xff] %v2498_v57 }
 0x1f0   : > { %v2502_v60 = vpop.eup %2501  ;;  %1700 = vst [vmem:[%s2801_s30 + $0xb0] sm:$0xff] %v2500_v58 }
 0x1f1   : > { %v2504_v62 = vpop.eup %2503  ;;  %1701 = vst [vmem:[%s2801_s30 + $0xb8] sm:$0xff] %v2502_v60 }
 0x1f2   : > { %v2506_v63 = vpop.eup %2505  ;;  %1702 = vst [vmem:[%s2801_s30 + $0xc0] sm:$0xff] %v2504_v62 }
 0x1f3   : > { %v2508_v33 = vpop.eup %2507  ;;  %1703 = vst [vmem:[%s2801_s30 + $0xc8] sm:$0xff] %v2506_v63 }
 0x1f4   : > { %v2510_v48 = vpop.eup %2509  ;;  %1704 = vst [vmem:[%s2801_s30 + $0xd0] sm:$0xff] %v2508_v33 }
 0x1f5   : > { %v2512_v53 = vpop.eup %2511  ;;  %1705 = vst [vmem:[%s2801_s30 + $0xd8] sm:$0xff] %v2510_v48 }
 0x1f6   : > { %v2514_v0 = vpop.eup %2513  ;;  %1706 = vst [vmem:[%s2801_s30 + $0xe0] sm:$0xff] %v2512_v53 }
 0x1f7   : > { %v2516_v36 = vpop.eup %2515  ;;  %1707 = vst [vmem:[%s2801_s30 + $0xe8] sm:$0xff] %v2514_v0 }
 0x1f8   : > { %v2518_v3 = vpop.eup %2517  ;;  %1708 = vst [vmem:[%s2801_s30 + $0xf0] sm:$0xff] %v2516_v36 }
 0x1f9   : > { %1709 = vst [vmem:[%s2801_s30 + $0xf8] sm:$0xff] %v2518_v3 }
 0x1fa PF: > { %s13_s18 = sadd.s32 1, %s2573_s18   ;;  %s3009_s12 = smov %s2553_s13 }
 0x1fb   : > { %p10_p0 = scmp.ge.s32.totalorder %s13_s18, 8   ;;  %s3010_s13 = smov %s2647_s25 }
 0x1fc   : > { %s3011_s14 = smov %s2565_s16  ;;  %s3012_s15 = smov %s2569_s17 }
 0x1fd   : > { %s3013_s16 = smov %s3016_s19  ;;  %s3014_s17 = smov %s3020_s20 }
 0x1fe   :  { %12 = sbr.rel (!%p10_p0) target bundleno = 4 (0x4), region = 113 }

</bundles_post_ra>
